<compile_context>
chip_gen: v5e
topology: v5e:2x2
jax: 0.10.0
libtpu: 0.0.40
codegen_flags: <defaults>
</compile_context>

<pallas_src>
import functools

import jax
import jax.numpy as jnp
import numpy as np
from jax.experimental import pallas as pl
from jax.experimental.pallas import tpu as pltpu

_LANE = 128


def _round_up(x, m):
    return (x + m - 1) // m * m


def _vmem_capacity_bytes():
    """Physical VMEM per core; generation-aware with a conservative (v7x) fallback."""
    try:
        info = pltpu.get_tpu_info()
        cap = getattr(info, "vmem_capacity_bytes", None)
        if cap:
            return int(cap)
    except Exception:
        pass
    return 64 * 1024 * 1024


def _compiler_params():
    cap = _vmem_capacity_bytes()
    return pltpu.CompilerParams(
        dimension_semantics=("parallel", "parallel"),      # megacore-friendly on v7x
        vmem_limit_bytes=int(0.75 * cap),
    )


def _pick_tile_h(n, h, per_row_bytes, fixed_bytes=0, requested=None):
    """Budget-driven row-band height: largest divisor of h that fits the VMEM budget."""
    if requested is not None:
        assert h % requested == 0, (h, requested)
        return requested
    budget = int(0.55 * _vmem_capacity_bytes())            # headroom for spills/metadata
    max_th = max(1, (budget - fixed_bytes) // max(per_row_bytes, 1))
    divs = [d for d in range(1, h + 1) if h % d == 0 and d <= max_th] or [1]
    # v7x has 2 TensorCores: keep at least 2 grid steps so both cores get work.
    while len(divs) > 1 and n * (h // divs[-1]) < 2:
        divs.pop()
    return divs[-1]


# ---------------- conv (folded K=9*Cin matmul) + optional fused input BN/act + BN stats --
def _conv_stats_kernel(xm_ref, xt_ref, xb_ref, sc_ref, sh_ref, w_ref, y_ref, st_ref,
                       *, fuse_in, slope):
    """3x3 SAME conv over one halo'd row band, single K=9*Cin MXU matmul.

    xm_ref: (1, TH, W, Cin) bf16  center rows (raw previous-stage conv output if fuse_in)
    xt_ref: (1, 1,  W, Cin) bf16  row above the band (index clamped at the edge)
    xb_ref: (1, 1,  W, Cin) bf16  row below the band (index clamped at the edge)
    sc_ref: (1, Cin) f32          previous stage's folded BN scale (used iff fuse_in)
    sh_ref: (1, Cin) f32          previous stage's folded BN shift (used iff fuse_in)
    w_ref:  (9*Cin, Coutp) bf16   conv weights, k = 3*dy + dx, Cout zero-padded to 128n
    y_ref:  (1, TH, W, Coutp) bf16 raw conv output (pre-BN)
    st_ref: (1, 1, 2, Coutp) f32  per-tile [sum, sum_of_squares] over the band
    """
    i = pl.program_id(1)
    last = pl.num_programs(1) - 1
    _, th, w, cin = xm_ref.shape
    coutp = w_ref.shape[1]

    mid = xm_ref[0]                    # (TH, W, Cin)  bf16
    top = xt_ref[0]                    # (1,  W, Cin)
    bot = xb_ref[0]

    if fuse_in:
        # Previous stage's BatchNorm affine + LeakyReLU, applied on the fly (f32 math,
        # bf16 result).  Lane-padded channels map 0 -> 0 (scale=shift=0 there).
        sc = sc_ref[...].reshape(1, 1, cin)
        sh = sh_ref[...].reshape(1, 1, cin)

        def in_act(v):
            z = v.astype(jnp.float32) * sc + sh
            return jnp.where(z >= 0, z, slope * z).astype(jnp.bfloat16)

        mid, top, bot = in_act(mid), in_act(top), in_act(bot)

    # Conv SAME zero padding: clamped halo rows lie outside the image at the edges.
    # (Must be zeroed AFTER the fused affine -- the conv pads the activation, not x.)
    top = jnp.where(i == 0, jnp.zeros_like(top), top)
    bot = jnp.where(i == last, jnp.zeros_like(bot), bot)
    band = jnp.concatenate([top, mid, bot], axis=0)          # (TH+2, W, Cin) bf16

    # Width zero padding in VMEM (avoids an XLA pad copy of the inter-stage activation).
    zcol = jnp.zeros((th + 2, 1, cin), band.dtype)
    band = jnp.concatenate([zcol, band, zcol], axis=1)       # (TH+2, W+2, Cin) bf16

    # im2col inside VMEM (bf16): 9 shifted views -> ONE matmul with K = 9*Cin.
    slabs = [band[dy:dy + th, dx:dx + w, :] for dy in range(3) for dx in range(3)]
    patches = jnp.concatenate(slabs, axis=-1).reshape(th * w, 9 * cin)

    acc = jnp.dot(patches, w_ref[...], preferred_element_type=jnp.float32)  # f32 acc

    y_ref[...] = acc.reshape(1, th, w, coutp).astype(y_ref.dtype)           # bf16 store

    # Single-pass BatchNorm partials from the f32 accumulator (not the bf16 store),
    # written with a single store.
    s1 = jnp.sum(acc, axis=0, keepdims=True)                 # (1, Coutp)
    s2 = jnp.sum(acc * acc, axis=0, keepdims=True)
    st_ref[...] = jnp.concatenate([s1, s2], axis=0).reshape(1, 1, 2, coutp)


# ----------------------------- final BN affine + optional LeakyReLU ----------------------
def _bn_act_kernel(y_ref, sc_ref, sh_ref, o_ref, *, apply_act, slope):
    z = y_ref[...].astype(jnp.float32) * sc_ref[...] + sh_ref[...]
    if apply_act:
        z = jnp.where(z >= 0, z, slope * z)
    o_ref[...] = z.astype(o_ref.dtype)


# ------------------------------------- stage wrappers ------------------------------------
def _conv_bn_stats(x, w_hwio, gamma, beta, *, in_scale=None, in_shift=None,
                   eps=1e-5, slope=0.01, tile_h=None):
    """3x3 SAME conv (no affine applied yet) + this-stage batch-BN statistics.

    If in_scale/in_shift are given, x is the *raw* previous-stage conv output and the
    previous stage's BN affine + LeakyReLU are applied inside the kernel.
    Returns: y (N,H,W,Coutp) bf16 raw conv output, and this stage's folded BN
             scale/shift, each (Coutp,) f32.
    """
    n, h, w, cin = x.shape
    assert w_hwio.shape[:3] == (3, 3, cin), (w_hwio.shape, cin)
    cout = w_hwio.shape[-1]
    coutp = _round_up(cout, _LANE)                  # lane-dense output stores

    # VMEM budget per row of the band (bytes): 2x center band + 2x y block (bf16,
    # double-buffered), bf16 patches slab, f32 accumulator.
    per_row = 2 * w * cin * 2 + 2 * w * coutp * 2 + w * 9 * cin * 2 + w * coutp * 4
    fixed = 2 * 9 * cin * coutp * 2 + 4 * w * cin * 2 + 4 * 2 * coutp * 4
    th = _pick_tile_h(n, h, per_row, fixed, tile_h)
    nt = h // th

    # Weights (3,3,Cin,Cout) -> (9*Cin, Coutp) bf16, Cout zero-padded to a 128 multiple.
    wk = jnp.pad(w_hwio, ((0, 0), (0, 0), (0, 0), (0, coutp - cout)))
    wk = wk.reshape(9 * cin, coutp).astype(jnp.bfloat16)

    fuse_in = in_scale is not None
    if not fuse_in:                                  # unread dummies (tiny DMA)
        in_scale = jnp.ones((cin,), jnp.float32)
        in_shift = jnp.zeros((cin,), jnp.float32)
    sc_in = in_scale.reshape(1, cin).astype(jnp.float32)
    sh_in = in_shift.reshape(1, cin).astype(jnp.float32)

    kern = functools.partial(_conv_stats_kernel, fuse_in=fuse_in, slope=slope)

    y, part = pl.pallas_call(
        kern,
        grid=(n, nt),
        in_specs=[
            # auto-pipelined center band
            pl.BlockSpec((1, th, w, cin), lambda b, i: (b, i, 0, 0)),
            # one-row halos; block size 1 on H => index_map returns row indices, clamped
            # at the image edge (the kernel substitutes the conv zero padding there).
            pl.BlockSpec((1, 1, w, cin),
                         lambda b, i: (b, jnp.maximum(i * th - 1, 0), 0, 0)),
            pl.BlockSpec((1, 1, w, cin),
                         lambda b, i: (b, jnp.minimum(i * th + th, h - 1), 0, 0)),
            # previous stage's folded BN affine (per-channel scale / shift)
            pl.BlockSpec((1, cin), lambda b, i: (0, 0)),
            pl.BlockSpec((1, cin), lambda b, i: (0, 0)),
            # weights: whole array, resident across the grid
            pl.BlockSpec((9 * cin, coutp), lambda b, i: (0, 0)),
        ],
        out_specs=(
            pl.BlockSpec((1, th, w, coutp), lambda b, i: (b, i, 0, 0)),
            pl.BlockSpec((1, 1, 2, coutp), lambda b, i: (b, i, 0, 0)),
        ),
        out_shape=(
            jax.ShapeDtypeStruct((n, h, w, coutp), jnp.bfloat16),
            jax.ShapeDtypeStruct((n, nt, 2, coutp), jnp.float32),
        ),
        compiler_params=_compiler_params(),
    )(x, x, x, sc_in, sh_in, wk)

    # Tiny (Coutp,)-sized reduction + BN affine folding outside the kernel.
    # TODO(synk): for very large N*H*W, merge per-tile (mean, M2) Welford-style instead
    # of E[x^2]-E[x]^2 to avoid cancellation.
    m = float(n * h * w)
    mean = jnp.sum(part[:, :, 0, :], axis=(0, 1)) / m
    var = jnp.maximum(jnp.sum(part[:, :, 1, :], axis=(0, 1)) / m - mean * mean, 0.0)
    gamma_p = jnp.pad(gamma.astype(jnp.float32), (0, coutp - cout))
    beta_p = jnp.pad(beta.astype(jnp.float32), (0, coutp - cout))
    scale = gamma_p * jax.lax.rsqrt(var + eps)
    shift = beta_p - mean * scale
    return y, scale, shift


def _bn_act(y, scale, shift, *, apply_act, slope=0.01, tile_h=None):
    """Final-stage BN affine (+ LeakyReLU).  y: (N,H,W,Coutp) bf16 -> bf16."""
    n, h, w, coutp = y.shape
    per_row = 2 * w * coutp * 2 + 2 * w * coutp * 2 + w * coutp * 4
    th = _pick_tile_h(n, h, per_row, 0, tile_h)
    return pl.pallas_call(
        functools.partial(_bn_act_kernel, apply_act=apply_act, slope=slope),
        grid=(n, h // th),
        in_specs=[
            pl.BlockSpec((1, th, w, coutp), lambda b, i: (b, i, 0, 0)),
            pl.BlockSpec((1, coutp), lambda b, i: (0, 0)),
            pl.BlockSpec((1, coutp), lambda b, i: (0, 0)),
        ],
        out_specs=pl.BlockSpec((1, th, w, coutp), lambda b, i: (b, i, 0, 0)),
        out_shape=jax.ShapeDtypeStruct((n, h, w, coutp), jnp.bfloat16),
        compiler_params=_compiler_params(),
    )(y, scale.reshape(1, coutp), shift.reshape(1, coutp))


def wnet_node_forward(x_nchw, params, *, last=False, tile_h=None):
    """WNetNode forward. x_nchw: (N, Cin, H, W) f32 -> (N, Cout, H, W) f32.

    Conv biases (params['b1'] / params['b2']) are intentionally not used: training-mode
    BatchNorm's batch-mean subtraction cancels them exactly.
    """
    x = jnp.transpose(x_nchw, (0, 2, 3, 1)).astype(jnp.bfloat16)   # NCHW f32 -> NHWC bf16

    cout1 = params["w1"].shape[-1]
    cout2 = params["w2"].shape[-1]

    # Stage 1: conv1 + BN1 statistics.  BN1 affine + LeakyReLU are folded into stage 2.
    y1, sc1, sh1 = _conv_bn_stats(x, params["w1"], params["g1"], params["be1"],
                                  tile_h=tile_h)

    # Stage 2: conv2 consumes the raw, lane-padded conv1 output directly (no slice, no
    # pad of the activation); w2's input channels are zero-padded to match (exact: the
    # padded channels are exactly zero after the fused affine).
    cinp2 = y1.shape[-1]
    w2p = jnp.pad(params["w2"], ((0, 0), (0, 0), (0, cinp2 - cout1), (0, 0)))
    y2, sc2, sh2 = _conv_bn_stats(y1, w2p, params["g2"], params["be2"],
                                  in_scale=sc1, in_shift=sh1, tile_h=tile_h)

    # Final pass: BN2 affine (+ LeakyReLU unless last).
    out_p = _bn_act(y2, sc2, sh2, apply_act=not last, tile_h=tile_h)

    # Single channel slice + layout transpose at the very end (one fused XLA copy).
    # TODO(synk): for W >= 128, emit NCHW directly from the final kernel instead.
    out = out_p[..., :cout2]
    return jnp.transpose(out, (0, 3, 1, 2)).astype(jnp.float32)
    # TODO(synk): BatchNorm running_mean/running_var momentum updates (module state
    # mutation) are not modeled; only the forward batch-statistics normalization is.


# ----------------------------------- plain-JAX reference ---------------------------------
def _ref_stage(x_nhwc, w_hwio, b, g, be, apply_act, eps=1e-5, slope=0.01):
    y = jax.lax.conv_general_dilated(
        x_nhwc, w_hwio, window_strides=(1, 1), padding="SAME",
        dimension_numbers=("NHWC", "HWIO", "NHWC"))
    y = y + b
    mean = jnp.mean(y, axis=(0, 1, 2), keepdims=True)
    var = jnp.mean((y - mean) ** 2, axis=(0, 1, 2), keepdims=True)
    y = (y - mean) * jax.lax.rsqrt(var + eps) * g + be
    if apply_act:
        y = jnp.where(y >= 0, y, slope * y)
    return y


def wnet_node_ref(x_nchw, p, *, last=False):
    x = jnp.transpose(x_nchw, (0, 2, 3, 1))
    o1 = _ref_stage(x, p["w1"], p["b1"], p["g1"], p["be1"], True)
    o2 = _ref_stage(o1, p["w2"], p["b2"], p["g2"], p["be2"], not last)
    return jnp.transpose(o2, (0, 3, 1, 2))


# ----------------------------------------- main -------------------------------------------
if __name__ == "__main__":
    N, Cin, Cout, H, W = 2, 4, 8, 16, 16
    key = jax.random.PRNGKey(0)
    k_x, k_w1, k_b1, k_w2, k_b2 = jax.random.split(key, 5)

    x = jax.random.normal(k_x, (N, Cin, H, W), dtype=jnp.float32)

    # Deterministic synthetic parameters (PyTorch conv weight layout: (Cout, Cin, 3, 3)).
    w1_oihw = 0.1 * jax.random.normal(k_w1, (Cout, Cin, 3, 3), dtype=jnp.float32)
    w2_oihw = 0.1 * jax.random.normal(k_w2, (Cout, Cout, 3, 3), dtype=jnp.float32)
    params = {
        "w1": jnp.transpose(w1_oihw, (2, 3, 1, 0)),   # -> HWIO
        "b1": 0.05 * jax.random.normal(k_b1, (Cout,), dtype=jnp.float32),
        "g1": jnp.ones((Cout,), jnp.float32),          # BatchNorm weight init
        "be1": jnp.zeros((Cout,), jnp.float32),        # BatchNorm bias init
        "w2": jnp.transpose(w2_oihw, (2, 3, 1, 0)),
        "b2": 0.05 * jax.random.normal(k_b2, (Cout,), dtype=jnp.float32),
        "g2": jnp.ones((Cout,), jnp.float32),
        "be2": jnp.zeros((Cout,), jnp.float32),
    }

    # tile_h=8 -> 2 row-band tiles per image: exercises the halo / multi-tile grid path.
    fwd = jax.jit(lambda a: wnet_node_forward(a, params, last=False, tile_h=8))
    out = jax.block_until_ready(fwd(x))
    assert out.shape == (N, Cout, H, W), out.shape

    ref = jax.block_until_ready(wnet_node_ref(x, params, last=False))
    # bf16 MXU operands and bf16 inter-stage activations loosen the tolerance vs. the
    # pure-f32 reference (BN statistics are still accumulated in f32).
    np.testing.assert_allclose(np.asarray(out), np.asarray(ref), rtol=2e-2, atol=6e-2)

    print("KERNEL_OK")
</pallas_src>

<mosaic_0001>
module attributes {stable_mosaic.version = 11 : i64} {
  func.func @_conv_stats_kernel(%arg0: i32, %arg1: i32, %arg2: memref<1x8x16x4xbf16, #tpu.memory_space<vmem>>, %arg3: memref<1x1x16x4xbf16, #tpu.memory_space<vmem>>, %arg4: memref<1x1x16x4xbf16, #tpu.memory_space<vmem>>, %arg5: memref<1x4xf32, #tpu.memory_space<vmem>>, %arg6: memref<1x4xf32, #tpu.memory_space<vmem>>, %arg7: memref<36x128xbf16, #tpu.memory_space<vmem>>, %arg8: memref<1x8x16x128xbf16, #tpu.memory_space<vmem>>, %arg9: memref<1x1x2x128xf32, #tpu.memory_space<vmem>>) attributes {dimension_semantics = [#tpu.dimension_semantics<parallel>, #tpu.dimension_semantics<parallel>], iteration_bounds = array<i64: 2, 2>, scalar_prefetch = 0 : i64, scratch_operands = 0 : i64, tpu.core_type = #tpu.core_type<tc>, window_params = [{transform_indices = @transform_0, window_bounds = array<i64: 1, 8, 16, 4>}, {transform_indices = @transform_1, window_bounds = array<i64: 1, 1, 16, 4>}, {transform_indices = @transform_2, window_bounds = array<i64: 1, 1, 16, 4>}, {pipeline_mode = #tpu.pipeline_mode<synchronous>, transform_indices = @transform_3, window_bounds = array<i64: 1, 4>}, {pipeline_mode = #tpu.pipeline_mode<synchronous>, transform_indices = @transform_4, window_bounds = array<i64: 1, 4>}, {pipeline_mode = #tpu.pipeline_mode<synchronous>, transform_indices = @transform_5, window_bounds = array<i64: 36, 128>}, {transform_indices = @transform_6, window_bounds = array<i64: 1, 8, 16, 128>}, {transform_indices = @transform_7, window_bounds = array<i64: 1, 1, 2, 128>}]} {
    %c0 = arith.constant 0 : index
    %c0_0 = arith.constant 0 : index
    %c0_1 = arith.constant 0 : index
    %c0_2 = arith.constant 0 : index
    %0 = vector.load %arg2[%c0, %c0_0, %c0_1, %c0_2] : memref<1x8x16x4xbf16, #tpu.memory_space<vmem>>, vector<1x8x16x4xbf16>
    %1 = vector.shape_cast %0 : vector<1x8x16x4xbf16> to vector<8x16x4xbf16>
    %c0_3 = arith.constant 0 : index
    %c0_4 = arith.constant 0 : index
    %c0_5 = arith.constant 0 : index
    %c0_6 = arith.constant 0 : index
    %2 = vector.load %arg3[%c0_3, %c0_4, %c0_5, %c0_6] : memref<1x1x16x4xbf16, #tpu.memory_space<vmem>>, vector<1x1x16x4xbf16>
    %3 = vector.shape_cast %2 : vector<1x1x16x4xbf16> to vector<1x16x4xbf16>
    %c0_7 = arith.constant 0 : index
    %c0_8 = arith.constant 0 : index
    %c0_9 = arith.constant 0 : index
    %c0_10 = arith.constant 0 : index
    %4 = vector.load %arg4[%c0_7, %c0_8, %c0_9, %c0_10] : memref<1x1x16x4xbf16, #tpu.memory_space<vmem>>, vector<1x1x16x4xbf16>
    %5 = vector.shape_cast %4 : vector<1x1x16x4xbf16> to vector<1x16x4xbf16>
    %c0_i32 = arith.constant 0 : i32
    %6 = arith.cmpi eq, %arg1, %c0_i32 : i32
    %cst = arith.constant 0.000000e+00 : bf16
    %7 = vector.broadcast %cst : bf16 to vector<1x16x4xbf16>
    %8 = arith.select %6, %7, %3 : vector<1x16x4xbf16>
    %c1_i32 = arith.constant 1 : i32
    %9 = arith.cmpi eq, %arg1, %c1_i32 : i32
    %cst_11 = arith.constant 0.000000e+00 : bf16
    %10 = vector.broadcast %cst_11 : bf16 to vector<1x16x4xbf16>
    %11 = arith.select %9, %10, %5 : vector<1x16x4xbf16>
    %12 = tpu.concatenate %8, %1, %11 in 0 : vector<1x16x4xbf16>, vector<8x16x4xbf16>, vector<1x16x4xbf16> -> vector<10x16x4xbf16>
    %cst_12 = arith.constant 0.000000e+00 : bf16
    %13 = vector.broadcast %cst_12 : bf16 to vector<10x1x4xbf16>
    %14 = tpu.concatenate %13, %12, %13 in 1 : vector<10x1x4xbf16>, vector<10x16x4xbf16>, vector<10x1x4xbf16> -> vector<10x18x4xbf16>
    %15 = vector.extract_strided_slice %14 {offsets = [0, 0, 0], sizes = [8, 16, 4], strides = [1, 1, 1]} : vector<10x18x4xbf16> to vector<8x16x4xbf16>
    %16 = vector.extract_strided_slice %14 {offsets = [0, 1, 0], sizes = [8, 16, 4], strides = [1, 1, 1]} : vector<10x18x4xbf16> to vector<8x16x4xbf16>
    %17 = vector.extract_strided_slice %14 {offsets = [0, 2, 0], sizes = [8, 16, 4], strides = [1, 1, 1]} : vector<10x18x4xbf16> to vector<8x16x4xbf16>
    %18 = vector.extract_strided_slice %14 {offsets = [1, 0, 0], sizes = [8, 16, 4], strides = [1, 1, 1]} : vector<10x18x4xbf16> to vector<8x16x4xbf16>
    %19 = vector.extract_strided_slice %14 {offsets = [1, 1, 0], sizes = [8, 16, 4], strides = [1, 1, 1]} : vector<10x18x4xbf16> to vector<8x16x4xbf16>
    %20 = vector.extract_strided_slice %14 {offsets = [1, 2, 0], sizes = [8, 16, 4], strides = [1, 1, 1]} : vector<10x18x4xbf16> to vector<8x16x4xbf16>
    %21 = vector.extract_strided_slice %14 {offsets = [2, 0, 0], sizes = [8, 16, 4], strides = [1, 1, 1]} : vector<10x18x4xbf16> to vector<8x16x4xbf16>
    %22 = vector.extract_strided_slice %14 {offsets = [2, 1, 0], sizes = [8, 16, 4], strides = [1, 1, 1]} : vector<10x18x4xbf16> to vector<8x16x4xbf16>
    %23 = vector.extract_strided_slice %14 {offsets = [2, 2, 0], sizes = [8, 16, 4], strides = [1, 1, 1]} : vector<10x18x4xbf16> to vector<8x16x4xbf16>
    %24 = tpu.concatenate %15, %16, %17, %18, %19, %20, %21, %22, %23 in 2 : vector<8x16x4xbf16>, vector<8x16x4xbf16>, vector<8x16x4xbf16>, vector<8x16x4xbf16>, vector<8x16x4xbf16>, vector<8x16x4xbf16>, vector<8x16x4xbf16>, vector<8x16x4xbf16>, vector<8x16x4xbf16> -> vector<8x16x36xbf16>
    %25 = vector.shape_cast %24 : vector<8x16x36xbf16> to vector<128x36xbf16>
    %c0_13 = arith.constant 0 : index
    %c0_14 = arith.constant 0 : index
    %26 = vector.load %arg7[%c0_13, %c0_14] : memref<36x128xbf16, #tpu.memory_space<vmem>>, vector<36x128xbf16>
    %cst_15 = arith.constant dense<0.000000e+00> : vector<128x128xf32>
    %27 = tpu.matmul %25, %26, %cst_15 {dimension_numbers = #tpu.dot_dimension_numbers<[1], [0], [0], [1], [0, 0, 1, 1], [], []>} : vector<128x36xbf16>, vector<36x128xbf16>, vector<128x128xf32> -> vector<128x128xf32>
    %28 = vector.shape_cast %27 : vector<128x128xf32> to vector<1x8x16x128xf32>
    %29 = arith.truncf %28 : vector<1x8x16x128xf32> to vector<1x8x16x128xbf16>
    %c0_16 = arith.constant 0 : index
    %c0_17 = arith.constant 0 : index
    %c0_18 = arith.constant 0 : index
    %c0_19 = arith.constant 0 : index
    %30 = vector.load %arg8[%c0_16, %c0_17, %c0_18, %c0_19] : memref<1x8x16x128xbf16, #tpu.memory_space<vmem>>, vector<1x8x16x128xbf16>
    tpu.vector_store %arg8[%c0_16, %c0_17, %c0_18, %c0_19], %29 {strides = array<i32>} : memref<1x8x16x128xbf16, #tpu.memory_space<vmem>>, vector<1x8x16x128xbf16>,
    %cst_20 = arith.constant dense<0.000000e+00> : vector<128xf32>
    %31 = vector.multi_reduction <add>, %27, %cst_20 [0] : vector<128x128xf32> to vector<128xf32>
    %32 = vector.shape_cast %31 : vector<128xf32> to vector<1x128xf32>
    %33 = arith.mulf %27, %27 : vector<128x128xf32>
    %cst_21 = arith.constant dense<0.000000e+00> : vector<128xf32>
    %34 = vector.multi_reduction <add>, %33, %cst_21 [0] : vector<128x128xf32> to vector<128xf32>
    %35 = vector.shape_cast %34 : vector<128xf32> to vector<1x128xf32>
    %36 = tpu.concatenate %32, %35 in 0 : vector<1x128xf32>, vector<1x128xf32> -> vector<2x128xf32>
    %37 = vector.shape_cast %36 : vector<2x128xf32> to vector<1x1x2x128xf32>
    %c0_22 = arith.constant 0 : index
    %c0_23 = arith.constant 0 : index
    %c0_24 = arith.constant 0 : index
    %c0_25 = arith.constant 0 : index
    %38 = vector.load %arg9[%c0_22, %c0_23, %c0_24, %c0_25] : memref<1x1x2x128xf32, #tpu.memory_space<vmem>>, vector<1x1x2x128xf32>
    tpu.vector_store %arg9[%c0_22, %c0_23, %c0_24, %c0_25], %37 {strides = array<i32>} : memref<1x1x2x128xf32, #tpu.memory_space<vmem>>, vector<1x1x2x128xf32>,
    return
  }
  func.func @transform_0(%arg0: i32, %arg1: i32) -> (i32, i32, i32, i32) {
    %c0_i32 = arith.constant 0 : i32
    %c0_i32_0 = arith.constant 0 : i32
    %c0_i32_1 = arith.constant 0 : i32
    return %arg0, %arg1, %c0_i32, %c0_i32_0 : i32, i32, i32, i32
  }
  func.func @transform_1(%arg0: i32, %arg1: i32) -> (i32, i32, i32, i32) {
    %c8_i32 = arith.constant 8 : i32
    %0 = arith.muli %arg1, %c8_i32 : i32
    %c1_i32 = arith.constant 1 : i32
    %1 = arith.subi %0, %c1_i32 : i32
    %c0_i32 = arith.constant 0 : i32
    %2 = arith.maxsi %1, %c0_i32 : i32
    %c0_i32_0 = arith.constant 0 : i32
    %c0_i32_1 = arith.constant 0 : i32
    %c0_i32_2 = arith.constant 0 : i32
    return %arg0, %2, %c0_i32_0, %c0_i32_1 : i32, i32, i32, i32
  }
  func.func @transform_2(%arg0: i32, %arg1: i32) -> (i32, i32, i32, i32) {
    %c8_i32 = arith.constant 8 : i32
    %0 = arith.muli %arg1, %c8_i32 : i32
    %c8_i32_0 = arith.constant 8 : i32
    %1 = arith.addi %0, %c8_i32_0 : i32
    %c15_i32 = arith.constant 15 : i32
    %2 = arith.minsi %1, %c15_i32 : i32
    %c0_i32 = arith.constant 0 : i32
    %c0_i32_1 = arith.constant 0 : i32
    %c0_i32_2 = arith.constant 0 : i32
    return %arg0, %2, %c0_i32, %c0_i32_1 : i32, i32, i32, i32
  }
  func.func @transform_3(%arg0: i32, %arg1: i32) -> (i32, i32) {
    %c0_i32 = arith.constant 0 : i32
    %c0_i32_0 = arith.constant 0 : i32
    %c0_i32_1 = arith.constant 0 : i32
    return %c0_i32, %c0_i32_0 : i32, i32
  }
  func.func @transform_4(%arg0: i32, %arg1: i32) -> (i32, i32) {
    %c0_i32 = arith.constant 0 : i32
    %c0_i32_0 = arith.constant 0 : i32
    %c0_i32_1 = arith.constant 0 : i32
    return %c0_i32, %c0_i32_0 : i32, i32
  }
  func.func @transform_5(%arg0: i32, %arg1: i32) -> (i32, i32) {
    %c0_i32 = arith.constant 0 : i32
    %c0_i32_0 = arith.constant 0 : i32
    %c0_i32_1 = arith.constant 0 : i32
    return %c0_i32, %c0_i32_0 : i32, i32
  }
  func.func @transform_6(%arg0: i32, %arg1: i32) -> (i32, i32, i32, i32) {
    %c0_i32 = arith.constant 0 : i32
    %c0_i32_0 = arith.constant 0 : i32
    %c0_i32_1 = arith.constant 0 : i32
    return %arg0, %arg1, %c0_i32, %c0_i32_0 : i32, i32, i32, i32
  }
  func.func @transform_7(%arg0: i32, %arg1: i32) -> (i32, i32, i32, i32) {
    %c0_i32 = arith.constant 0 : i32
    %c0_i32_0 = arith.constant 0 : i32
    %c0_i32_1 = arith.constant 0 : i32
    return %arg0, %arg1, %c0_i32, %c0_i32_0 : i32, i32, i32, i32
  }
}

module attributes {stable_mosaic.version = 11 : i64} {
  func.func @_bn_act_kernel(%arg0: i32, %arg1: i32, %arg2: memref<1x8x16x128xbf16, #tpu.memory_space<vmem>>, %arg3: memref<1x128xf32, #tpu.memory_space<vmem>>, %arg4: memref<1x128xf32, #tpu.memory_space<vmem>>, %arg5: memref<1x8x16x128xbf16, #tpu.memory_space<vmem>>) attributes {dimension_semantics = [#tpu.dimension_semantics<parallel>, #tpu.dimension_semantics<parallel>], iteration_bounds = array<i64: 2, 2>, scalar_prefetch = 0 : i64, scratch_operands = 0 : i64, tpu.core_type = #tpu.core_type<tc>, window_params = [{transform_indices = @transform_0, window_bounds = array<i64: 1, 8, 16, 128>}, {pipeline_mode = #tpu.pipeline_mode<synchronous>, transform_indices = @transform_1, window_bounds = array<i64: 1, 128>}, {pipeline_mode = #tpu.pipeline_mode<synchronous>, transform_indices = @transform_2, window_bounds = array<i64: 1, 128>}, {transform_indices = @transform_3, window_bounds = array<i64: 1, 8, 16, 128>}]} {
    %c0 = arith.constant 0 : index
    %c0_0 = arith.constant 0 : index
    %c0_1 = arith.constant 0 : index
    %c0_2 = arith.constant 0 : index
    %0 = vector.load %arg2[%c0, %c0_0, %c0_1, %c0_2] : memref<1x8x16x128xbf16, #tpu.memory_space<vmem>>, vector<1x8x16x128xbf16>
    %1 = arith.extf %0 : vector<1x8x16x128xbf16> to vector<1x8x16x128xf32>
    %c0_3 = arith.constant 0 : index
    %c0_4 = arith.constant 0 : index
    %2 = vector.load %arg3[%c0_3, %c0_4] : memref<1x128xf32, #tpu.memory_space<vmem>>, vector<1x128xf32>
    %3 = vector.shape_cast %2 : vector<1x128xf32> to vector<1x1x1x128xf32>
    %4 = vector.broadcast %3 : vector<1x1x1x128xf32> to vector<1x8x16x128xf32>
    %5 = arith.mulf %1, %4 : vector<1x8x16x128xf32>
    %c0_5 = arith.constant 0 : index
    %c0_6 = arith.constant 0 : index
    %6 = vector.load %arg4[%c0_5, %c0_6] : memref<1x128xf32, #tpu.memory_space<vmem>>, vector<1x128xf32>
    %7 = vector.shape_cast %6 : vector<1x128xf32> to vector<1x1x1x128xf32>
    %8 = vector.broadcast %7 : vector<1x1x1x128xf32> to vector<1x8x16x128xf32>
    %9 = arith.addf %5, %8 : vector<1x8x16x128xf32>
    %cst = arith.constant 0.000000e+00 : f32
    %10 = vector.broadcast %cst : f32 to vector<1x8x16x128xf32>
    %11 = arith.cmpf oge, %9, %10 : vector<1x8x16x128xf32>
    %cst_7 = arith.constant 0.00999999977 : f32
    %12 = vector.broadcast %cst_7 : f32 to vector<1x8x16x128xf32>
    %13 = arith.mulf %12, %9 : vector<1x8x16x128xf32>
    %14 = arith.select %11, %9, %13 : vector<1x8x16x128xi1>, vector<1x8x16x128xf32>
    %15 = arith.truncf %14 : vector<1x8x16x128xf32> to vector<1x8x16x128xbf16>
    %c0_8 = arith.constant 0 : index
    %c0_9 = arith.constant 0 : index
    %c0_10 = arith.constant 0 : index
    %c0_11 = arith.constant 0 : index
    %16 = vector.load %arg5[%c0_8, %c0_9, %c0_10, %c0_11] : memref<1x8x16x128xbf16, #tpu.memory_space<vmem>>, vector<1x8x16x128xbf16>
    tpu.vector_store %arg5[%c0_8, %c0_9, %c0_10, %c0_11], %15 {strides = array<i32>} : memref<1x8x16x128xbf16, #tpu.memory_space<vmem>>, vector<1x8x16x128xbf16>,
    return
  }
  func.func @transform_0(%arg0: i32, %arg1: i32) -> (i32, i32, i32, i32) {
    %c0_i32 = arith.constant 0 : i32
    %c0_i32_0 = arith.constant 0 : i32
    %c0_i32_1 = arith.constant 0 : i32
    return %arg0, %arg1, %c0_i32, %c0_i32_0 : i32, i32, i32, i32
  }
  func.func @transform_1(%arg0: i32, %arg1: i32) -> (i32, i32) {
    %c0_i32 = arith.constant 0 : i32
    %c0_i32_0 = arith.constant 0 : i32
    %c0_i32_1 = arith.constant 0 : i32
    return %c0_i32, %c0_i32_0 : i32, i32
  }
  func.func @transform_2(%arg0: i32, %arg1: i32) -> (i32, i32) {
    %c0_i32 = arith.constant 0 : i32
    %c0_i32_0 = arith.constant 0 : i32
    %c0_i32_1 = arith.constant 0 : i32
    return %c0_i32, %c0_i32_0 : i32, i32
  }
  func.func @transform_3(%arg0: i32, %arg1: i32) -> (i32, i32, i32, i32) {
    %c0_i32 = arith.constant 0 : i32
    %c0_i32_0 = arith.constant 0 : i32
    %c0_i32_1 = arith.constant 0 : i32
    return %arg0, %arg1, %c0_i32, %c0_i32_0 : i32, i32, i32, i32
  }
}

module attributes {stable_mosaic.version = 11 : i64} {
  func.func @_conv_stats_kernel(%arg0: i32, %arg1: i32, %arg2: memref<1x8x16x128xbf16, #tpu.memory_space<vmem>>, %arg3: memref<1x1x16x128xbf16, #tpu.memory_space<vmem>>, %arg4: memref<1x1x16x128xbf16, #tpu.memory_space<vmem>>, %arg5: memref<1x128xf32, #tpu.memory_space<vmem>>, %arg6: memref<1x128xf32, #tpu.memory_space<vmem>>, %arg7: memref<1152x128xbf16, #tpu.memory_space<vmem>>, %arg8: memref<1x8x16x128xbf16, #tpu.memory_space<vmem>>, %arg9: memref<1x1x2x128xf32, #tpu.memory_space<vmem>>) attributes {dimension_semantics = [#tpu.dimension_semantics<parallel>, #tpu.dimension_semantics<parallel>], iteration_bounds = array<i64: 2, 2>, scalar_prefetch = 0 : i64, scratch_operands = 0 : i64, tpu.core_type = #tpu.core_type<tc>, window_params = [{transform_indices = @transform_0, window_bounds = array<i64: 1, 8, 16, 128>}, {transform_indices = @transform_1, window_bounds = array<i64: 1, 1, 16, 128>}, {transform_indices = @transform_2, window_bounds = array<i64: 1, 1, 16, 128>}, {pipeline_mode = #tpu.pipeline_mode<synchronous>, transform_indices = @transform_3, window_bounds = array<i64: 1, 128>}, {pipeline_mode = #tpu.pipeline_mode<synchronous>, transform_indices = @transform_4, window_bounds = array<i64: 1, 128>}, {pipeline_mode = #tpu.pipeline_mode<synchronous>, transform_indices = @transform_5, window_bounds = array<i64: 1152, 128>}, {transform_indices = @transform_6, window_bounds = array<i64: 1, 8, 16, 128>}, {transform_indices = @transform_7, window_bounds = array<i64: 1, 1, 2, 128>}]} {
    %c0 = arith.constant 0 : index
    %c0_0 = arith.constant 0 : index
    %c0_1 = arith.constant 0 : index
    %c0_2 = arith.constant 0 : index
    %0 = vector.load %arg2[%c0, %c0_0, %c0_1, %c0_2] : memref<1x8x16x128xbf16, #tpu.memory_space<vmem>>, vector<1x8x16x128xbf16>
    %1 = vector.shape_cast %0 : vector<1x8x16x128xbf16> to vector<8x16x128xbf16>
    %c0_3 = arith.constant 0 : index
    %c0_4 = arith.constant 0 : index
    %c0_5 = arith.constant 0 : index
    %c0_6 = arith.constant 0 : index
    %2 = vector.load %arg3[%c0_3, %c0_4, %c0_5, %c0_6] : memref<1x1x16x128xbf16, #tpu.memory_space<vmem>>, vector<1x1x16x128xbf16>
    %3 = vector.shape_cast %2 : vector<1x1x16x128xbf16> to vector<1x16x128xbf16>
    %c0_7 = arith.constant 0 : index
    %c0_8 = arith.constant 0 : index
    %c0_9 = arith.constant 0 : index
    %c0_10 = arith.constant 0 : index
    %4 = vector.load %arg4[%c0_7, %c0_8, %c0_9, %c0_10] : memref<1x1x16x128xbf16, #tpu.memory_space<vmem>>, vector<1x1x16x128xbf16>
    %5 = vector.shape_cast %4 : vector<1x1x16x128xbf16> to vector<1x16x128xbf16>
    %c0_11 = arith.constant 0 : index
    %c0_12 = arith.constant 0 : index
    %6 = vector.load %arg5[%c0_11, %c0_12] : memref<1x128xf32, #tpu.memory_space<vmem>>, vector<1x128xf32>
    %7 = vector.shape_cast %6 : vector<1x128xf32> to vector<1x1x128xf32>
    %c0_13 = arith.constant 0 : index
    %c0_14 = arith.constant 0 : index
    %8 = vector.load %arg6[%c0_13, %c0_14] : memref<1x128xf32, #tpu.memory_space<vmem>>, vector<1x128xf32>
    %9 = vector.shape_cast %8 : vector<1x128xf32> to vector<1x1x128xf32>
    %10 = arith.extf %1 : vector<8x16x128xbf16> to vector<8x16x128xf32>
    %11 = vector.broadcast %7 : vector<1x1x128xf32> to vector<8x16x128xf32>
    %12 = arith.mulf %10, %11 : vector<8x16x128xf32>
    %13 = vector.broadcast %9 : vector<1x1x128xf32> to vector<8x16x128xf32>
    %14 = arith.addf %12, %13 : vector<8x16x128xf32>
    %cst = arith.constant 0.000000e+00 : f32
    %15 = vector.broadcast %cst : f32 to vector<8x16x128xf32>
    %16 = arith.cmpf oge, %14, %15 : vector<8x16x128xf32>
    %cst_15 = arith.constant 0.00999999977 : f32
    %17 = vector.broadcast %cst_15 : f32 to vector<8x16x128xf32>
    %18 = arith.mulf %17, %14 : vector<8x16x128xf32>
    %19 = arith.select %16, %14, %18 : vector<8x16x128xi1>, vector<8x16x128xf32>
    %20 = arith.truncf %19 : vector<8x16x128xf32> to vector<8x16x128xbf16>
    %21 = arith.extf %3 : vector<1x16x128xbf16> to vector<1x16x128xf32>
    %22 = vector.broadcast %7 : vector<1x1x128xf32> to vector<1x16x128xf32>
    %23 = arith.mulf %21, %22 : vector<1x16x128xf32>
    %24 = vector.broadcast %9 : vector<1x1x128xf32> to vector<1x16x128xf32>
    %25 = arith.addf %23, %24 : vector<1x16x128xf32>
    %cst_16 = arith.constant 0.000000e+00 : f32
    %26 = vector.broadcast %cst_16 : f32 to vector<1x16x128xf32>
    %27 = arith.cmpf oge, %25, %26 : vector<1x16x128xf32>
    %cst_17 = arith.constant 0.00999999977 : f32
    %28 = vector.broadcast %cst_17 : f32 to vector<1x16x128xf32>
    %29 = arith.mulf %28, %25 : vector<1x16x128xf32>
    %30 = arith.select %27, %25, %29 : vector<1x16x128xi1>, vector<1x16x128xf32>
    %31 = arith.truncf %30 : vector<1x16x128xf32> to vector<1x16x128xbf16>
    %32 = arith.extf %5 : vector<1x16x128xbf16> to vector<1x16x128xf32>
    %33 = vector.broadcast %7 : vector<1x1x128xf32> to vector<1x16x128xf32>
    %34 = arith.mulf %32, %33 : vector<1x16x128xf32>
    %35 = vector.broadcast %9 : vector<1x1x128xf32> to vector<1x16x128xf32>
    %36 = arith.addf %34, %35 : vector<1x16x128xf32>
    %cst_18 = arith.constant 0.000000e+00 : f32
    %37 = vector.broadcast %cst_18 : f32 to vector<1x16x128xf32>
    %38 = arith.cmpf oge, %36, %37 : vector<1x16x128xf32>
    %cst_19 = arith.constant 0.00999999977 : f32
    %39 = vector.broadcast %cst_19 : f32 to vector<1x16x128xf32>
    %40 = arith.mulf %39, %36 : vector<1x16x128xf32>
    %41 = arith.select %38, %36, %40 : vector<1x16x128xi1>, vector<1x16x128xf32>
    %42 = arith.truncf %41 : vector<1x16x128xf32> to vector<1x16x128xbf16>
    %c0_i32 = arith.constant 0 : i32
    %43 = arith.cmpi eq, %arg1, %c0_i32 : i32
    %cst_20 = arith.constant 0.000000e+00 : bf16
    %44 = vector.broadcast %cst_20 : bf16 to vector<1x16x128xbf16>
    %45 = arith.select %43, %44, %31 : vector<1x16x128xbf16>
    %c1_i32 = arith.constant 1 : i32
    %46 = arith.cmpi eq, %arg1, %c1_i32 : i32
    %cst_21 = arith.constant 0.000000e+00 : bf16
    %47 = vector.broadcast %cst_21 : bf16 to vector<1x16x128xbf16>
    %48 = arith.select %46, %47, %42 : vector<1x16x128xbf16>
    %49 = tpu.concatenate %45, %20, %48 in 0 : vector<1x16x128xbf16>, vector<8x16x128xbf16>, vector<1x16x128xbf16> -> vector<10x16x128xbf16>
    %cst_22 = arith.constant 0.000000e+00 : bf16
    %50 = vector.broadcast %cst_22 : bf16 to vector<10x1x128xbf16>
    %51 = tpu.concatenate %50, %49, %50 in 1 : vector<10x1x128xbf16>, vector<10x16x128xbf16>, vector<10x1x128xbf16> -> vector<10x18x128xbf16>
    %52 = vector.extract_strided_slice %51 {offsets = [0, 0, 0], sizes = [8, 16, 128], strides = [1, 1, 1]} : vector<10x18x128xbf16> to vector<8x16x128xbf16>
    %53 = vector.extract_strided_slice %51 {offsets = [0, 1, 0], sizes = [8, 16, 128], strides = [1, 1, 1]} : vector<10x18x128xbf16> to vector<8x16x128xbf16>
    %54 = vector.extract_strided_slice %51 {offsets = [0, 2, 0], sizes = [8, 16, 128], strides = [1, 1, 1]} : vector<10x18x128xbf16> to vector<8x16x128xbf16>
    %55 = vector.extract_strided_slice %51 {offsets = [1, 0, 0], sizes = [8, 16, 128], strides = [1, 1, 1]} : vector<10x18x128xbf16> to vector<8x16x128xbf16>
    %56 = vector.extract_strided_slice %51 {offsets = [1, 1, 0], sizes = [8, 16, 128], strides = [1, 1, 1]} : vector<10x18x128xbf16> to vector<8x16x128xbf16>
    %57 = vector.extract_strided_slice %51 {offsets = [1, 2, 0], sizes = [8, 16, 128], strides = [1, 1, 1]} : vector<10x18x128xbf16> to vector<8x16x128xbf16>
    %58 = vector.extract_strided_slice %51 {offsets = [2, 0, 0], sizes = [8, 16, 128], strides = [1, 1, 1]} : vector<10x18x128xbf16> to vector<8x16x128xbf16>
    %59 = vector.extract_strided_slice %51 {offsets = [2, 1, 0], sizes = [8, 16, 128], strides = [1, 1, 1]} : vector<10x18x128xbf16> to vector<8x16x128xbf16>
    %60 = vector.extract_strided_slice %51 {offsets = [2, 2, 0], sizes = [8, 16, 128], strides = [1, 1, 1]} : vector<10x18x128xbf16> to vector<8x16x128xbf16>
    %61 = tpu.concatenate %52, %53, %54, %55, %56, %57, %58, %59, %60 in 2 : vector<8x16x128xbf16>, vector<8x16x128xbf16>, vector<8x16x128xbf16>, vector<8x16x128xbf16>, vector<8x16x128xbf16>, vector<8x16x128xbf16>, vector<8x16x128xbf16>, vector<8x16x128xbf16>, vector<8x16x128xbf16> -> vector<8x16x1152xbf16>
    %62 = vector.shape_cast %61 : vector<8x16x1152xbf16> to vector<128x1152xbf16>
    %c0_23 = arith.constant 0 : index
    %c0_24 = arith.constant 0 : index
    %63 = vector.load %arg7[%c0_23, %c0_24] : memref<1152x128xbf16, #tpu.memory_space<vmem>>, vector<1152x128xbf16>
    %cst_25 = arith.constant dense<0.000000e+00> : vector<128x128xf32>
    %64 = tpu.matmul %62, %63, %cst_25 {dimension_numbers = #tpu.dot_dimension_numbers<[1], [0], [0], [1], [0, 0, 1, 1], [], []>} : vector<128x1152xbf16>, vector<1152x128xbf16>, vector<128x128xf32> -> vector<128x128xf32>
    %65 = vector.shape_cast %64 : vector<128x128xf32> to vector<1x8x16x128xf32>
    %66 = arith.truncf %65 : vector<1x8x16x128xf32> to vector<1x8x16x128xbf16>
    %c0_26 = arith.constant 0 : index
    %c0_27 = arith.constant 0 : index
    %c0_28 = arith.constant 0 : index
    %c0_29 = arith.constant 0 : index
    %67 = vector.load %arg8[%c0_26, %c0_27, %c0_28, %c0_29] : memref<1x8x16x128xbf16, #tpu.memory_space<vmem>>, vector<1x8x16x128xbf16>
    tpu.vector_store %arg8[%c0_26, %c0_27, %c0_28, %c0_29], %66 {strides = array<i32>} : memref<1x8x16x128xbf16, #tpu.memory_space<vmem>>, vector<1x8x16x128xbf16>,
    %cst_30 = arith.constant dense<0.000000e+00> : vector<128xf32>
    %68 = vector.multi_reduction <add>, %64, %cst_30 [0] : vector<128x128xf32> to vector<128xf32>
    %69 = vector.shape_cast %68 : vector<128xf32> to vector<1x128xf32>
    %70 = arith.mulf %64, %64 : vector<128x128xf32>
    %cst_31 = arith.constant dense<0.000000e+00> : vector<128xf32>
    %71 = vector.multi_reduction <add>, %70, %cst_31 [0] : vector<128x128xf32> to vector<128xf32>
    %72 = vector.shape_cast %71 : vector<128xf32> to vector<1x128xf32>
    %73 = tpu.concatenate %69, %72 in 0 : vector<1x128xf32>, vector<1x128xf32> -> vector<2x128xf32>
    %74 = vector.shape_cast %73 : vector<2x128xf32> to vector<1x1x2x128xf32>
    %c0_32 = arith.constant 0 : index
    %c0_33 = arith.constant 0 : index
    %c0_34 = arith.constant 0 : index
    %c0_35 = arith.constant 0 : index
    %75 = vector.load %arg9[%c0_32, %c0_33, %c0_34, %c0_35] : memref<1x1x2x128xf32, #tpu.memory_space<vmem>>, vector<1x1x2x128xf32>
    tpu.vector_store %arg9[%c0_32, %c0_33, %c0_34, %c0_35], %74 {strides = array<i32>} : memref<1x1x2x128xf32, #tpu.memory_space<vmem>>, vector<1x1x2x128xf32>,
    return
  }
  func.func @transform_0(%arg0: i32, %arg1: i32) -> (i32, i32, i32, i32) {
    %c0_i32 = arith.constant 0 : i32
    %c0_i32_0 = arith.constant 0 : i32
    %c0_i32_1 = arith.constant 0 : i32
    return %arg0, %arg1, %c0_i32, %c0_i32_0 : i32, i32, i32, i32
  }
  func.func @transform_1(%arg0: i32, %arg1: i32) -> (i32, i32, i32, i32) {
    %c8_i32 = arith.constant 8 : i32
    %0 = arith.muli %arg1, %c8_i32 : i32
    %c1_i32 = arith.constant 1 : i32
    %1 = arith.subi %0, %c1_i32 : i32
    %c0_i32 = arith.constant 0 : i32
    %2 = arith.maxsi %1, %c0_i32 : i32
    %c0_i32_0 = arith.constant 0 : i32
    %c0_i32_1 = arith.constant 0 : i32
    %c0_i32_2 = arith.constant 0 : i32
    return %arg0, %2, %c0_i32_0, %c0_i32_1 : i32, i32, i32, i32
  }
  func.func @transform_2(%arg0: i32, %arg1: i32) -> (i32, i32, i32, i32) {
    %c8_i32 = arith.constant 8 : i32
    %0 = arith.muli %arg1, %c8_i32 : i32
    %c8_i32_0 = arith.constant 8 : i32
    %1 = arith.addi %0, %c8_i32_0 : i32
    %c15_i32 = arith.constant 15 : i32
    %2 = arith.minsi %1, %c15_i32 : i32
    %c0_i32 = arith.constant 0 : i32
    %c0_i32_1 = arith.constant 0 : i32
    %c0_i32_2 = arith.constant 0 : i32
    return %arg0, %2, %c0_i32, %c0_i32_1 : i32, i32, i32, i32
  }
  func.func @transform_3(%arg0: i32, %arg1: i32) -> (i32, i32) {
    %c0_i32 = arith.constant 0 : i32
    %c0_i32_0 = arith.constant 0 : i32
    %c0_i32_1 = arith.constant 0 : i32
    return %c0_i32, %c0_i32_0 : i32, i32
  }
  func.func @transform_4(%arg0: i32, %arg1: i32) -> (i32, i32) {
    %c0_i32 = arith.constant 0 : i32
    %c0_i32_0 = arith.constant 0 : i32
    %c0_i32_1 = arith.constant 0 : i32
    return %c0_i32, %c0_i32_0 : i32, i32
  }
  func.func @transform_5(%arg0: i32, %arg1: i32) -> (i32, i32) {
    %c0_i32 = arith.constant 0 : i32
    %c0_i32_0 = arith.constant 0 : i32
    %c0_i32_1 = arith.constant 0 : i32
    return %c0_i32, %c0_i32_0 : i32, i32
  }
  func.func @transform_6(%arg0: i32, %arg1: i32) -> (i32, i32, i32, i32) {
    %c0_i32 = arith.constant 0 : i32
    %c0_i32_0 = arith.constant 0 : i32
    %c0_i32_1 = arith.constant 0 : i32
    return %arg0, %arg1, %c0_i32, %c0_i32_0 : i32, i32, i32, i32
  }
  func.func @transform_7(%arg0: i32, %arg1: i32) -> (i32, i32, i32, i32) {
    %c0_i32 = arith.constant 0 : i32
    %c0_i32_0 = arith.constant 0 : i32
    %c0_i32_1 = arith.constant 0 : i32
    return %arg0, %arg1, %c0_i32, %c0_i32_0 : i32, i32, i32, i32
  }
}

</mosaic_0001>

<bundles_post_ra>
// kernel: _lambda_.5
= control target key start
LH: loop header
LB: loop body
LE: loop exit
PB: predicated region body
PF: predicated region fallthrough
CT: control target
= control target key end

     0   :  { %s669_s12 = smov 0   ;;  %s671_s13 = smov 0   ;;  %s790_s0 = inlined_call_operand.vmem [shape: bf16[2,16,16,128], index: 0, kind: input, shape index: {}]   ;;  %s791_s1 = inlined_call_operand.vmem [shape: f32[1,128], index: 1, kind: input, shape index: {}]   ;;  %s792_s2 = inlined_call_operand.vmem [shape: f32[1,128], index: 2, kind: input, shape index: {}]   ;;  %s793_s3 = inlined_call_operand.vmem [shape: bf16[2,16,16,128], index: 3, kind: output, shape index: {}]  }
   0x1   :  { %s673_s14 = smov 0   ;;  %s675_s15 = smov 0  }
   0x2   :  { %s677_s16 = smov 0  }
   0x3 LB: > { %s22_s17 = sadd.s32 1, %s639_s14  ;;  %s25_s18 = sadd.s32 1, %s643_s15  ;;  %s647_s16 = sphi %s677_s16, %s13_s16   ;;  %s643_s15 = sphi %s675_s15, %s797_s15   ;;  %s639_s14 = sphi %s673_s14, %s796_s14   ;;  %s635_s13 = sphi %s671_s13, %s795_s13   ;;  %s631_s12 = sphi %s669_s12, %s794_s12  }
   0x4   : > { %p23_p0 = scmp.ge.s32.totalorder %s22_s17, 2  ;;  %p470_p1 = scmp.ge.s32.totalorder %s647_s16, 1 }
   0x5   : > { %p159_p2 = scmp.lt.s32.totalorder %s647_s16, 5 }
   0x6   : > { %s799_s17 = smov (%p23_p0, %s22_s17), 0  ;;  %s801_s18 = smov (!%p23_p0, %s25_s18), %s643_s15 }
   0x7   : > { %p160_p3 = pnand %p470_p1, %p159_p2  ;;  %p27_p4 = scmp.ge.s32.totalorder %s801_s18, 2 }
   0x8   : > { %s471_s19 = sshll.u32 (!%p160_p3), %s631_s12, 3  ;;  %p194_p5 = scmp.lt.s32.totalorder (!%p160_p3), %s635_s13, 1 }
   0x9   : > { %s803_s18 = smov (%p27_p4, %s801_s18), 0  ;;  %163 = sbr.rel (%p160_p3) target bundleno = 52 (0x34), region = 32 }
   0xa   : > { %p196_p6 = scmp.lt.s32.totalorder (!%p160_p3), %s471_s19, 15 }
   0xe   : > { %s805_s13 = smov (!%p194_p5, %s635_s13), 1  ;;  %s807_s19 = smov (!%p196_p6, %s471_s19), 15  ;;  %v712_v0 = vld [vmem:[%s791_s1] ss:$0 sm:$0xff] }
   0xf   : > { %s473_s20 = sshll.u32 %s805_s13, 5  ;;  %s472_s21 = sshll.u32 %s807_s19, 1  ;;  %v720_v6 = vld [vmem:[%s792_s2] ss:$0 sm:$0xff] }
  0x10   : > { %s699_s22 = sadd.s32 %s473_s20, %s472_s21 }
  0x11   : > { %s474_s23 = sshll.u32 %s699_s22, 2 }
  0x12   : > { %s707_s26 = scalar_lea.vmem %s790_s0, %s474_s23  ;;  %s744_s6 = scalar_lea.vmem %s793_s3, %s474_s23 }
  0x13   : > { %v482_v1 = vld [vmem:[%s707_s26] sm:$0xff]   ;;  %v553_v2 = vld [vmem:[%s707_s26 + $0x8] sm:$0xff]   ;;  %v554_v3 = vld [vmem:[%s707_s26 + $0x10] sm:$0xff]  }
  0x14   : > { %v483_v4 = vunpack.c.l.bf16 %v482_v1  ;;  %v484_v5 = vunpack.c.h.bf16 %v482_v1  ;;  %v487_v7 = vunpack.c.l.bf16 %v553_v2  ;;  %v488_v8 = vunpack.c.h.bf16 %v553_v2  ;;  %v555_v9 = vld [vmem:[%s707_s26 + $0x18] sm:$0xff]   ;;  %v556_v36 = vld [vmem:[%s707_s26 + $0x20] sm:$0xff]   ;;  %v557_v41 = vld [vmem:[%s707_s26 + $0x28] sm:$0xff]  }
  0x15   : > { %v491_v10 = vunpack.c.l.bf16 %v554_v3  ;;  %v492_v11 = vunpack.c.h.bf16 %v554_v3  ;;  %v495_v12 = vunpack.c.l.bf16 %v555_v9  ;;  %v496_v13 = vunpack.c.h.bf16 %v555_v9  ;;  %v558_v52 = vld [vmem:[%s707_s26 + $0x30] sm:$0xff]   ;;  %v559_v53 = vld [vmem:[%s707_s26 + $0x38] sm:$0xff]  }
  0x16   : > { %v251_v14 = vmul.f32 %v712_v0, %v483_v4  ;;  %v252_v15 = vmul.f32 %v712_v0, %v484_v5  ;;  %v253_v16 = vmul.f32 %v712_v0, %v487_v7  ;;  %v254_v17 = vmul.f32 %v712_v0, %v488_v8 }
  0x17   : > { %v255_v18 = vmul.f32 %v712_v0, %v491_v10  ;;  %v256_v19 = vmul.f32 %v712_v0, %v492_v11  ;;  %v257_v20 = vmul.f32 %v712_v0, %v495_v12  ;;  %v258_v21 = vmul.f32 %v712_v0, %v496_v13 }
  0x18   : > { %v271_v22 = vadd.f32 %v720_v6, %v251_v14  ;;  %v272_v23 = vadd.f32 %v720_v6, %v252_v15  ;;  %v273_v24 = vadd.f32 %v720_v6, %v253_v16  ;;  %v274_v25 = vadd.f32 %v720_v6, %v254_v17 }
  0x19   : > { %v275_v26 = vadd.f32 %v720_v6, %v255_v18  ;;  %v276_v27 = vadd.f32 %v720_v6, %v256_v19  ;;  %v277_v28 = vadd.f32 %v720_v6, %v257_v20  ;;  %v278_v29 = vadd.f32 %v720_v6, %v258_v21 }
  0x1a   : > { %vm287_vm0 = vcmp.ge.f32.partialorder %v271_v22, 0.0  ;;  %vm288_vm1 = vcmp.ge.f32.partialorder %v272_v23, 0.0  ;;  %v303_v30 = vmul.f32 0.01, %v271_v22  ;;  %v304_v31 = vmul.f32 0.01, %v272_v23 }
  0x1b   : > { %vm289_vm2 = vcmp.ge.f32.partialorder %v273_v24, 0.0  ;;  %vm290_vm3 = vcmp.ge.f32.partialorder %v274_v25, 0.0  ;;  %v305_v32 = vmul.f32 0.01, %v273_v24  ;;  %v306_v33 = vmul.f32 0.01, %v274_v25 }
  0x1c   : > { %v319_v34 = vsel %vm287_vm0, %v271_v22, %v303_v30  ;;  %v320_v35 = vsel %vm288_vm1, %v272_v23, %v304_v31  ;;  %vm291_vm4 = vcmp.ge.f32.partialorder %v275_v26, 0.0  ;;  %vm292_vm5 = vcmp.ge.f32.partialorder %v276_v27, 0.0 }
  0x1d   : > { %v516_v37 = vpack.c.bf16 %v320_v35, %v319_v34  ;;  %v321_v38 = vsel %vm289_vm2, %v273_v24, %v305_v32  ;;  %v322_v39 = vsel %vm290_vm3, %v274_v25, %v306_v33  ;;  %v307_v40 = vmul.f32 0.01, %v275_v26 }
  0x1e   : > { %v521_v42 = vpack.c.bf16 %v322_v39, %v321_v38  ;;  %v308_v43 = vmul.f32 0.01, %v276_v27  ;;  %vm293_vm6 = vcmp.ge.f32.partialorder %v277_v28, 0.0  ;;  %vm294_vm7 = vcmp.ge.f32.partialorder %v278_v29, 0.0 }
  0x1f   : > { %517 = vst [vmem:[%s744_s6] sm:$0xff] %v516_v37   ;;  %v323_v44 = vsel %vm291_vm4, %v275_v26, %v307_v40  ;;  %v309_v45 = vmul.f32 0.01, %v277_v28  ;;  %v310_v46 = vmul.f32 0.01, %v278_v29  ;;  %v499_v47 = vunpack.c.l.bf16 %v556_v36 }
  0x20   : > { %560 = vst [vmem:[%s744_s6 + $0x8] sm:$0xff] %v521_v42   ;;  %v324_v48 = vsel %vm292_vm5, %v276_v27, %v308_v43  ;;  %v500_v49 = vunpack.c.h.bf16 %v556_v36  ;;  %v503_v50 = vunpack.c.l.bf16 %v557_v41  ;;  %v504_v51 = vunpack.c.h.bf16 %v557_v41 }
  0x21   : > { %v526_v54 = vpack.c.bf16 %v324_v48, %v323_v44  ;;  %v325_v55 = vsel %vm293_vm6, %v277_v28, %v309_v45  ;;  %v326_v56 = vsel %vm294_vm7, %v278_v29, %v310_v46  ;;  %v259_v57 = vmul.f32 %v712_v0, %v499_v47 }
  0x22   : > { %v531_v58 = vpack.c.bf16 %v326_v56, %v325_v55  ;;  %v260_v59 = vmul.f32 %v712_v0, %v500_v49  ;;  %v261_v60 = vmul.f32 %v712_v0, %v503_v50  ;;  %v262_v61 = vmul.f32 %v712_v0, %v504_v51 }
  0x23   : > { %561 = vst [vmem:[%s744_s6 + $0x10] sm:$0xff] %v526_v54   ;;  %v279_v62 = vadd.f32 %v720_v6, %v259_v57  ;;  %v507_v63 = vunpack.c.l.bf16 %v558_v52  ;;  %v508_v1 = vunpack.c.h.bf16 %v558_v52  ;;  %v511_v2 = vunpack.c.l.bf16 %v559_v53 }
  0x24   : > { %562 = vst [vmem:[%s744_s6 + $0x18] sm:$0xff] %v531_v58   ;;  %v280_v3 = vadd.f32 %v720_v6, %v260_v59  ;;  %v281_v4 = vadd.f32 %v720_v6, %v261_v60  ;;  %v282_v5 = vadd.f32 %v720_v6, %v262_v61  ;;  %v512_v7 = vunpack.c.h.bf16 %v559_v53 }
  0x25   : > { %vm295_vm8 = vcmp.ge.f32.partialorder %v279_v62, 0.0  ;;  %v311_v8 = vmul.f32 0.01, %v279_v62  ;;  %v263_v9 = vmul.f32 %v712_v0, %v507_v63  ;;  %v264_v10 = vmul.f32 %v712_v0, %v508_v1 }
  0x26   : > { %vm296_vm9 = vcmp.ge.f32.partialorder %v280_v3, 0.0  ;;  %v312_v11 = vmul.f32 0.01, %v280_v3  ;;  %vm297_vm10 = vcmp.ge.f32.partialorder %v281_v4, 0.0  ;;  %vm298_vm11 = vcmp.ge.f32.partialorder %v282_v5, 0.0 }
  0x27   : > { %v327_v12 = vsel %vm295_vm8, %v279_v62, %v311_v8  ;;  %v313_v13 = vmul.f32 0.01, %v281_v4  ;;  %v314_v14 = vmul.f32 0.01, %v282_v5  ;;  %v283_v15 = vadd.f32 %v720_v6, %v263_v9 }
  0x28   : > { %v328_v16 = vsel %vm296_vm9, %v280_v3, %v312_v11  ;;  %v284_v17 = vadd.f32 %v720_v6, %v264_v10  ;;  %v265_v18 = vmul.f32 %v712_v0, %v511_v2  ;;  %v266_v19 = vmul.f32 %v712_v0, %v512_v7 }
  0x29   : > { %v536_v20 = vpack.c.bf16 %v328_v16, %v327_v12  ;;  %v329_v21 = vsel %vm297_vm10, %v281_v4, %v313_v13  ;;  %v330_v22 = vsel %vm298_vm11, %v282_v5, %v314_v14  ;;  %vm299_vm12 = vcmp.ge.f32.partialorder %v283_v15, 0.0 }
  0x2a   : > { %v541_v23 = vpack.c.bf16 %v330_v22, %v329_v21  ;;  %vm300_vm13 = vcmp.ge.f32.partialorder %v284_v17, 0.0  ;;  %v315_v24 = vmul.f32 0.01, %v283_v15  ;;  %v316_v25 = vmul.f32 0.01, %v284_v17 }
  0x2b   : > { %563 = vst [vmem:[%s744_s6 + $0x20] sm:$0xff] %v536_v20   ;;  %v285_v26 = vadd.f32 %v720_v6, %v265_v18  ;;  %v286_v27 = vadd.f32 %v720_v6, %v266_v19 }
  0x2c   : > { %564 = vst [vmem:[%s744_s6 + $0x28] sm:$0xff] %v541_v23   ;;  %v331_v28 = vsel %vm299_vm12, %v283_v15, %v315_v24  ;;  %v332_v29 = vsel %vm300_vm13, %v284_v17, %v316_v25 }
  0x2d   : > { %v546_v30 = vpack.c.bf16 %v332_v29, %v331_v28  ;;  %vm301_vm14 = vcmp.ge.f32.partialorder %v285_v26, 0.0  ;;  %vm302_vm15 = vcmp.ge.f32.partialorder %v286_v27, 0.0  ;;  %v317_v0 = vmul.f32 0.01, %v285_v26 }
  0x2e   : > { %v318_v31 = vmul.f32 0.01, %v286_v27 }
  0x2f   : > { %565 = vst [vmem:[%s744_s6 + $0x30] sm:$0xff] %v546_v30   ;;  %v333_v32 = vsel %vm301_vm14, %v285_v26, %v317_v0 }
  0x30   : > { %v334_v33 = vsel %vm302_vm15, %v286_v27, %v318_v31 }
  0x31   : > { %v551_v34 = vpack.c.bf16 %v334_v33, %v333_v32 }
  0x33   : > { %566 = vst [vmem:[%s744_s6 + $0x38] sm:$0xff] %v551_v34  }
  0x34 PF: > { %s13_s16 = sadd.s32 1, %s647_s16   ;;  %s794_s12 = smov %s639_s14 }
  0x35   : > { %p10_p7 = scmp.ge.s32.totalorder %s13_s16, 6   ;;  %s795_s13 = smov %s643_s15 }
  0x36   : > { %s796_s14 = smov %s799_s17  ;;  %s797_s15 = smov %s803_s18 }
  0x37   :  { %12 = sbr.rel (!%p10_p7) target bundleno = 3 (0x3), region = 62 }

// kernel: _lambda_.3
= control target key start
LH: loop header
LB: loop body
LE: loop exit
PB: predicated region body
PF: predicated region fallthrough
CT: control target
= control target key end

     0   :  { %s1763_s24 = smov 0   ;;  %s1765_s25 = smov 0   ;;  %s2279_s0 = inlined_call_operand.vmem [shape: bf16[2,16,16,4], index: 0, kind: input, shape index: {}, may-alias: {0,1,2}]   ;;  %s2280_s1 = inlined_call_operand.vmem [shape: bf16[2,16,16,4], index: 1, kind: input, shape index: {}, may-alias: {0,1,2}]   ;;  %s2281_s2 = inlined_call_operand.vmem [shape: bf16[2,16,16,4], index: 2, kind: input, shape index: {}, may-alias: {0,1,2}]   ;;  %s2282_s3 = inlined_call_operand.vmem [shape: f32[1,4], index: 3, kind: input, shape index: {}]   ;;  %s2283_s4 = inlined_call_operand.vmem [shape: f32[1,4], index: 4, kind: input, shape index: {}]   ;;  %s2284_s5 = inlined_call_operand.vmem [shape: bf16[36,128], index: 5, kind: input, shape index: {}]   ;;  %s2285_s6 = inlined_call_operand.vmem [shape: bf16[2,16,16,128], index: 6, kind: output, shape index: {0}]   ;;  %s2286_s7 = inlined_call_operand.vmem [shape: f32[2,2,2,128], index: 7, kind: output, shape index: {1}]  }
   0x1   :  { %s1767_s26 = smov 0   ;;  %s1769_s27 = smov 0  }
   0x2   :  { %s1771_s3 = smov 0  }
   0x3 LB: > { %s27_s4 = sadd.s32 1, %s1705_s26  ;;  %s30_s28 = sadd.s32 1, %s1709_s27  ;;  %s1713_s3 = sphi %s1771_s3, %s18_s3   ;;  %s1709_s27 = sphi %s1769_s27, %s2293_s27   ;;  %s1705_s26 = sphi %s1767_s26, %s2292_s26   ;;  %s1701_s25 = sphi %s1765_s25, %s2291_s25   ;;  %s1697_s24 = sphi %s1763_s24, %s2290_s24  }
   0x4   : > { %p28_p0 = scmp.ge.s32.totalorder %s27_s4, 2  ;;  %p1481_p1 = scmp.ge.s32.totalorder %s1713_s3, 1 }
   0x5   : > { %p328_p2 = scmp.lt.s32.totalorder %s1713_s3, 5 }
   0x6   : > { %s2295_s4 = smov (%p28_p0, %s27_s4), 0  ;;  %s2297_s28 = smov (!%p28_p0, %s30_s28), %s1709_s27 }
   0x7   : > { %p329_p3 = pnand %p1481_p1, %p328_p2  ;;  %p32_p4 = scmp.ge.s32.totalorder %s2297_s28, 2 }
   0x8   : > { %s1796_s29 = sshll.u32 (!%p329_p3), %s1697_s24, 3  ;;  %p405_p5 = scmp.lt.s32.totalorder (!%p329_p3), %s1701_s25, 1 }
   0x9   : > { %s2299_s28 = smov (%p32_p4, %s2297_s28), 0  ;;  %332 = sbr.rel (%p329_p3) target bundleno = 474 (0x1da), region = 44 }
   0xa   : > { %p407_p6 = scmp.lt.s32.totalorder (!%p329_p3), %s1796_s29, 15  ;;  %s1487_s15 = sadd.s32 (!%p329_p3), 4294967295, %s1796_s29 }
   0xb   : > { %p417_p7 = scmp.gt.s32.totalorder (!%p329_p3), %s1487_s15, 0  ;;  %p1488_p8 = scmp.lt.s32.totalorder (!%p329_p3), %s1487_s15, 15 }
   0xc   : > { %p489_p9 = scmp.eq.s32.totalorder (!%p329_p3), %s1697_s24, 0  ;;  %s1715_s20 = smov (!%p329_p3), 12  }
   0xd   : > { %s1716_s21 = smov (!%p329_p3), 24   ;;  %s1717_s12 = smov (!%p329_p3), 8  }
   0xe   : > { %s2301_s25 = smov (!%p405_p5, %s1701_s25), 1  ;;  %vm641_vm0 = vcmask 1040384   ;;  %vm642_vm1 = vsmask.f32 256  ;;  %vm793_vm3 = vcmask 1046528   ;;  %s1718_s13 = smov 32  }
   0xf   : > { %s408_s30 = scalar_select %p407_p6, %s1796_s29, 15  ;;  %vm1823_vm2 = vmand %vm641_vm0, %vm642_vm1  ;;  %vm664_vm4 = vsmask.f32 7424  ;;  %vm1137_vm6 = vcmask 1041408   ;;  %vm964_vm8 = vcmask 31744   ;;  %vm981_vm9 = vcmask 64512  }
  0x10   : > { %s1803_s8 = sshll.u32 %s2301_s25, 5  ;;  %s1722_s23 = smov 4   ;;  %vm998_vm10 = vcmask 97280   ;;  %vm1032_vm11 = vcmask 162816   ;;  %vm1015_vm12 = vcmask 130048   ;;  %vm1049_vm13 = vcmask 195584  }
  0x11   : > { %s1483_s9 = sshll.u32 %s408_s30, 1  ;;  %p495_p11 = scmp.eq.s32.totalorder %s1697_s24, 1  ;;  %vm1066_vm14 = vcmask 228352   ;;  %vm1083_vm15 = vcmask 261120   ;;  %vm1120_vm1 = vcmask 293888  }
  0x12   : > { %s1806_s10 = sadd.s32 %s1803_s8, %s1483_s9  ;;  %p462_p12 = scmp.lt.s32.totalorder %s1697_s24, 1 }
  0x13   : > { %s1485_s11 = sshll.u32 %s1806_s10, 2  ;;  %s1507_s10 = sshll.u32 %s2301_s25, 1 }
  0x14   : > { %s1814_s14 = scalar_lea.vmem %s2279_s0, %s1485_s11  ;;  %s2309_s24 = smov (!%p462_p12, %s1697_s24), 1 }
  0x15   : > { %v1561_v0 = vld [vmem:[%s1814_s14] sm:$0xff]  ;;  %v1562_v1 = vld [vmem:[%s1814_s14 + $0x8] sm:$0xff]  ;;  %v1563_v2 = vld [vmem:[%s1814_s14 + $0x10] sm:$0xff]  ;;  %s418_s16 = scalar_select %p417_p7, %s1487_s15, 0 }
  0x16   : > { %v1564_v3 = vld [vmem:[%s1814_s14 + $0x18] sm:$0xff]  ;;  %v559_v4 = vshrl.u32 %v1561_v0, 16  ;;  %v562_v5 = vshll.u32 %v1561_v0, 16  ;;  %v566_v6 = vshrl.u32 %v1562_v1, 16  ;;  %v569_v7 = vshll.u32 %v1562_v1, 16  ;;  %v1565_v47 = vld [vmem:[%s1814_s14 + $0x20] sm:$0xff] }
  0x17   : > { %v573_v9 = vshrl.u32 %v1563_v2, 16  ;;  %v580_v10 = vshrl.u32 %v1564_v3, 16  ;;  %v576_v13 = vshll.u32 %v1563_v2, 16  ;;  %s1827_s17 = scalar_select %p489_p9, 1, 0  ;;  %v583_v21 = vshll.u32 %v1564_v3, 16 }
  0x18   : > { %v561_v11 = vrot.slane %v559_v4, 7  ;;  %v568_v12 = vrot.slane %v566_v6, 7  ;;  %s2303_s16 = smov (!%p1488_p8, %s418_s16), 15  ;;  %v587_v58 = vshrl.u32 %v1565_v47, 16  ;;  %s1719_s15 = smov 28  }
  0x19   : > { %v1829_v14 = vrot.slane %v573_v9, 7  ;;  %s1493_s18 = sshll.u32 %s2303_s16, 1  ;;  %v582_v20 = vrot.slane %v580_v10, 7  ;;  %v491_v29 = vstv %s1827_s17  ;;  %s433_s16 = sadd.s32 8, %s1796_s29 }
  0x1a   : > { %v564_v15 = vor.u32 %v562_v5, %v561_v11  ;;  %v571_v16 = vor.u32 %v569_v7, %v568_v12  ;;  %v656_v17 = vsel %vm1823_vm2, %v568_v12, 0  ;;  %v655_v19 = vsel %vm1823_vm2, %v561_v11, 0  ;;  %s425_s19 = sadd.s32 %s1493_s18, %s1803_s8  ;;  %p1896_p10 = scmp.lt.s32.totalorder %s433_s16, 15 }
  0x1b   : > { %v801_v18 = vrot.slane %v656_v17, 1  ;;  %v578_v24 = vor.u32 %v576_v13, %v1829_v14  ;;  %v697_v25 = vshll.u32 %v656_v17, 16  ;;  %s1495_s22 = sshll.u32 %s425_s19, 2  ;;  %v585_v35 = vor.u32 %v583_v21, %v582_v20  ;;  %s1720_s29 = smov 16  }
  0x1c   : > { %v1838_v22 = vsel %vm1823_vm2, 0, %v564_v15  ;;  %v1842_v23 = vsel %vm1823_vm2, 0, %v571_v16  ;;  %s427_s9 = scalar_lea.vmem %s2280_s1, %s1495_s22  ;;  %v685_v37 = vshll.u32 %v655_v19, 16  ;;  %vm492_vm5 = vcmp.eq.s32.totalorder %v491_v29, 1  ;;  %s2305_s16 = smov (!%p1896_p10, %s433_s16), 15  ;;  %v1566_v29 = vld [vmem:[%s1814_s14 + $0x28] sm:$0xff] }
  0x1d   : > { %835 = vrot.lane.b32.xlu1 %v1838_v22, %s1715_s20  ;;  %900 = vrot.lane.b32.xlu2 %v1842_v23, %s1716_s21  ;;  %v800_v26 = vrot.slane %v1842_v23, 1  ;;  %v690_v27 = vshrl.u32 %v1842_v23, 16  ;;  %v692_v28 = vshll.u32 %v1842_v23, 16  ;;  %v680_v30 = vshll.u32 %v1838_v22, 16  ;;  %v485_v33 = vld [vmem:[%s427_s9] sm:$0xf] }
  0x1e   : > { %v486_v34 = vld [vmem:[%s427_s9 + $0x4] sm:$0xf]  ;;  %v1865_v36 = vsel %vm1823_vm2, 0, %v578_v24  ;;  %v699_v39 = vrot.slane %v697_v25, 1  ;;  %v493_v40 = vsel %vm492_vm5, 0, %v485_v33  ;;  %v678_v42 = vshrl.u32 %v1838_v22, 16 }
  0x1f   : > { %v1859_v31 = vsel %vm793_vm3, %v800_v26, %v801_v18  ;;  %v694_v32 = vrot.slane %v692_v28, 1  ;;  %v494_v41 = vsel %vm492_vm5, 0, %v486_v34  ;;  %v682_v43 = vrot.slane %v680_v30, 1  ;;  %s1721_s18 = smov 20   ;;  %s2307_s16 = smov (!%p1896_p10, %s2305_s16), 15 }
  0x20   : > { %822 = vrot.lane.b32.xlu0 %v1859_v31, %s1717_s12  ;;  %v521_v44 = vunpack.c.l.b16 %v493_v40  ;;  %v522_v45 = vunpack.c.l.b16 %v494_v41  ;;  %v1870_v46 = vsel %vm1823_vm2, 0, %v585_v35  ;;  %v798_v48 = vrot.slane %v655_v19, 1  ;;  %s1919_s19 = sshll.u32 %s2307_s16, 1 }
  0x21   : > { %v695_v38 = vor.u32 %v694_v32, %v690_v27  ;;  %v687_v51 = vrot.slane %v685_v37, 1  ;;  %v797_v52 = vrot.slane %v1838_v22, 1  ;;  %v658_v53 = vsel %vm1823_vm2, %v582_v20, 0  ;;  %s442_s22 = sadd.s32 %s1919_s19, %s1803_s8 }
  0x22   : > { %v541_v49 = vpack.c.b16 %v522_v45, %v521_v44  ;;  %v683_v54 = vor.u32 %v682_v43, %v678_v42  ;;  %v716_v57 = vshll.u32 %v1870_v46, 16  ;;  %v714_v61 = vshrl.u32 %v1870_v46, 16  ;;  %s1502_s9 = sshll.u32 %s442_s22, 2 }
  0x23   : > { %v1878_v50 = vsel %vm664_vm4, %v695_v38, %v699_v39  ;;  %v1887_v60 = vsel %vm793_vm3, %v797_v52, %v798_v48  ;;  %v721_v62 = vshll.u32 %v658_v53, 16  ;;  %v589_v4 = vrot.slane %v587_v58, 7  ;;  %s496_s16 = scalar_select %p495_p11, 1, 0 }
  0x24   : > { %v552_v55 = vshrl.u32 %v541_v49, 16  ;;  %v555_v56 = vshll.u32 %v541_v49, 16  ;;  %v1892_v63 = vsel %vm664_vm4, %v683_v54, %v687_v51  ;;  %v718_v2 = vrot.slane %v716_v57, 1  ;;  %s444_s30 = scalar_lea.vmem %s2281_s2, %s1502_s9 }
  0x25   : > { %948 = vrot.lane.b32.xlu1 %v1859_v31, %s1718_s13  ;;  %839 = vrot.lane.b32.xlu2 %v1865_v36, %s1715_s20  ;;  %v590_v5 = vshll.u32 %v1565_v47, 16  ;;  %v723_v10 = vrot.slane %v721_v62, 1  ;;  %v704_v11 = vshll.u32 %v1865_v36, 16  ;;  %v657_v13 = vsel %vm1823_vm2, %v1829_v14, 0 }
  0x26   : > { %v554_v59 = vrot.slane %v552_v55, 7  ;;  %v719_v9 = vor.u32 %v718_v2, %v714_v61  ;;  %v806_v16 = vrot.slane %v1870_v46, 1  ;;  %v807_v17 = vrot.slane %v658_v53, 1 }
  0x27   : > { %v592_v15 = vor.u32 %v590_v5, %v589_v4  ;;  %v702_v20 = vshrl.u32 %v1865_v36, 16  ;;  %v706_v21 = vrot.slane %v704_v11, 1  ;;  %v709_v14 = vshll.u32 %v657_v13, 16 }
  0x28   : > { %928 = vrot.lane.b32.xlu0 %v1878_v50, %s1719_s15  ;;  %v557_v0 = vor.u32 %v555_v56, %v554_v59  ;;  %v654_v1 = vsel %vm1823_vm2, %v554_v59, 0  ;;  %v1926_v19 = vsel %vm664_vm4, %v719_v9, %v723_v10  ;;  %v1938_v25 = vsel %vm793_vm3, %v806_v16, %v807_v17 }
  0x29   : > { %v795_v3 = vrot.slane %v654_v1, 1  ;;  %v1931_v24 = vsel %vm1823_vm2, 0, %v592_v15  ;;  %v673_v28 = vshll.u32 %v654_v1, 16  ;;  %v707_v30 = vor.u32 %v706_v21, %v702_v20 }
  0x2a   : > { %v1902_v6 = vsel %vm1823_vm2, 0, %v557_v0  ;;  %v711_v32 = vrot.slane %v709_v14, 1  ;;  %v728_v33 = vshll.u32 %v1931_v24, 16  ;;  %v659_v34 = vsel %vm1823_vm2, %v589_v4, 0  ;;  %v1567_v4 = vld [vmem:[%s1814_s14 + $0x30] sm:$0xff] }
  0x2b   : > { %v794_v7 = vrot.slane %v1902_v6, 1  ;;  %v668_v18 = vshll.u32 %v1902_v6, 16  ;;  %v666_v26 = vshrl.u32 %v1902_v6, 16  ;;  %v675_v37 = vrot.slane %v673_v28, 1 }
  0x2c   : > { %v594_v38 = vshrl.u32 %v1566_v29, 16  ;;  %v1948_v39 = vsel %vm664_vm4, %v707_v30, %v711_v32  ;;  %v726_v40 = vshrl.u32 %v1931_v24, 16  ;;  %v730_v41 = vrot.slane %v728_v33, 1 }
  0x2d   : > { %863 = vrot.lane.b32.xlu1 %v1892_v63, %s1720_s29  ;;  %883 = vrot.lane.b32.xlu2 %v1887_v60, %s1721_s18  ;;  %v796_v12 = vsel %vm793_vm3, %v794_v7, %v795_v3  ;;  %v670_v27 = vrot.slane %v668_v18, 1  ;;  %v733_v42 = vshll.u32 %v659_v34, 16  ;;  %v597_v45 = vshll.u32 %v1566_v29, 16 }
  0x2e   : > { %v596_v44 = vrot.slane %v594_v38, 7  ;;  %v731_v47 = vor.u32 %v730_v41, %v726_v40  ;;  %v803_v49 = vrot.slane %v1865_v36, 1  ;;  %v804_v51 = vrot.slane %v657_v13, 1 }
  0x2f   : > { %v671_v35 = vor.u32 %v670_v27, %v666_v26  ;;  %v735_v48 = vrot.slane %v733_v42, 1  ;;  %v809_v57 = vrot.slane %v1931_v24, 1  ;;  %v810_v58 = vrot.slane %v659_v34, 1 }
  0x30   : > { %818 = vrot.lane.b32.xlu0 %v796_v12, %s1717_s12  ;;  %v599_v52 = vor.u32 %v597_v45, %v596_v44  ;;  %v1964_v54 = vsel %vm793_vm3, %v803_v49, %v804_v51  ;;  %v660_v59 = vsel %vm1823_vm2, %v596_v44, 0  ;;  %v601_v7 = vshrl.u32 %v1567_v4, 16 }
  0x31   : > { %v676_v43 = vsel %vm664_vm4, %v671_v35, %v675_v37  ;;  %v1959_v53 = vsel %vm664_vm4, %v731_v47, %v735_v48  ;;  %v745_v0 = vshll.u32 %v660_v59, 16  ;;  %v1982_v1 = vsel %vm793_vm3, %v809_v57, %v810_v58 }
  0x32   : > { %v1970_v55 = vsel %vm1823_vm2, 0, %v599_v52  ;;  %v813_v10 = vrot.slane %v660_v59, 1  ;;  %v603_v11 = vrot.slane %v601_v7, 7  ;;  %v604_v12 = vshll.u32 %v1567_v4, 16  ;;  %v1104_v52 = vld [vmem:[%s2284_s5 + $0x10] sm:$0x3] }
  0x33   : > { %v740_v56 = vshll.u32 %v1970_v55, 16  ;;  %v738_v61 = vshrl.u32 %v1970_v55, 16  ;;  %v747_v3 = vrot.slane %v745_v0, 1  ;;  %v812_v9 = vrot.slane %v1970_v55, 1  ;;  %v1569_v4 = vld [vmem:[%s2284_s5] sm:$0xff] }
  0x34   : > { %v661_v17 = vsel %vm1823_vm2, %v603_v11, 0  ;;  %v497_v0 = vstv %s496_s16 }
  0x35   : > { %769 = vrot.lane.b32.xlu1 %v1926_v19, %s1722_s23  ;;  %765 = vrot.lane.b32.xlu2 %v1878_v50, %s1722_s23  ;;  %v742_v62 = vrot.slane %v740_v56, 1  ;;  %v2000_v13 = vsel %vm793_vm3, %v812_v9, %v813_v10  ;;  %v757_v21 = vshll.u32 %v661_v17, 16  ;;  %v816_v30 = vrot.slane %v661_v17, 1 }
  0x36   : > { %v1114_v56 = vunpack.c.l.b16 %v1104_v52  ;;  %vm498_vm7 = vcmp.eq.s32.totalorder %v497_v0, 1 }
  0x37   : > { %v743_v2 = vor.u32 %v742_v62, %v738_v61  ;;  %v759_v26 = vrot.slane %v757_v21, 1  ;;  %v1570_v62 = vld [vmem:[%s2284_s5 + $0x8] sm:$0xff] }
  0x38   : > { %826 = vrot.lane.b32.xlu0 %v1938_v25, %s1717_s12 }
  0x39   : > { %v1990_v5 = vsel %vm664_vm4, %v743_v2, %v747_v3  ;;  %v487_v2 = vld [vmem:[%s444_s30] sm:$0xf]  ;;  %v488_v3 = vld [vmem:[%s444_s30 + $0x4] sm:$0xf] }
  0x3a   : > { %v499_v9 = vsel %vm498_vm7, 0, %v487_v2  ;;  %v500_v10 = vsel %vm498_vm7, 0, %v488_v3 }
  0x3d   : > { %867 = vrot.lane.b32.xlu1 %v1948_v39, %s1720_s29  ;;  %843 = vrot.lane.b32.xlu2 %v1931_v24, %s1715_s20 }
  0x40   : > { %761 = vrot.lane.b32.xlu0 %v676_v43, %s1722_s23 }
  0x45   : > { %871 = vrot.lane.b32.xlu1 %v1959_v53, %s1720_s29  ;;  %904 = vrot.lane.b32.xlu2 %v1870_v46, %s1716_s21 }
  0x48   : > { %887 = vrot.lane.b32.xlu0 %v1964_v54, %s1721_s18 }
  0x4d   : > { %932 = vrot.lane.b32.xlu1 %v1926_v19, %s1719_s15  ;;  %908 = vrot.lane.b32.xlu2 %v1970_v55, %s1716_s21 }
  0x50   : > { %891 = vrot.lane.b32.xlu0 %v1982_v1, %s1721_s18 }
  0x55   : > { %763 = vrot.lane.b32.xlu1 %v1892_v63, %s1722_s23  ;;  %936 = vrot.lane.b32.xlu2 %v1990_v5, %s1719_s15  ;;  %v606_v63 = vor.u32 %v604_v12, %v603_v11 }
  0x57   : > { %v2010_v15 = vsel %vm1823_vm2, 0, %v606_v63  ;;  %v539_v63 = vunpack.c.l.b16 %v499_v9 }
  0x58   : > { %952 = vrot.lane.b32.xlu0 %v1938_v25, %s1718_s13  ;;  %v752_v16 = vshll.u32 %v2010_v15, 16  ;;  %v750_v18 = vshrl.u32 %v2010_v15, 16  ;;  %v815_v29 = vrot.slane %v2010_v15, 1 }
  0x5a   : > { %v754_v20 = vrot.slane %v752_v16, 1  ;;  %v2034_v33 = vsel %vm793_vm3, %v815_v29, %v816_v30 }
  0x5c   : > { %v755_v14 = vor.u32 %v754_v20, %v750_v18 }
  0x5d   : > { %956 = vrot.lane.b32.xlu1 %v2000_v13, %s1718_s13  ;;  %773 = vrot.lane.b32.xlu2 %v1990_v5, %s1722_s23 }
  0x5e   : > { %v2024_v28 = vsel %vm664_vm4, %v755_v14, %v759_v26 }
  0x60   : > { %820 = vrot.lane.b32.xlu0 %v1887_v60, %s1717_s12  ;;  %v1568_v60 = vld [vmem:[%s1814_s14 + $0x38] sm:$0xff] }
  0x61   : > { %v608_v27 = vshrl.u32 %v1568_v60, 16  ;;  %v611_v32 = vshll.u32 %v1568_v60, 16 }
  0x65   : > { %830 = vrot.lane.b32.xlu1 %v2000_v13, %s1717_s12  ;;  %865 = vrot.lane.b32.xlu2 %v1878_v50, %s1720_s29  ;;  %v610_v50 = vrot.slane %v608_v27, 7 }
  0x67   : > { %v613_v34 = vor.u32 %v611_v32, %v610_v50  ;;  %v662_v38 = vsel %vm1823_vm2, %v610_v50, 0 }
  0x68   : > { %837 = vrot.lane.b32.xlu0 %v1842_v23, %s1715_s20  ;;  %v859_v42 = vshll.u32 %v662_v38, 16  ;;  %v881_v44 = vrot.slane %v662_v38, 1 }
  0x6a   : > { %v861_v48 = vrot.slane %v859_v42, 1 }
  0x6d   : > { %885 = vrot.lane.b32.xlu1 %v1859_v31, %s1721_s18  ;;  %875 = vrot.lane.b32.xlu2 %v2024_v28, %s1720_s29  ;;  %v2042_v31 = vsel %vm1823_vm2, 0, %v613_v34 }
  0x6e   : > { %v854_v37 = vshll.u32 %v2042_v31, 16  ;;  %v852_v40 = vshrl.u32 %v2042_v31, 16  ;;  %v880_v43 = vrot.slane %v2042_v31, 1 }
  0x70   : > { %847 = vrot.lane.b32.xlu0 %v2010_v15, %s1715_s20  ;;  %v856_v41 = vrot.slane %v854_v37, 1  ;;  %v2062_v49 = vsel %vm793_vm3, %v880_v43, %v881_v44 }
  0x72   : > { %v857_v47 = vor.u32 %v856_v41, %v852_v40 }
  0x75   : > { %895 = vrot.lane.b32.xlu1 %v2034_v33, %s1721_s18  ;;  %930 = vrot.lane.b32.xlu2 %v1948_v39, %s1719_s15 }
  0x77   : > { %v2044_v35 = vpop.permute.xlu2 %900 }
  0x78   : > { %902 = vrot.lane.b32.xlu0 %v1865_v36, %s1716_s21 }
  0x7d   : > { %950 = vrot.lane.b32.xlu1 %v1964_v54, %s1718_s13  ;;  %767 = vrot.lane.b32.xlu2 %v1948_v39, %s1722_s23  ;;  %v2067_v39 = vsel %vm664_vm4, %v857_v47, %v861_v48 }
  0x7f   : > { %v2057_v45 = vpop.permute.xlu2 %839 }
  0x80   : > { %912 = vrot.lane.b32.xlu0 %v2042_v31, %s1716_s21 }
  0x85   : > { %824 = vrot.lane.b32.xlu1 %v1964_v54, %s1717_s12  ;;  %960 = vrot.lane.b32.xlu2 %v2062_v49, %s1718_s13  ;;  %v1117_v54 = vpack.c.b16 %v1114_v56, %v1114_v56 }
  0x87   : > { %v2071_v51 = vpop.permute.xlu2 %883  ;;  %v1139_v58 = vsel %vm1137_vm6, %v1117_v54, 0 }
  0x88   : > { %940 = vrot.lane.b32.xlu0 %v2067_v39, %s1719_s15  ;;  %1146 = vmatpush.bf16.msra.mxu0 %v1139_v58 }
  0x89   : > { %1618 = vmatpush.bf16.msra.mxu1 %v1139_v58  ;;  %1619 = vmatpush.bf16.msra.mxu2 %v1139_v58 }
  0x8a   : > { %1620 = vmatpush.bf16.msra.mxu3 %v1139_v58 }
  0x8c   : > { %1147 = vmatpush.bf16.msra.mxu0 %v1570_v62 }
  0x8d   : > { %841 = vrot.lane.b32.xlu1 %v1870_v46, %s1715_s20  ;;  %828 = vrot.lane.b32.xlu2 %v1982_v1, %s1717_s12 }
  0x8e   : > { %1621 = vmatpush.bf16.msra.mxu1 %v1570_v62  ;;  %1622 = vmatpush.bf16.msra.mxu2 %v1570_v62 }
  0x8f   : > { %v2086_v57 = vpop.permute.xlu1 %835  ;;  %v2090_v59 = vpop.permute.xlu2 %765  ;;  %1623 = vmatpush.bf16.msra.mxu3 %v1570_v62 }
  0x90   : > { %771 = vrot.lane.b32.xlu0 %v1959_v53, %s1722_s23  ;;  %1148 = vmatpush.bf16.msra.mxu0 %v1569_v4 }
  0x92   : > { %v2095_v61 = vpop.permute.xlu0 %822  ;;  %1624 = vmatpush.bf16.msra.mxu1 %v1569_v4  ;;  %1625 = vmatpush.bf16.msra.mxu2 %v1569_v4 }
  0x93   : > { %1626 = vmatpush.bf16.msra.mxu3 %v1569_v4 }
  0x95   : > { %845 = vrot.lane.b32.xlu1 %v1970_v55, %s1715_s20  ;;  %889 = vrot.lane.b32.xlu2 %v1938_v25, %s1721_s18  ;;  %v540_v25 = vunpack.c.l.b16 %v500_v10 }
  0x97   : > { %v2107_v7 = vpop.permute.xlu1 %948  ;;  %v2111_v11 = vpop.permute.xlu2 %843  ;;  %v550_v16 = vpack.c.b16 %v540_v25, %v539_v63 }
  0x98   : > { %869 = vrot.lane.b32.xlu0 %v1926_v19, %s1720_s29 }
  0x99   : > { %v615_v18 = vshrl.u32 %v550_v16, 16  ;;  %v618_v60 = vshll.u32 %v550_v16, 16 }
  0x9a   : > { %v929_v12 = vpop.permute.xlu0 %928 }
  0x9b   : > { %v617_v21 = vrot.slane %v615_v18, 7 }
  0x9d   : > { %906 = vrot.lane.b32.xlu1 %v1931_v24, %s1716_s21  ;;  %893 = vrot.lane.b32.xlu2 %v2000_v13, %s1721_s18  ;;  %v620_v26 = vor.u32 %v618_v60, %v617_v21  ;;  %v663_v37 = vsel %vm1823_vm2, %v617_v21, 0 }
  0x9f   : > { %v864_v17 = vpop.permute.xlu1 %863  ;;  %v2119_v20 = vpop.permute.xlu2 %904  ;;  %v653_v27 = vsel %vm1823_vm2, 0, %v620_v26 }
  0xa0   : > { %873 = vrot.lane.b32.xlu0 %v1990_v5, %s1720_s29  ;;  %v919_v29 = vshll.u32 %v653_v27, 16  ;;  %v917_v50 = vshrl.u32 %v653_v27, 16  ;;  %v945_v54 = vrot.slane %v653_v27, 1 }
  0xa2   : > { %v819_v19 = vpop.permute.xlu0 %818  ;;  %v921_v32 = vrot.slane %v919_v29, 1 }
  0xa4   : > { %v922_v42 = vor.u32 %v921_v32, %v917_v50 }
  0xa5   : > { %910 = vrot.lane.b32.xlu1 %v2010_v15, %s1716_s21  ;;  %954 = vrot.lane.b32.xlu2 %v1982_v1, %s1718_s13 }
  0xa7   : > { %v770_v14 = vpop.permute.xlu1 %769  ;;  %v2129_v5 = vpop.permute.xlu2 %908 }
  0xa8   : > { %934 = vrot.lane.b32.xlu0 %v1959_v53, %s1719_s15  ;;  %v974_v56 = vsel %vm964_vm8, %v1870_v46, %v770_v14 }
  0xaa   : > { %v827_v13 = vpop.permute.xlu0 %826 }
  0xab   : > { %v991_v62 = vsel %vm981_vm9, %v974_v56, %v827_v13 }
  0xad   : > { %958 = vrot.lane.b32.xlu1 %v2034_v33, %s1718_s13  ;;  %775 = vrot.lane.b32.xlu2 %v2024_v28, %s1722_s23 }
  0xaf   : > { %v868_v1 = vpop.permute.xlu1 %867  ;;  %v937_v41 = vpop.permute.xlu2 %936 }
  0xb0   : > { %938 = vrot.lane.b32.xlu0 %v2024_v28, %s1719_s15 }
  0xb2   : > { %v762_v53 = vpop.permute.xlu0 %761 }
  0xb3   : > { %v966_v30 = vsel %vm964_vm8, %v1902_v6, %v762_v53  ;;  %v924_v6 = vshll.u32 %v663_v37, 16 }
  0xb4   : > { %v983_v34 = vsel %vm981_vm9, %v966_v30, %v819_v19 }
  0xb5   : > { %v1000_v38 = vsel %vm998_vm10, %v983_v34, %v2086_v57  ;;  %849 = vrot.lane.b32.xlu1 %v2042_v31, %s1715_s20  ;;  %877 = vrot.lane.b32.xlu2 %v2067_v39, %s1720_s29  ;;  %v926_v43 = vrot.slane %v924_v6, 1  ;;  %v946_v57 = vrot.slane %v663_v37, 1 }
  0xb6   : > { %v1017_v28 = vsel %vm1015_vm12, %v1000_v38, %v864_v17 }
  0xb7   : > { %v872_v40 = vpop.permute.xlu1 %871  ;;  %v1034_v8 = vsel %vm1032_vm11, %v1017_v28, %v2071_v51  ;;  %v927_v39 = vsel %vm664_vm4, %v922_v42, %v926_v43  ;;  %v774_v51 = vpop.permute.xlu2 %773 }
  0xb8   : > { %832 = vrot.lane.b32.xlu0 %v2034_v33, %s1717_s12  ;;  %v1051_v31 = vsel %vm1049_vm13, %v1034_v8, %v2044_v35  ;;  %v970_v33 = vsel %vm964_vm8, %v1842_v23, %v2090_v59  ;;  %v947_v59 = vsel %vm793_vm3, %v945_v54, %v946_v57  ;;  %s2247_s12 = scalar_lea.vmem %s2285_s6, %s1485_s11  ;;  %s465_s11 = sadd.s32 %s1507_s10, %s2309_s24 }
  0xb9   : > { %v1068_v44 = vsel %vm1066_vm14, %v1051_v31, %v929_v12  ;;  %v987_v52 = vsel %vm981_vm9, %v970_v33, %v2095_v61  ;;  %v1008_v61 = vsel %vm998_vm10, %v991_v62, %v2111_v11 }
  0xba   : > { %v888_v47 = vpop.permute.xlu0 %887  ;;  %v1085_v48 = vsel %vm1083_vm15, %v1068_v44, %v2107_v7  ;;  %v1004_v0 = vsel %vm998_vm10, %v987_v52, %v2057_v45  ;;  %v1025_v46 = vsel %vm1015_vm12, %v1008_v61, %v872_v40 }
  0xbb   : > { %1549 = vmatmul.msk.bf16.vlgmr.msra.gmra.mxu0 %vm1120_vm1, %v1085_v48  ;;  %v1021_v23 = vsel %vm1015_vm12, %v1004_v0, %v868_v1 }
  0xbd   : > { %914 = vrot.lane.b32.xlu1 %v653_v27, %s1716_s21  ;;  %942 = vrot.lane.b32.xlu2 %v927_v39, %s1719_s15 }
  0xbf   : > { %v933_v35 = vpop.permute.xlu1 %932  ;;  %v866_v45 = vpop.permute.xlu2 %865 }
  0xc0   : > { %897 = vrot.lane.b32.xlu0 %v2062_v49, %s1721_s18  ;;  %v1038_v49 = vsel %vm1032_vm11, %v1021_v23, %v888_v47 }
  0xc1   : > { %v1055_v3 = vsel %vm1049_vm13, %v1038_v49, %v2119_v20 }
  0xc2   : > { %v892_v58 = vpop.permute.xlu0 %891  ;;  %v1072_v7 = vsel %vm1066_vm14, %v1055_v3, %v933_v35 }
  0xc3   : > { %v1042_v4 = vsel %vm1032_vm11, %v1025_v46, %v892_v58 }
  0xc4   : > { %v1059_v12 = vsel %vm1049_vm13, %v1042_v4, %v2129_v5 }
  0xc5   : > { %v1076_v11 = vsel %vm1066_vm14, %v1059_v12, %v937_v41 }
  0xc7   : > { %v764_v2 = vpop.permute.xlu1 %763  ;;  %v876_v17 = vpop.permute.xlu2 %875 }
  0xc8   : > { %962 = vrot.lane.b32.xlu0 %v947_v59, %s1718_s13  ;;  %v968_v14 = vsel %vm964_vm8, %v1838_v22, %v764_v2  ;;  %v978_v22 = vsel %vm964_vm8, %v1970_v55, %v774_v51  ;;  %s1508_s13 = sshll.u32 %s465_s11, 1 }
  0xc9   : > { %s467_s18 = scalar_lea.vmem %s2286_s7, %s1508_s13 }
  0xca   : > { %v953_v9 = vpop.permute.xlu0 %952 }
  0xcb   : > { %v1089_v10 = vsel %vm1083_vm15, %v1072_v7, %v953_v9 }
  0xcc   : > { %1551 = vmatmul.msk.bf16.vlgmr.msra.gmra.mxu1 %vm1120_vm1, %v1089_v10 }
  0xcf   : > { %v957_v63 = vpop.permute.xlu1 %956  ;;  %v931_v20 = vpop.permute.xlu2 %930 }
  0xd0   : > { %v1093_v25 = vsel %vm1083_vm15, %v1076_v11, %v957_v63 }
  0xd1   : > { %1553 = vmatmul.msk.bf16.vlgmr.msra.gmra.mxu2 %vm1120_vm1, %v1093_v25 }
  0xd2   : > { %v821_v16 = vpop.permute.xlu0 %820 }
  0xd3   : > { %v985_v13 = vsel %vm981_vm9, %v968_v14, %v821_v16 }
  0xd7   : > { %v831_v19 = vpop.permute.xlu1 %830  ;;  %v768_v27 = vpop.permute.xlu2 %767 }
  0xd8   : > { %v995_v6 = vsel %vm981_vm9, %v978_v22, %v831_v19  ;;  %v972_v56 = vsel %vm964_vm8, %v1865_v36, %v768_v27 }
  0xda   : > { %v838_v18 = vpop.permute.xlu0 %837 }
  0xdb   : > { %v1002_v26 = vsel %vm998_vm10, %v985_v13, %v838_v18 }
  0xdc   : > { %v1019_v1 = vsel %vm1015_vm12, %v1002_v26, %v866_v45 }
  0xdf   : > { %v886_v21 = vpop.permute.xlu1 %885  ;;  %v961_v37 = vpop.permute.xlu2 %960 }
  0xe0   : > { %v1036_v53 = vsel %vm1032_vm11, %v1019_v1, %v886_v21 }
  0xe2   : > { %v848_v60 = vpop.permute.xlu0 %847 }
  0xe3   : > { %v1012_v28 = vsel %vm998_vm10, %v995_v6, %v848_v60 }
  0xe4   : > { %v1029_v8 = vsel %vm1015_vm12, %v1012_v28, %v876_v17 }
  0xe7   : > { %v896_v5 = vpop.permute.xlu1 %895  ;;  %v829_v44 = vpop.permute.xlu2 %828 }
  0xe8   : > { %v1046_v41 = vsel %vm1032_vm11, %v1029_v8, %v896_v5 }
  0xea   : > { %v903_v29 = vpop.permute.xlu0 %902 }
  0xeb   : > { %v1053_v30 = vsel %vm1049_vm13, %v1036_v53, %v903_v29 }
  0xec   : > { %v1070_v50 = vsel %vm1066_vm14, %v1053_v30, %v931_v20 }
  0xef   : > { %v951_v32 = vpop.permute.xlu1 %950  ;;  %v890_v39 = vpop.permute.xlu2 %889 }
  0xf0   : > { %v1087_v34 = vsel %vm1083_vm15, %v1070_v50, %v951_v32 }
  0xf1   : > { %1550 = vmatmul.msk.bf16.gmra.mxu0 %vm1120_vm1, %v1087_v34 }
  0xf2   : > { %v913_v38 = vpop.permute.xlu0 %912 }
  0xf3   : > { %v1063_v42 = vsel %vm1049_vm13, %v1046_v41, %v913_v38 }
  0xf7   : > { %v825_v40 = vpop.permute.xlu1 %824  ;;  %v894_v52 = vpop.permute.xlu2 %893 }
  0xf8   : > { %v989_v57 = vsel %vm981_vm9, %v972_v56, %v825_v40 }
  0xfa   : > { %v941_v43 = vpop.permute.xlu0 %940 }
  0xfb   : > { %v1080_v31 = vsel %vm1066_vm14, %v1063_v42, %v941_v43 }
  0xfc   : > { %v1097_v55 = vsel %vm1083_vm15, %v1080_v31, %v961_v37 }
  0xfd   : > { %1555 = vmatmul.msk.bf16.vlgmr.msra.gmra.mxu3 %vm1120_vm1, %v1097_v55 }
  0xff   : > { %v842_v47 = vpop.permute.xlu1 %841  ;;  %v955_v49 = vpop.permute.xlu2 %954 }
 0x100   : > { %v1006_v58 = vsel %vm998_vm10, %v989_v57, %v842_v47 }
 0x102   : > { %v772_v48 = vpop.permute.xlu0 %771 }
 0x103   : > { %v976_v23 = vsel %vm964_vm8, %v1931_v24, %v772_v48 }
 0x104   : > { %v993_v36 = vsel %vm981_vm9, %v976_v23, %v829_v44 }
 0x107   : > { %v846_v33 = vpop.permute.xlu1 %845  ;;  %v776_v11 = vpop.permute.xlu2 %775 }
 0x108   : > { %v1010_v4 = vsel %vm998_vm10, %v993_v36, %v846_v33  ;;  %v980_v25 = vsel %vm964_vm8, %v2010_v15, %v776_v11 }
 0x10a   : > { %v870_v35 = vpop.permute.xlu0 %869 }
 0x10b   : > { %v1023_v62 = vsel %vm1015_vm12, %v1006_v58, %v870_v35 }
 0x10c   : > { %v1040_v59 = vsel %vm1032_vm11, %v1023_v62, %v890_v39 }
 0x10f   : > { %v907_v51 = vpop.permute.xlu1 %906  ;;  %v878_v18 = vpop.permute.xlu2 %877 }
 0x110   : > { %v1057_v61 = vsel %vm1049_vm13, %v1040_v59, %v907_v51 }
 0x112   : > { %v874_v54 = vpop.permute.xlu0 %873 }
 0x113   : > { %v1027_v45 = vsel %vm1015_vm12, %v1010_v4, %v874_v54 }
 0x114   : > { %v1044_v24 = vsel %vm1032_vm11, %v1027_v45, %v894_v52 }
 0x117   : > { %v911_v0 = vpop.permute.xlu1 %910  ;;  %v943_v5 = vpop.permute.xlu2 %942 }
 0x118   : > { %v1061_v9 = vsel %vm1049_vm13, %v1044_v24, %v911_v0 }
 0x11a   : > { %v935_v2 = vpop.permute.xlu0 %934 }
 0x11b   : > { %v1074_v46 = vsel %vm1066_vm14, %v1057_v61, %v935_v2 }
 0x11c   : > { %v1091_v3 = vsel %vm1083_vm15, %v1074_v46, %v955_v49 }
 0x11d   : > { %1552 = vmatmul.msk.bf16.gmra.mxu1 %vm1120_vm1, %v1091_v3 }
 0x11f   : > { %v959_v7 = vpop.permute.xlu1 %958 }
 0x122   : > { %v939_v10 = vpop.permute.xlu0 %938 }
 0x123   : > { %v1078_v12 = vsel %vm1066_vm14, %v1061_v9, %v939_v10 }
 0x124   : > { %v1095_v63 = vsel %vm1083_vm15, %v1078_v12, %v959_v7 }
 0x125   : > { %1554 = vmatmul.msk.bf16.gmra.mxu2 %vm1120_vm1, %v1095_v63 }
 0x127   : > { %v850_v17 = vpop.permute.xlu1 %849 }
 0x12a   : > { %v833_v16 = vpop.permute.xlu0 %832 }
 0x12b   : > { %v997_v19 = vsel %vm981_vm9, %v980_v25, %v833_v16 }
 0x12c   : > { %v1014_v20 = vsel %vm998_vm10, %v997_v19, %v850_v17 }
 0x12d   : > { %v1031_v60 = vsel %vm1015_vm12, %v1014_v20, %v878_v18 }
 0x12f   : > { %v915_v13 = vpop.permute.xlu1 %914 }
 0x132   : > { %v898_v21 = vpop.permute.xlu0 %897 }
 0x133   : > { %v1048_v14 = vsel %vm1032_vm11, %v1031_v60, %v898_v21 }
 0x134   : > { %v1065_v26 = vsel %vm1049_vm13, %v1048_v14, %v915_v13 }
 0x135   : > { %v1082_v15 = vsel %vm1066_vm14, %v1065_v26, %v943_v5 }
 0x138   : > { %v1150_v27 = vpop.f32.mrf.mxu0 }
 0x139   : > { %v1243_v30 = vmul.f32 %v1150_v27, %v1150_v27 }
 0x13a   : > { %v963_v1 = vpop.permute.xlu0 %962 }
 0x13b   : > { %v1099_v29 = vsel %vm1083_vm15, %v1082_v15, %v963_v1 }
 0x13c   : > { %1556 = vmatmul.msk.bf16.gmra.mxu3 %vm1120_vm1, %v1099_v29 }
 0x140   : > { %v1152_v53 = vpop.f32.mrf.mxu0 }
 0x141   : > { %v1574_v50 = vpack.c.bf16 %v1152_v53, %v1150_v27  ;;  %v1222_v32 = vadd.f32 %v1152_v53, %v1150_v27  ;;  %v1244_v34 = vmul.f32 %v1152_v53, %v1152_v53 }
 0x143   : > { %1575 = vst [vmem:[%s2247_s12] sm:$0xff] %v1574_v50   ;;  %v1259_v22 = vadd.f32 %v1244_v34, %v1243_v30 }
 0x149   : > { %v1160_v37 = vpop.f32.mrf.mxu1 }
 0x14a   : > { %v1247_v39 = vmul.f32 %v1160_v37, %v1160_v37 }
 0x151   : > { %v1162_v38 = vpop.f32.mrf.mxu1 }
 0x152   : > { %v1584_v6 = vpack.c.bf16 %v1162_v38, %v1160_v37  ;;  %v1248_v58 = vmul.f32 %v1162_v38, %v1162_v38 }
 0x154   : > { %1612 = vst [vmem:[%s2247_s12 + $0x10] sm:$0xff] %v1584_v6   ;;  %v1170_v28 = vpop.f32.mrf.mxu2 }
 0x155   : > { %v1251_v4 = vmul.f32 %v1170_v28, %v1170_v28 }
 0x15c   : > { %v1172_v40 = vpop.f32.mrf.mxu2 }
 0x15d   : > { %v1594_v8 = vpack.c.bf16 %v1172_v40, %v1170_v28  ;;  %v1252_v9 = vmul.f32 %v1172_v40, %v1172_v40 }
 0x15f   : > { %1614 = vst [vmem:[%s2247_s12 + $0x20] sm:$0xff] %v1594_v8  }
 0x16e   : > { %v1155_v41 = vpop.f32.mrf.mxu0 }
 0x16f   : > { %v1223_v42 = vadd.f32 %v1222_v32, %v1155_v41  ;;  %v1245_v43 = vmul.f32 %v1155_v41, %v1155_v41 }
 0x171   : > { %v1260_v44 = vadd.f32 %v1259_v22, %v1245_v43 }
 0x176   : > { %v1157_v31 = vpop.f32.mrf.mxu0 }
 0x177   : > { %v1579_v55 = vpack.c.bf16 %v1157_v31, %v1155_v41  ;;  %v1224_v47 = vadd.f32 %v1223_v42, %v1157_v31  ;;  %v1246_v48 = vmul.f32 %v1157_v31, %v1157_v31 }
 0x179   : > { %1611 = vst [vmem:[%s2247_s12 + $0x8] sm:$0xff] %v1579_v55   ;;  %v1225_v33 = vadd.f32 %v1224_v47, %v1160_v37  ;;  %v1261_v35 = vadd.f32 %v1260_v44, %v1246_v48 }
 0x17b   : > { %v1262_v51 = vadd.f32 %v1261_v35, %v1247_v39  ;;  %v1226_v62 = vadd.f32 %v1225_v33, %v1162_v38 }
 0x17d   : > { %v1263_v59 = vadd.f32 %v1262_v51, %v1248_v58 }
 0x180   : > { %v1180_v52 = vpop.f32.mrf.mxu3 }
 0x181   : > { %v1255_v20 = vmul.f32 %v1180_v52, %v1180_v52 }
 0x188   : > { %v1182_v56 = vpop.f32.mrf.mxu3 }
 0x189   : > { %v1604_v54 = vpack.c.bf16 %v1182_v56, %v1180_v52  ;;  %v1256_v26 = vmul.f32 %v1182_v56, %v1182_v56 }
 0x18b   : > { %1616 = vst [vmem:[%s2247_s12 + $0x30] sm:$0xff] %v1604_v54  }
 0x19a   : > { %v1165_v57 = vpop.f32.mrf.mxu1 }
 0x19b   : > { %v1249_v0 = vmul.f32 %v1165_v57, %v1165_v57  ;;  %v1227_v23 = vadd.f32 %v1226_v62, %v1165_v57 }
 0x19d   : > { %v1264_v61 = vadd.f32 %v1263_v59, %v1249_v0 }
 0x1a2   : > { %v1167_v49 = vpop.f32.mrf.mxu1 }
 0x1a3   : > { %v1589_v2 = vpack.c.bf16 %v1167_v49, %v1165_v57  ;;  %v1228_v46 = vadd.f32 %v1227_v23, %v1167_v49  ;;  %v1250_v36 = vmul.f32 %v1167_v49, %v1167_v49 }
 0x1a5   : > { %1613 = vst [vmem:[%s2247_s12 + $0x18] sm:$0xff] %v1589_v2   ;;  %v1265_v3 = vadd.f32 %v1264_v61, %v1250_v36  ;;  %v1229_v45 = vadd.f32 %v1228_v46, %v1170_v28 }
 0x1a7   : > { %v1266_v24 = vadd.f32 %v1265_v3, %v1251_v4  ;;  %v1230_v10 = vadd.f32 %v1229_v45, %v1172_v40 }
 0x1a8   : > { %v1175_v7 = vpop.f32.mrf.mxu2 }
 0x1a9   : > { %v1253_v12 = vmul.f32 %v1175_v7, %v1175_v7  ;;  %v1267_v11 = vadd.f32 %v1266_v24, %v1252_v9  ;;  %v1231_v63 = vadd.f32 %v1230_v10, %v1175_v7 }
 0x1ab   : > { %v1268_v16 = vadd.f32 %v1267_v11, %v1253_v12 }
 0x1b0   : > { %v1177_v25 = vpop.f32.mrf.mxu2 }
 0x1b1   : > { %v1599_v17 = vpack.c.bf16 %v1177_v25, %v1175_v7  ;;  %v1232_v19 = vadd.f32 %v1231_v63, %v1177_v25  ;;  %v1254_v18 = vmul.f32 %v1177_v25, %v1177_v25 }
 0x1b3   : > { %1615 = vst [vmem:[%s2247_s12 + $0x28] sm:$0xff] %v1599_v17   ;;  %v1233_v21 = vadd.f32 %v1232_v19, %v1180_v52  ;;  %v1269_v60 = vadd.f32 %v1268_v16, %v1254_v18 }
 0x1b5   : > { %v1270_v14 = vadd.f32 %v1269_v60, %v1255_v20  ;;  %v1234_v5 = vadd.f32 %v1233_v21, %v1182_v56 }
 0x1b7   : > { %v1271_v1 = vadd.f32 %v1270_v14, %v1256_v26 }
 0x1bf   : > { %v1185_v13 = vpop.f32.mrf.mxu3 }
 0x1c0   : > { %v1257_v27 = vmul.f32 %v1185_v13, %v1185_v13  ;;  %v1235_v15 = vadd.f32 %v1234_v5, %v1185_v13 }
 0x1c2   : > { %v1272_v53 = vadd.f32 %v1271_v1, %v1257_v27 }
 0x1c7   : > { %v1187_v29 = vpop.f32.mrf.mxu3 }
 0x1c8   : > { %v1609_v30 = vpack.c.bf16 %v1187_v29, %v1185_v13  ;;  %v1236_v50 = vadd.f32 %v1235_v15, %v1187_v29  ;;  %v1258_v32 = vmul.f32 %v1187_v29, %v1187_v29 }
 0x1ca   : > { %1617 = vst [vmem:[%s2247_s12 + $0x38] sm:$0xff] %v1609_v30   ;;  %v1237_v34 = vrot.slane %v1236_v50, 4  ;;  %v1273_v22 = vadd.f32 %v1272_v53, %v1258_v32 }
 0x1cc   : > { %v1238_v37 = vadd.f32 %v1237_v34, %v1236_v50  ;;  %v1274_v38 = vrot.slane %v1273_v22, 4 }
 0x1ce   : > { %v1239_v6 = vrot.slane %v1238_v37, 2  ;;  %v1275_v28 = vadd.f32 %v1274_v38, %v1273_v22 }
 0x1d0   : > { %v1240_v40 = vadd.f32 %v1239_v6, %v1238_v37  ;;  %v1276_v8 = vrot.slane %v1275_v28, 2 }
 0x1d2   : > { %v1241_v41 = vrot.slane %v1240_v40, 1  ;;  %v1277_v42 = vadd.f32 %v1276_v8, %v1275_v28 }
 0x1d4   : > { %v1278_v43 = vrot.slane %v1277_v42, 1  ;;  %v1242_v31 = vadd.f32 %v1241_v41, %v1240_v40 }
 0x1d6   : > { %v1279_v44 = vadd.f32 %v1278_v43, %v1277_v42 }
 0x1d8   : > { %v1281_v55 = vsel %vm641_vm0, %v1242_v31, %v1279_v44 }
 0x1d9   : > { %1282 = vst [vmem:[%s467_s18] sm:$0x3] %v1281_v55 }
 0x1da PF: > { %s18_s3 = sadd.s32 1, %s1713_s3   ;;  %s2290_s24 = smov %s1705_s26 }
 0x1db   : > { %p15_p13 = scmp.ge.s32.totalorder %s18_s3, 6   ;;  %s2291_s25 = smov %s1709_s27 }
 0x1dc   : > { %s2292_s26 = smov %s2295_s4  ;;  %s2293_s27 = smov %s2299_s28 }
 0x1dd   :  { %17 = sbr.rel (!%p15_p13) target bundleno = 3 (0x3), region = 92 }

// kernel: _lambda_.4
= control target key start
LH: loop header
LB: loop body
LE: loop exit
PB: predicated region body
PF: predicated region fallthrough
CT: control target
= control target key end

     0   :  { %13 = vsyncpa [#allocation3], 0  ;;  %s3027_s24 = smov 0   ;;  %s3029_s25 = smov 0   ;;  %s3563_s0 = inlined_call_operand.vmem [shape: bf16[2,16,16,128], index: 0, kind: input, shape index: {}, may-alias: {0,1,2}]   ;;  %s3564_s1 = inlined_call_operand.vmem [shape: bf16[2,16,16,128], index: 1, kind: input, shape index: {}, may-alias: {0,1,2}]   ;;  %s3565_s2 = inlined_call_operand.vmem [shape: bf16[2,16,16,128], index: 2, kind: input, shape index: {}, may-alias: {0,1,2}]   ;;  %s3566_s3 = inlined_call_operand.vmem [shape: f32[1,128], index: 3, kind: input, shape index: {}]   ;;  %s3567_s4 = inlined_call_operand.vmem [shape: f32[1,128], index: 4, kind: input, shape index: {}]   ;;  %s3568_s5 = inlined_call_operand.hbm [shape: bf16[1152,128], index: 5, kind: input, shape index: {}]   ;;  %s3569_s6 = inlined_call_operand.vmem [shape: bf16[2,16,16,128], index: 6, kind: output, shape index: {0}]   ;;  %s3570_s7 = inlined_call_operand.vmem [shape: f32[2,2,2,128], index: 7, kind: output, shape index: {1}]  }
   0x1   :  { %s3031_s26 = smov 0   ;;  %s3033_s27 = smov 0  }
   0x2   :  { %s3035_s28 = smov 0  }
   0x3 LB: > { %s2331_s29 = sadd.s32 4294967295, %s2982_s28   ;;  %s28_s30 = sadd.s32 1, %s2974_s26  ;;  %s2982_s28 = sphi %s3035_s28, %s19_s28   ;;  %s2978_s27 = sphi %s3033_s27, %s3581_s27   ;;  %s2974_s26 = sphi %s3031_s26, %s3580_s26   ;;  %s2970_s25 = sphi %s3029_s25, %s3579_s25   ;;  %s2966_s24 = sphi %s3027_s24, %s3578_s24  }
   0x4   : > { %p29_p0 = scmp.ge.s32.totalorder %s28_s30, 2  ;;  %s31_s8 = sadd.s32 1, %s2978_s27 }
   0x5   : > { %p2339_p1 = scmp.ge.s32.totalorder %s2982_s28, 1  ;;  %p255_p2 = scmp.lt.s32.totalorder %s2982_s28, 5 }
   0x6   : > { %s3583_s30 = smov (%p29_p0, %s28_s30), 0  ;;  %s3585_s8 = smov (!%p29_p0, %s31_s8), %s2978_s27 }
   0x7   : > { %p3060_p3 = pnand %p2339_p1, %p255_p2  ;;  %p33_p4 = scmp.ge.s32.totalorder %s3585_s8, 2 }
   0x8   : > { %p3064_p5 = scmp.eq.s32.totalorder %s2331_s29, 0  ;;  %s272_s13 = sshll.u32 %s3568_s5, 4  ;;  %s273_s13 = int_to_ptr.hbm [resolvable:$true] %s272_s13 }
   0x9   : > { %p2857_p6 = pneg %p3060_p3  ;;  %s3587_s8 = smov (%p33_p4, %s3585_s8), 0 }
   0xa   : > { %s2984_s14 = smov [#allocation2]   ;;  %s2985_s16 = smov 64  }
   0xb   : > { %s274_s15 = sshll.u32 %s2984_s14, 4  ;;  %p2858_p7 = pnand %p3064_p5, %p2857_p6  ;;  %s275_s15 = int_to_ptr.vmem [resolvable:$true] %s274_s15 }
   0xc   : > { %s2986_s17 = smov 4   ;;  %344 = sbr.rel (%p3060_p3) target bundleno = 497 (0x1f1), region = 44 }
   0xd   : > { %2860 = dma.hbm_to_vmem [thread:$0]  (!%p2858_p7), %s273_s13, 9216, %s275_s15, [#allocation3], %s2985_s16, %s2985_s16, %s2986_s17  }
  0x11   : > { %2961 = dma.done.wait (%p3064_p5), [#allocation3], 9216  }
  0x12   : > { %2963 = vsyncadd (%p3064_p5), [#allocation3], 4294958080  ;;  %s3084_s18 = sshll.u32 %s2966_s24, 3  ;;  %p422_p8 = scmp.lt.s32.totalorder %s2970_s25, 1  ;;  %v2670_v0 = vld [vmem:[#allocation2 + $0x38] sm:$0xff]  ;;  %v2669_v1 = vld [vmem:[#allocation2 + $0x30] sm:$0xff] }
  0x13   : > { %p424_p9 = scmp.lt.s32.totalorder %s3084_s18, 15  ;;  %s2349_s19 = sadd.s32 4294967295, %s3084_s18  ;;  %2829 = vmatpush.bf16.msra.mxu1 %v2670_v0  ;;  %2830 = vmatpush.bf16.msra.mxu2 %v2670_v0  ;;  %v3112_v5 = vld [vmem:[%s3566_s3] ss:$0 sm:$0xff]  ;;  %v2668_v13 = vld [vmem:[#allocation2 + $0x28] sm:$0xff]  ;;  %vm806_vm2 = vcmask 1040384  }
  0x14   : > { %s3589_s25 = smov (!%p422_p8, %s2970_s25), 1  ;;  %p434_p10 = scmp.gt.s32.totalorder %s2349_s19, 0  ;;  %2831 = vmatpush.bf16.msra.mxu3 %v2670_v0  ;;  %1597 = vmatpush.bf16.msra.mxu0 %v2670_v0  ;;  %v3117_v6 = vld [vmem:[%s3567_s4] ss:$0 sm:$0xff]  ;;  %vm807_vm3 = vsmask.f32 256 }
  0x15   : > { %s425_s20 = scalar_select %p424_p9, %s3084_s18, 15  ;;  %v2667_v26 = vld [vmem:[#allocation2 + $0x20] sm:$0xff]  ;;  %v2666_v40 = vld [vmem:[#allocation2 + $0x18] sm:$0xff]  ;;  %v2665_v58 = vld [vmem:[#allocation2 + $0x10] sm:$0xff] }
  0x16   : > { %s3094_s21 = sshll.u32 %s3589_s25, 5  ;;  %p2350_p11 = scmp.lt.s32.totalorder %s2349_s19, 15  ;;  %vm3167_vm10 = vmand %vm806_vm2, %vm807_vm3 }
  0x17   : > { %s2345_s22 = sshll.u32 %s425_s20, 1  ;;  %p654_p12 = scmp.eq.s32.totalorder %s2966_s24, 0  ;;  %2832 = vmatpush.bf16.msra.mxu1 %v2669_v1  ;;  %2833 = vmatpush.bf16.msra.mxu2 %v2669_v1 }
  0x18   : > { %s3097_s23 = sadd.s32 %s3094_s21, %s2345_s22  ;;  %2834 = vmatpush.bf16.msra.mxu3 %v2669_v1  ;;  %1598 = vmatpush.bf16.msra.mxu0 %v2669_v1  ;;  %p660_p0 = scmp.eq.s32.totalorder %s2966_s24, 1 }
  0x19   : > { %s2347_s29 = sshll.u32 %s3097_s23, 2  ;;  %p479_p1 = scmp.lt.s32.totalorder %s2966_s24, 1 }
  0x1a   : > { %s3105_s11 = scalar_lea.vmem %s3563_s0, %s2347_s29  ;;  %s3518_s13 = scalar_lea.vmem %s3569_s6, %s2347_s29 }
  0x1b   : > { %v2815_v2 = vld [vmem:[%s3105_s11 + $0x8] sm:$0xff]   ;;  %s435_s12 = scalar_select %p434_p10, %s2349_s19, 0  ;;  %v2817_v7 = vld [vmem:[%s3105_s11 + $0x18] sm:$0xff]   ;;  %v3133_v19 = vld [vmem:[%s3105_s11 + $0x10] sm:$0xff]   ;;  %2835 = vmatpush.bf16.msra.mxu1 %v2668_v13  ;;  %2836 = vmatpush.bf16.msra.mxu2 %v2668_v13 }
  0x1c   : > { %v2741_v3 = vunpack.c.l.bf16 %v2815_v2  ;;  %v2742_v4 = vunpack.c.h.bf16 %v2815_v2  ;;  %v2749_v10 = vunpack.c.l.bf16 %v2817_v7  ;;  %v2750_v11 = vunpack.c.h.bf16 %v2817_v7  ;;  %v2819_v12 = vld [vmem:[%s3105_s11 + $0x28] sm:$0xff]   ;;  %s3126_s17 = scalar_select %p654_p12, 1, 0  ;;  %2837 = vmatpush.bf16.msra.mxu3 %v2668_v13  ;;  %1599 = vmatpush.bf16.msra.mxu0 %v2668_v13 }
  0x1d   : > { %s3591_s12 = smov (!%p2350_p11, %s435_s12), 15  ;;  %v2757_v14 = vunpack.c.l.bf16 %v2819_v12  ;;  %v2758_v15 = vunpack.c.h.bf16 %v2819_v12  ;;  %v2745_v31 = vunpack.c.l.bf16 %v3133_v19  ;;  %v2746_v7 = vunpack.c.h.bf16 %v3133_v19  ;;  %v2664_v13 = vld [vmem:[#allocation2 + $0x8] sm:$0xff]  ;;  %s3597_s24 = smov (!%p479_p1, %s2966_s24), 1 }
  0x1e   : > { %v529_v8 = vmul.f32 %v3112_v5, %v2741_v3  ;;  %v530_v9 = vmul.f32 %v3112_v5, %v2742_v4  ;;  %s2355_s19 = sshll.u32 %s3591_s12, 1  ;;  %v533_v18 = vmul.f32 %v3112_v5, %v2749_v10  ;;  %v534_v20 = vmul.f32 %v3112_v5, %v2750_v11  ;;  %s2369_s23 = sshll.u32 %s3589_s25, 1 }
  0x1f   : > { %s442_s20 = sadd.s32 %s2355_s19, %s3094_s21  ;;  %v537_v21 = vmul.f32 %v3112_v5, %v2757_v14  ;;  %v538_v22 = vmul.f32 %v3112_v5, %v2758_v15  ;;  %v656_v23 = vstv %s3126_s17  ;;  %2838 = vmatpush.bf16.msra.mxu1 %v2667_v26  ;;  %2839 = vmatpush.bf16.msra.mxu2 %v2667_v26  ;;  %v531_v12 = vmul.f32 %v3112_v5, %v2745_v31  ;;  %s482_s29 = sadd.s32 %s2369_s23, %s3597_s24 }
  0x20   : > { %v548_v16 = vadd.f32 %v3117_v6, %v529_v8  ;;  %v549_v17 = vadd.f32 %v3117_v6, %v530_v9  ;;  %s2357_s22 = sshll.u32 %s442_s20, 2  ;;  %v552_v27 = vadd.f32 %v3117_v6, %v533_v18  ;;  %v553_v28 = vadd.f32 %v3117_v6, %v534_v20  ;;  %2840 = vmatpush.bf16.msra.mxu3 %v2667_v26  ;;  %v2818_v8 = vld [vmem:[%s3105_s11 + $0x20] sm:$0xff]  }
  0x21   : > { %s444_s12 = scalar_lea.vmem %s3564_s1, %s2357_s22  ;;  %v556_v29 = vadd.f32 %v3117_v6, %v537_v21  ;;  %v557_v34 = vadd.f32 %v3117_v6, %v538_v22  ;;  %vm3149_vm8 = vcmp.eq.s32.totalorder %v656_v23, 1  ;;  %1600 = vmatpush.bf16.msra.mxu0 %v2667_v26  ;;  %v2753_v21 = vunpack.c.l.bf16 %v2818_v8 }
  0x22   : > { %vm564_vm0 = vcmp.ge.f32.partialorder %v548_v16, 0.0  ;;  %vm565_vm1 = vcmp.ge.f32.partialorder %v549_v17, 0.0  ;;  %v580_v24 = vmul.f32 0.01, %v548_v16  ;;  %v581_v25 = vmul.f32 0.01, %v549_v17 }
  0x23   : > { %v2768_v30 = vld [vmem:[%s444_s12] sm:$0xff]   ;;  %vm568_vm4 = vcmp.ge.f32.partialorder %v552_v27, 0.0  ;;  %vm569_vm5 = vcmp.ge.f32.partialorder %v553_v28, 0.0  ;;  %v584_v38 = vmul.f32 0.01, %v552_v27  ;;  %vm572_vm6 = vcmp.ge.f32.partialorder %v556_v29, 0.0  ;;  %2841 = vmatpush.bf16.msra.mxu1 %v2666_v40  ;;  %2842 = vmatpush.bf16.msra.mxu2 %v2666_v40 }
  0x24   : > { %v596_v32 = vsel %vm564_vm0, %v548_v16, %v580_v24  ;;  %v597_v33 = vsel %vm565_vm1, %v549_v17, %v581_v25  ;;  %v2769_v35 = vunpack.c.l.bf16 %v2768_v30  ;;  %v585_v39 = vmul.f32 0.01, %v553_v28  ;;  %2843 = vmatpush.bf16.msra.mxu3 %v2666_v40  ;;  %s661_s10 = scalar_select %p660_p0, 1, 0 }
  0x25   : > { %v612_v36 = vpack.c.bf16 %v596_v32, %v596_v32  ;;  %v613_v37 = vpack.c.bf16 %v597_v33, %v597_v33  ;;  %vm573_vm7 = vcmp.ge.f32.partialorder %v557_v34, 0.0  ;;  %v588_v43 = vmul.f32 0.01, %v556_v29  ;;  %1601 = vmatpush.bf16.msra.mxu0 %v2666_v40  ;;  %v2686_v40 = vld [vmem:[#allocation2 + $0xb8] sm:$0xff] }
  0x26   : > { %v589_v44 = vmul.f32 0.01, %v557_v34  ;;  %v600_v46 = vsel %vm568_vm4, %v552_v27, %v584_v38  ;;  %v601_v47 = vsel %vm569_vm5, %v553_v28, %v585_v39  ;;  %v2770_v48 = vunpack.c.h.bf16 %v2768_v30  ;;  %v2663_v30 = vld [vmem:[#allocation2] sm:$0xff]  ;;  %v2820_v38 = vld [vmem:[%s3105_s11 + $0x30] sm:$0xff]  }
  0x27   : > { %v690_v41 = vunpack.c.l.b16 %v612_v36  ;;  %v691_v42 = vunpack.c.l.b16 %v613_v37  ;;  %v628_v49 = vmul.f32 %v3112_v5, %v2769_v35  ;;  %v616_v51 = vpack.c.bf16 %v600_v46, %v600_v46  ;;  %2844 = vmatpush.bf16.msra.mxu1 %v2665_v58  ;;  %2845 = vmatpush.bf16.msra.mxu2 %v2665_v58 }
  0x28   : > { %v617_v52 = vpack.c.bf16 %v601_v47, %v601_v47  ;;  %v604_v53 = vsel %vm572_vm6, %v556_v29, %v588_v43  ;;  %v605_v54 = vsel %vm573_vm7, %v557_v34, %v589_v44  ;;  %v629_v56 = vmul.f32 %v3112_v5, %v2770_v48  ;;  %2846 = vmatpush.bf16.msra.mxu3 %v2665_v58  ;;  %v2702_v48 = vld [vmem:[#allocation2 + $0x138] sm:$0xff] }
  0x29   : > { %v708_v50 = vpack.c.b16 %v691_v42, %v690_v41  ;;  %v620_v55 = vpack.c.bf16 %v604_v53, %v604_v53  ;;  %v630_v57 = vadd.f32 %v3117_v6, %v628_v49  ;;  %v694_v61 = vunpack.c.l.b16 %v616_v51  ;;  %1602 = vmatpush.bf16.msra.mxu0 %v2665_v58  ;;  %v2678_v41 = vld [vmem:[#allocation2 + $0x78] sm:$0xff]  ;;  %v3199_v53 = vld [vmem:[%s3105_s11] sm:$0xff]  }
  0x2a   : > { %v695_v62 = vunpack.c.l.b16 %v617_v52  ;;  %v621_v63 = vpack.c.bf16 %v605_v54, %v605_v54  ;;  %v631_v1 = vadd.f32 %v3117_v6, %v629_v56  ;;  %v532_v25 = vmul.f32 %v3112_v5, %v2746_v7 }
  0x2b   : > { %v731_v59 = vshrl.u32 %v708_v50, 16  ;;  %v734_v60 = vshll.u32 %v708_v50, 16  ;;  %v698_v0 = vunpack.c.l.b16 %v620_v55  ;;  %vm632_vm9 = vcmp.ge.f32.partialorder %v630_v57, 0.0  ;;  %2847 = vmatpush.bf16.msra.mxu1 %v2664_v13  ;;  %2848 = vmatpush.bf16.msra.mxu2 %v2664_v13  ;;  %v2694_v55 = vld [vmem:[#allocation2 + $0xf8] sm:$0xff] }
  0x2c   : > { %v710_v3 = vpack.c.b16 %v695_v62, %v694_v61  ;;  %v634_v4 = vmul.f32 0.01, %v630_v57  ;;  %v699_v10 = vunpack.c.l.b16 %v621_v63  ;;  %vm633_vm11 = vcmp.ge.f32.partialorder %v631_v1, 0.0  ;;  %2849 = vmatpush.bf16.msra.mxu3 %v2664_v13 }
  0x2d   : > { %v3161_v2 = vrot.slane %v731_v59, 7  ;;  %v635_v11 = vmul.f32 0.01, %v631_v1  ;;  %v550_v29 = vadd.f32 %v3117_v6, %v531_v12  ;;  %v551_v34 = vadd.f32 %v3117_v6, %v532_v25  ;;  %1603 = vmatpush.bf16.msra.mxu0 %v2664_v13  ;;  %v2685_v59 = vld [vmem:[#allocation2 + $0xb0] sm:$0xff] }
  0x2e   : > { %v745_v15 = vshrl.u32 %v710_v3, 16  ;;  %v748_v16 = vshll.u32 %v710_v3, 16  ;;  %v636_v17 = vsel %vm632_vm9, %v630_v57, %v634_v4  ;;  %v712_v18 = vpack.c.b16 %v699_v10, %v698_v0  ;;  %v2693_v12 = vld [vmem:[#allocation2 + $0xf0] sm:$0xff] }
  0x2f   : > { %v736_v14 = vor.u32 %v734_v60, %v3161_v2  ;;  %v637_v19 = vsel %vm633_vm11, %v631_v1, %v635_v11  ;;  %v638_v20 = vpack.c.bf16 %v636_v17, %v636_v17  ;;  %vm566_vm12 = vcmp.ge.f32.partialorder %v550_v29, 0.0  ;;  %2850 = vmatpush.bf16.msra.mxu1 %v2663_v30  ;;  %2851 = vmatpush.bf16.msra.mxu2 %v2663_v30  ;;  %v2677_v60 = vld [vmem:[#allocation2 + $0x70] sm:$0xff]  ;;  %v2684_v17 = vld [vmem:[#allocation2 + $0xa8] sm:$0xff] }
  0x30   : > { %v3178_v23 = vrot.slane %v745_v15, 7  ;;  %v639_v24 = vpack.c.bf16 %v637_v19, %v637_v19  ;;  %v759_v26 = vshrl.u32 %v712_v18, 16  ;;  %v762_v27 = vshll.u32 %v712_v18, 16  ;;  %2852 = vmatpush.bf16.msra.mxu3 %v2663_v30  ;;  %v2701_v13 = vld [vmem:[#allocation2 + $0x130] sm:$0xff]  ;;  %v2676_v18 = vld [vmem:[#allocation2 + $0x68] sm:$0xff] }
  0x31   : > { %v3176_v22 = vsel %vm3167_vm10, 0, %v736_v14  ;;  %v658_v28 = vsel %vm3149_vm8, 0, %v638_v20  ;;  %v582_v37 = vmul.f32 0.01, %v550_v29  ;;  %vm567_vm13 = vcmp.ge.f32.partialorder %v551_v34, 0.0  ;;  %1604 = vmatpush.bf16.msra.mxu0 %v2663_v30 }
  0x32   : > { %v750_v31 = vor.u32 %v748_v16, %v3178_v23  ;;  %v659_v32 = vsel %vm3149_vm8, 0, %v639_v24  ;;  %v686_v33 = vunpack.c.l.b16 %v658_v28  ;;  %v3188_v35 = vrot.slane %v759_v26, 7  ;;  %1615 = vmatmul.bf16.vlgmr.msra.gmra.mxu1 %v3176_v22 }
  0x33   : > { %v687_v36 = vunpack.c.l.b16 %v659_v32  ;;  %v583_v42 = vmul.f32 0.01, %v551_v34  ;;  %v2754_v43 = vunpack.c.h.bf16 %v2818_v8  ;;  %v598_v46 = vsel %vm566_vm12, %v550_v29, %v582_v37  ;;  %1695 = vmatpush.bf16.msrb.mxu2 %v2686_v40  ;;  %1646 = vmatpush.bf16.msrb.mxu1 %v2678_v41  ;;  %v2700_v32 = vld [vmem:[#allocation2 + $0x128] sm:$0xff]  ;;  %v2683_v37 = vld [vmem:[#allocation2 + $0xa0] sm:$0xff] }
  0x34   : > { %v3193_v39 = vsel %vm3167_vm10, 0, %v750_v31  ;;  %v764_v44 = vor.u32 %v762_v27, %v3188_v35  ;;  %v535_v47 = vmul.f32 %v3112_v5, %v2753_v21  ;;  %v614_v50 = vpack.c.bf16 %v598_v46, %v598_v46  ;;  %1744 = vmatpush.bf16.msrb.mxu3 %v2694_v55  ;;  %v2692_v31 = vld [vmem:[#allocation2 + $0xe8] sm:$0xff] }
  0x35   : > { %v706_v45 = vpack.c.b16 %v687_v36, %v686_v33  ;;  %v599_v49 = vsel %vm567_vm13, %v551_v34, %v583_v42  ;;  %v536_v51 = vmul.f32 %v3112_v5, %v2754_v43  ;;  %v2761_v52 = vunpack.c.l.bf16 %v2820_v38  ;;  %1625 = vmatmul.bf16.vlgmr.msra.gmra.mxu2 %v3193_v39  ;;  %1793 = vmatpush.bf16.msrb.mxu0 %v2702_v48 }
  0x36   : > { %v3203_v54 = vsel %vm3167_vm10, 0, %v764_v44  ;;  %v615_v58 = vpack.c.bf16 %v599_v49, %v599_v49  ;;  %v692_v61 = vunpack.c.l.b16 %v614_v50  ;;  %v554_v62 = vadd.f32 %v3117_v6, %v535_v47  ;;  %v2691_v49 = vld [vmem:[#allocation2 + $0xe0] sm:$0xff] }
  0x37   : > { %v717_v56 = vshrl.u32 %v706_v45, 16  ;;  %v720_v57 = vshll.u32 %v706_v45, 16  ;;  %v555_v63 = vadd.f32 %v3117_v6, %v536_v51  ;;  %v2762_v0 = vunpack.c.h.bf16 %v2820_v38  ;;  %1635 = vmatmul.bf16.vlgmr.msra.gmra.mxu3 %v3203_v54  ;;  %1696 = vmatpush.bf16.msrb.mxu2 %v2685_v59  ;;  %v2675_v38 = vld [vmem:[#allocation2 + $0x60] sm:$0xff] }
  0x38   : > { %v693_v3 = vunpack.c.l.b16 %v615_v58  ;;  %v539_v4 = vmul.f32 %v3112_v5, %v2761_v52  ;;  %v2737_v7 = vunpack.c.l.bf16 %v3199_v53  ;;  %vm570_vm14 = vcmp.ge.f32.partialorder %v554_v62, 0.0  ;;  %1647 = vmatpush.bf16.msrb.mxu1 %v2677_v60  ;;  %1745 = vmatpush.bf16.msrb.mxu3 %v2693_v12  ;;  %v2699_v50 = vld [vmem:[#allocation2 + $0x120] sm:$0xff]  ;;  %v2674_v58 = vld [vmem:[#allocation2 + $0x58] sm:$0xff] }
  0x39   : > { %v3209_v1 = vrot.slane %v717_v56, 7  ;;  %vm571_vm15 = vcmp.ge.f32.partialorder %v555_v63, 0.0  ;;  %v586_v8 = vmul.f32 0.01, %v554_v62  ;;  %v587_v10 = vmul.f32 0.01, %v555_v63  ;;  %1794 = vmatpush.bf16.msrb.mxu0 %v2701_v13 }
  0x3a   : > { %v709_v14 = vpack.c.b16 %v693_v3, %v692_v61  ;;  %v540_v15 = vmul.f32 %v3112_v5, %v2762_v0  ;;  %v558_v16 = vadd.f32 %v3117_v6, %v539_v4  ;;  %v2738_v21 = vunpack.c.h.bf16 %v3199_v53  ;;  %v2690_v4 = vld [vmem:[#allocation2 + $0xd8] sm:$0xff]  ;;  %v2681_v13 = vld [vmem:[#allocation2 + $0x90] sm:$0xff] }
  0x3b   : > { %v722_v11 = vor.u32 %v720_v57, %v3209_v1  ;;  %v602_v19 = vsel %vm570_vm14, %v554_v62, %v586_v8  ;;  %v603_v20 = vsel %vm571_vm15, %v555_v63, %v587_v10  ;;  %v527_v27 = vmul.f32 %v3112_v5, %v2737_v7  ;;  %1697 = vmatpush.bf16.msrb.mxu2 %v2684_v17  ;;  %v2682_v57 = vld [vmem:[#allocation2 + $0x98] sm:$0xff]  ;;  %v2673_v17 = vld [vmem:[#allocation2 + $0x50] sm:$0xff] }
  0x3c   : > { %v738_v25 = vshrl.u32 %v709_v14, 16  ;;  %v618_v26 = vpack.c.bf16 %v602_v19, %v602_v19  ;;  %v741_v28 = vshll.u32 %v709_v14, 16  ;;  %v619_v29 = vpack.c.bf16 %v603_v20, %v603_v20  ;;  %1648 = vmatpush.bf16.msrb.mxu1 %v2676_v18  ;;  %1746 = vmatpush.bf16.msrb.mxu3 %v2692_v31  ;;  %v2698_v12 = vld [vmem:[#allocation2 + $0x118] sm:$0xff]  ;;  %v2680_v31 = vld [vmem:[#allocation2 + $0x88] sm:$0xff] }
  0x3d   : > { %v3220_v24 = vsel %vm3167_vm10, 0, %v722_v11  ;;  %v559_v30 = vadd.f32 %v3117_v6, %v540_v15  ;;  %vm574_vm0 = vcmp.ge.f32.partialorder %v558_v16, 0.0  ;;  %v590_v36 = vmul.f32 0.01, %v558_v16  ;;  %1795 = vmatpush.bf16.msrb.mxu0 %v2700_v32  ;;  %v2672_v32 = vld [vmem:[#allocation2 + $0x48] sm:$0xff] }
  0x3e   : > { %1605 = vmatmul.bf16.vlgmr.msra.gmra.mxu0 %v3220_v24  ;;  %v3225_v33 = vrot.slane %v738_v25, 7  ;;  %v696_v34 = vunpack.c.l.b16 %v618_v26  ;;  %v697_v40 = vunpack.c.l.b16 %v619_v29  ;;  %v528_v43 = vmul.f32 %v3112_v5, %v2738_v21  ;;  %v2689_v25 = vld [vmem:[#allocation2 + $0xd0] sm:$0xff] }
  0x3f   : > { %vm575_vm1 = vcmp.ge.f32.partialorder %v559_v30, 0.0  ;;  %v591_v41 = vmul.f32 0.01, %v559_v30  ;;  %v606_v42 = vsel %vm574_vm0, %v558_v16, %v590_v36  ;;  %v546_v44 = vadd.f32 %v3117_v6, %v527_v27  ;;  %1698 = vmatpush.bf16.msrb.mxu2 %v2683_v37 }
  0x40   : > { %v743_v45 = vor.u32 %v741_v28, %v3225_v33  ;;  %v711_v46 = vpack.c.b16 %v697_v40, %v696_v34  ;;  %v622_v48 = vpack.c.bf16 %v606_v42, %v606_v42  ;;  %v547_v52 = vadd.f32 %v3117_v6, %v528_v43  ;;  %1649 = vmatpush.bf16.msrb.mxu1 %v2675_v38  ;;  %v2697_v28 = vld [vmem:[#allocation2 + $0x110] sm:$0xff]  ;;  %v2696_v42 = vld [vmem:[#allocation2 + $0x108] sm:$0xff]  ;;  %v2679_v43 = vld [vmem:[#allocation2 + $0x80] sm:$0xff] }
  0x41   : > { %v607_v47 = vsel %vm575_vm1, %v559_v30, %v591_v41  ;;  %vm562_vm3 = vcmp.ge.f32.partialorder %v546_v44, 0.0  ;;  %v578_v59 = vmul.f32 0.01, %v546_v44  ;;  %1747 = vmatpush.bf16.msrb.mxu3 %v2691_v49  ;;  %1796 = vmatpush.bf16.msrb.mxu0 %v2699_v50  ;;  %v833_v18 = vshll.u32 %v3220_v24, 16  ;;  %v2687_v49 = vld [vmem:[#allocation2 + $0xc0] sm:$0xff]  ;;  %v2710_v50 = vld [vmem:[#allocation2 + $0x178] sm:$0xff] }
  0x42   : > { %v623_v51 = vpack.c.bf16 %v607_v47, %v607_v47  ;;  %v752_v53 = vshrl.u32 %v711_v46, 16  ;;  %v755_v55 = vshll.u32 %v711_v46, 16  ;;  %v700_v56 = vunpack.c.l.b16 %v622_v48  ;;  %v2718_v48 = vld [vmem:[#allocation2 + $0x1b8] sm:$0xff] }
  0x43   : > { %vm563_vm4 = vcmp.ge.f32.partialorder %v547_v52, 0.0  ;;  %v579_v61 = vmul.f32 0.01, %v547_v52  ;;  %v3233_v62 = vsel %vm3167_vm10, 0, %v743_v45  ;;  %v594_v0 = vsel %vm562_vm3, %v546_v44, %v578_v59  ;;  %1699 = vmatpush.bf16.msrb.mxu2 %v2682_v57  ;;  %v2671_v45 = vld [vmem:[#allocation2 + $0x40] sm:$0xff]  ;;  %v2734_v57 = vld [vmem:[#allocation2 + $0x238] sm:$0xff] }
  0x44   : > { %v701_v60 = vunpack.c.l.b16 %v623_v51  ;;  %v3235_v63 = vrot.slane %v752_v53, 7  ;;  %v610_v8 = vpack.c.bf16 %v594_v0, %v594_v0  ;;  %1650 = vmatpush.bf16.msrb.mxu1 %v2674_v58  ;;  %v819_v26 = vsel %vm3167_vm10, %v3209_v1, 0  ;;  %v2688_v1 = vld [vmem:[#allocation2 + $0xc8] sm:$0xff]  ;;  %v2709_v0 = vld [vmem:[#allocation2 + $0x170] sm:$0xff] }
  0x45   : > { %v595_v7 = vsel %vm563_vm4, %v547_v52, %v579_v61  ;;  %1620 = vmatmul.bf16.gmra.mxu1 %v3233_v62  ;;  %1748 = vmatpush.bf16.msrb.mxu3 %v2690_v4  ;;  %v831_v29 = vshrl.u32 %v3220_v24, 16  ;;  %v835_v34 = vrot.slane %v833_v18, 1  ;;  %v838_v38 = vshll.u32 %v819_v26, 16  ;;  %v2695_v52 = vld [vmem:[#allocation2 + $0x100] sm:$0xff]  ;;  %v2733_v4 = vld [vmem:[#allocation2 + $0x230] sm:$0xff]  ;;  %v2708_v18 = vld [vmem:[#allocation2 + $0x168] sm:$0xff] }
  0x46   : > { %v713_v3 = vpack.c.b16 %v701_v60, %v700_v56  ;;  %v757_v10 = vor.u32 %v755_v55, %v3235_v63  ;;  %v611_v11 = vpack.c.bf16 %v595_v7, %v595_v7  ;;  %v688_v16 = vunpack.c.l.b16 %v610_v8  ;;  %1797 = vmatpush.bf16.msrb.mxu0 %v2698_v12  ;;  %v2726_v56 = vld [vmem:[#allocation2 + $0x1f8] sm:$0xff]  ;;  %v2717_v60 = vld [vmem:[#allocation2 + $0x1b0] sm:$0xff] }
  0x47   : > { %1700 = vmatpush.bf16.msrb.mxu2 %v2681_v13  ;;  %v836_v46 = vor.u32 %v835_v34, %v831_v29  ;;  %v840_v47 = vrot.slane %v838_v38, 1  ;;  %vm829_vm5 = vsmask.f32 7424  ;;  %v951_v53 = vrot.slane %v3220_v24, 1  ;;  %v2716_v13 = vld [vmem:[#allocation2 + $0x1a8] sm:$0xff]  ;;  %v2715_v34 = vld [vmem:[#allocation2 + $0x1a0] sm:$0xff] }
  0x48   : > { %v766_v14 = vshrl.u32 %v713_v3, 16  ;;  %v769_v15 = vshll.u32 %v713_v3, 16  ;;  %v3242_v19 = vsel %vm3167_vm10, 0, %v757_v10  ;;  %v689_v20 = vunpack.c.l.b16 %v611_v11  ;;  %1651 = vmatpush.bf16.msrb.mxu1 %v2673_v17  ;;  %v2725_v3 = vld [vmem:[#allocation2 + $0x1f0] sm:$0xff]  ;;  %v2724_v17 = vld [vmem:[#allocation2 + $0x1e8] sm:$0xff]  ;;  %v2723_v38 = vld [vmem:[#allocation2 + $0x1e0] sm:$0xff] }
  0x49   : > { %1630 = vmatmul.bf16.gmra.mxu2 %v3242_v19  ;;  %1749 = vmatpush.bf16.msrb.mxu3 %v2689_v25  ;;  %v952_v55 = vrot.slane %v819_v26, 1  ;;  %vm950_vm6 = vcmask 1046528   ;;  %v841_v58 = vsel %vm829_vm5, %v836_v46, %v840_v47  ;;  %v857_v25 = vshll.u32 %v3176_v22, 16 }
  0x4a   : > { %v3245_v21 = vrot.slane %v766_v14, 7  ;;  %v707_v27 = vpack.c.b16 %v689_v20, %v688_v16  ;;  %1798 = vmatpush.bf16.msrb.mxu0 %v2697_v28  ;;  %v2732_v20 = vld [vmem:[#allocation2 + $0x228] sm:$0xff]  ;;  %v821_v26 = vsel %vm3167_vm10, %v3161_v2, 0  ;;  %v855_v28 = vshrl.u32 %v3176_v22, 16 }
  0x4b   : > { %1701 = vmatpush.bf16.msrb.mxu2 %v2680_v31  ;;  %v953_v24 = vsel %vm950_vm6, %v951_v53, %v952_v55  ;;  %v859_v29 = vrot.slane %v857_v25, 1  ;;  %v2722_v53 = vld [vmem:[#allocation2 + $0x1d8] sm:$0xff] }
  0x4c   : > { %v771_v30 = vor.u32 %v769_v15, %v3245_v21  ;;  %v724_v36 = vshrl.u32 %v707_v27, 16  ;;  %v727_v37 = vshll.u32 %v707_v27, 16  ;;  %1652 = vmatpush.bf16.msrb.mxu1 %v2672_v32  ;;  %v2706_v55 = vld [vmem:[#allocation2 + $0x158] sm:$0xff] }
  0x4d   : > { %1750 = vmatpush.bf16.msrb.mxu3 %v2688_v1  ;;  %v860_v31 = vor.u32 %v859_v29, %v855_v28  ;;  %v2707_v1 = vld [vmem:[#allocation2 + $0x160] sm:$0xff] }
  0x4e   : > { %v3254_v40 = vsel %vm3167_vm10, 0, %v771_v30  ;;  %v726_v41 = vrot.slane %v724_v36, 7  ;;  %1799 = vmatpush.bf16.msrb.mxu0 %v2696_v42  ;;  %v862_v30 = vshll.u32 %v821_v26, 16  ;;  %v957_v36 = vrot.slane %v3176_v22, 1 }
  0x4f   : > { %1640 = vmatmul.bf16.gmra.mxu3 %v3254_v40  ;;  %1702 = vmatpush.bf16.msrb.mxu2 %v2679_v43  ;;  %v869_v42 = vshll.u32 %v3233_v62, 16  ;;  %v822_v43 = vsel %vm3167_vm10, %v3225_v33, 0 }
  0x50   : > { %v729_v44 = vor.u32 %v727_v37, %v726_v41  ;;  %1653 = vmatpush.bf16.msrb.mxu1 %v2671_v45  ;;  %v820_v61 = vsel %vm3167_vm10, %v726_v41, 0  ;;  %v864_v32 = vrot.slane %v862_v30, 1  ;;  %v958_v37 = vrot.slane %v821_v26, 1  ;;  %v2731_v41 = vld [vmem:[#allocation2 + $0x220] sm:$0xff] }
  0x51   : > { %1751 = vmatpush.bf16.msrb.mxu3 %v2687_v49  ;;  %v850_v10 = vshll.u32 %v820_v61, 16  ;;  %v955_v16 = vrot.slane %v820_v61, 1  ;;  %v867_v45 = vshrl.u32 %v3233_v62, 16  ;;  %v871_v46 = vrot.slane %v869_v42, 1  ;;  %v2704_v42 = vld [vmem:[#allocation2 + $0x148] sm:$0xff] }
  0x52   : > { %v810_v51 = vsel %vm3167_vm10, 0, %v729_v44  ;;  %1800 = vmatpush.bf16.msrb.mxu0 %v2695_v52  ;;  %v3276_v2 = vsel %vm829_vm5, %v860_v31, %v864_v32  ;;  %v3285_v44 = vsel %vm950_vm6, %v957_v36, %v958_v37  ;;  %v874_v47 = vshll.u32 %v822_v43, 16  ;;  %v2712_v31 = vld [vmem:[#allocation2 + $0x188] sm:$0xff] }
  0x53   : > { %1610 = vmatmul.bf16.gmra.mxu0 %v810_v51  ;;  %1891 = vmatpush.bf16.msra.mxu2 %v2718_v48  ;;  %v845_v59 = vshll.u32 %v810_v51, 16  ;;  %v843_v7 = vshrl.u32 %v810_v51, 16  ;;  %v852_v12 = vrot.slane %v850_v10, 1  ;;  %v954_v15 = vrot.slane %v810_v51, 1  ;;  %v2721_v10 = vld [vmem:[#allocation2 + $0x1d0] sm:$0xff] }
  0x54   : > { %1842 = vmatpush.bf16.msra.mxu1 %v2710_v50  ;;  %v872_v48 = vor.u32 %v871_v46, %v867_v45  ;;  %v876_v49 = vrot.slane %v874_v47, 1  ;;  %v2714_v50 = vld [vmem:[#allocation2 + $0x198] sm:$0xff]  ;;  %v961_v52 = vrot.slane %v822_v43, 1  ;;  %v966_v37 = vrot.slane %v3242_v19, 1  ;;  %v2728_v43 = vld [vmem:[#allocation2 + $0x208] sm:$0xff] }
  0x55   : > { %1940 = vmatpush.bf16.msra.mxu3 %v2726_v56  ;;  %1654 = vmatmul.bf16.vlgmr.msrb.gmra.mxu1 %v841_v58  ;;  %v847_v8 = vrot.slane %v845_v59, 1  ;;  %v3270_v27 = vsel %vm950_vm6, %v954_v15, %v955_v16  ;;  %v2730_v56 = vld [vmem:[#allocation2 + $0x218] sm:$0xff]  ;;  %v823_v58 = vsel %vm3167_vm10, %v3178_v23, 0  ;;  %v2713_v23 = vld [vmem:[#allocation2 + $0x190] sm:$0xff]  ;;  %v905_v45 = vshll.u32 %v3203_v54, 16 }
  0x56   : > { %1989 = vmatpush.bf16.msra.mxu0 %v2734_v57  ;;  %v3292_v33 = vsel %vm829_vm5, %v872_v48, %v876_v49  ;;  %v881_v57 = vshll.u32 %v3193_v39, 16  ;;  %v2821_v15 = vld [vmem:[%s3105_s11 + $0x38] sm:$0xff]   ;;  %v903_v49 = vshrl.u32 %v3203_v54, 16  ;;  %s450_s11 = sadd.s32 8, %s3084_s18 }
  0x57   : > { %1892 = vmatpush.bf16.msra.mxu2 %v2717_v60  ;;  %v848_v11 = vor.u32 %v847_v8, %v843_v7  ;;  %v879_v60 = vshrl.u32 %v3193_v39, 16  ;;  %v963_v7 = vrot.slane %v3193_v39, 1  ;;  %v964_v8 = vrot.slane %v823_v58, 1  ;;  %p3428_p13 = scmp.lt.s32.totalorder %s450_s11, 15 }
  0x58   : > { %1843 = vmatpush.bf16.msra.mxu1 %v2709_v0  ;;  %v883_v61 = vrot.slane %v881_v57, 1  ;;  %v886_v0 = vshll.u32 %v823_v58, 16 }
  0x59   : > { %1703 = vmatmul.bf16.vlgmr.msrb.gmra.mxu2 %v953_v24  ;;  %1941 = vmatpush.bf16.msra.mxu3 %v2725_v3  ;;  %v853_v14 = vsel %vm829_vm5, %v848_v11, %v852_v12  ;;  %v2705_v11 = vld [vmem:[#allocation2 + $0x150] sm:$0xff]  ;;  %v3318_v16 = vsel %vm950_vm6, %v963_v7, %v964_v8  ;;  %v917_v8 = vshll.u32 %v3254_v40, 16  ;;  %s3593_s11 = smov (!%p3428_p13, %s450_s11), 15 }
  0x5a   : > { %1990 = vmatpush.bf16.msra.mxu0 %v2733_v4  ;;  %v884_v24 = vor.u32 %v883_v61, %v879_v60  ;;  %v888_v3 = vrot.slane %v886_v0, 1  ;;  %v2729_v12 = vld [vmem:[#allocation2 + $0x210] sm:$0xff]  ;;  %v2711_v60 = vld [vmem:[#allocation2 + $0x180] sm:$0xff]  ;;  %v969_v0 = vrot.slane %v3203_v54, 1  ;;  %s3595_s11 = smov (!%p3428_p13, %s3593_s11), 15 }
  0x5b   : > { %1893 = vmatpush.bf16.msra.mxu2 %v2716_v13  ;;  %v893_v13 = vshll.u32 %v3242_v19, 16  ;;  %s2362_s18 = sshll.u32 %s3595_s11, 1 }
  0x5c   : > { %1844 = vmatpush.bf16.msra.mxu1 %v2708_v18  ;;  %v3308_v4 = vsel %vm829_vm5, %v884_v24, %v888_v3  ;;  %v2766_v18 = vunpack.c.h.bf16 %v2821_v15  ;;  %v2719_v3 = vld [vmem:[#allocation2 + $0x1c0] sm:$0xff]  ;;  %s459_s14 = sadd.s32 %s2362_s18, %s3094_s21  ;;  %s2370_s18 = sshll.u32 %s482_s29, 1 }
  0x5d   : > { %1942 = vmatpush.bf16.msra.mxu3 %v2724_v17  ;;  %v2765_v17 = vunpack.c.l.bf16 %v2821_v15  ;;  %v895_v25 = vrot.slane %v893_v13, 1  ;;  %v915_v13 = vshrl.u32 %v3254_v40, 16  ;;  %s2364_s15 = sshll.u32 %s459_s14, 2  ;;  %s484_s16 = scalar_lea.vmem %s3570_s7, %s2370_s18 }
  0x5e   : > { %1991 = vmatpush.bf16.msra.mxu0 %v2732_v20  ;;  %v891_v20 = vshrl.u32 %v3242_v19, 16  ;;  %s461_s19 = scalar_lea.vmem %s3565_s2, %s2364_s15 }
  0x5f   : > { %1752 = vmatmul.bf16.vlgmr.msrb.gmra.mxu3 %v810_v51  ;;  %1894 = vmatpush.bf16.msra.mxu2 %v2715_v34  ;;  %v960_v51 = vrot.slane %v3233_v62, 1  ;;  %v541_v28 = vmul.f32 %v3112_v5, %v2765_v17  ;;  %v2727_v17 = vld [vmem:[#allocation2 + $0x200] sm:$0xff] }
  0x60   : > { %1845 = vmatpush.bf16.msra.mxu1 %v2707_v1  ;;  %v896_v29 = vor.u32 %v895_v25, %v891_v20 }
  0x61   : > { %1943 = vmatpush.bf16.msra.mxu3 %v2723_v38  ;;  %v3301_v59 = vsel %vm950_vm6, %v960_v51, %v961_v52  ;;  %v560_v32 = vadd.f32 %v3117_v6, %v541_v28 }
  0x62   : > { %1992 = vmatpush.bf16.msra.mxu0 %v2731_v41 }
  0x63   : > { %1801 = vmatmul.bf16.vlgmr.msrb.gmra.mxu0 %v853_v14  ;;  %1895 = vmatpush.bf16.msra.mxu2 %v2714_v50  ;;  %v592_v1 = vmul.f32 0.01, %v560_v32  ;;  %vm576_vm7 = vcmp.ge.f32.partialorder %v560_v32, 0.0  ;;  %v907_v50 = vrot.slane %v905_v45, 1 }
  0x64   : > { %1846 = vmatpush.bf16.msra.mxu1 %v2706_v55 }
  0x65   : > { %1659 = vmatmul.bf16.gmra.mxu1 %v853_v14  ;;  %1944 = vmatpush.bf16.msra.mxu3 %v2722_v53  ;;  %v824_v14 = vsel %vm3167_vm10, %v3235_v63, 0  ;;  %v542_v63 = vmul.f32 %v3112_v5, %v2766_v18  ;;  %v2720_v5 = vld [vmem:[#allocation2 + $0x1c8] sm:$0xff]  ;;  %v608_v47 = vsel %vm576_vm7, %v560_v32, %v592_v1  ;;  %v908_v55 = vor.u32 %v907_v50, %v903_v49 }
  0x66   : > { %1993 = vmatpush.bf16.msra.mxu0 %v2730_v56  ;;  %v898_v26 = vshll.u32 %v824_v14, 16  ;;  %v967_v38 = vrot.slane %v824_v14, 1  ;;  %v624_v52 = vpack.c.bf16 %v608_v47, %v608_v47  ;;  %v919_v14 = vrot.slane %v917_v8, 1 }
  0x67   : > { %1896 = vmatpush.bf16.msra.mxu2 %v2713_v23  ;;  %v561_v34 = vadd.f32 %v3117_v6, %v542_v63  ;;  %v825_v6 = vsel %vm3167_vm10, %v3188_v35, 0  ;;  %v2703_v23 = vld [vmem:[#allocation2 + $0x140] sm:$0xff] }
  0x68   : > { %1847 = vmatpush.bf16.msra.mxu1 %v2705_v11  ;;  %v900_v30 = vrot.slane %v898_v26, 1  ;;  %v3338_v46 = vsel %vm950_vm6, %v966_v37, %v967_v38  ;;  %v910_v51 = vshll.u32 %v825_v6, 16  ;;  %v702_v56 = vunpack.c.l.b16 %v624_v52 }
  0x69   : > { %1708 = vmatmul.bf16.gmra.mxu2 %v3270_v27  ;;  %1945 = vmatpush.bf16.msra.mxu3 %v2721_v10  ;;  %v593_v41 = vmul.f32 0.01, %v561_v34  ;;  %vm577_vm8 = vcmp.ge.f32.partialorder %v561_v34, 0.0  ;;  %v970_v24 = vrot.slane %v825_v6, 1  ;;  %v826_v10 = vsel %vm3167_vm10, %v3245_v21, 0 }
  0x6a   : > { %1994 = vmatpush.bf16.msra.mxu0 %v2729_v12  ;;  %v3329_v36 = vsel %vm829_vm5, %v896_v29, %v900_v30  ;;  %v912_v35 = vrot.slane %v910_v51, 1  ;;  %v922_v15 = vshll.u32 %v826_v10, 16  ;;  %v920_v26 = vor.u32 %v919_v14, %v915_v13 }
  0x6b   : > { %1897 = vmatpush.bf16.msra.mxu2 %v2712_v31  ;;  %v609_v48 = vsel %vm577_vm8, %v561_v34, %v593_v41  ;;  %v3356_v12 = vsel %vm950_vm6, %v969_v0, %v970_v24  ;;  %v972_v37 = vrot.slane %v3254_v40, 1  ;;  %v973_v38 = vrot.slane %v826_v10, 1 }
  0x6c   : > { %1848 = vmatpush.bf16.msra.mxu1 %v2704_v42  ;;  %v625_v53 = vpack.c.bf16 %v609_v48, %v609_v48  ;;  %v3345_v58 = vsel %vm829_vm5, %v908_v55, %v912_v35  ;;  %v924_v28 = vrot.slane %v922_v15, 1 }
  0x6d   : > { %1946 = vmatpush.bf16.msra.mxu3 %v2720_v5 }
  0x6e   : > { %1995 = vmatpush.bf16.msra.mxu0 %v2728_v43  ;;  %v703_v57 = vunpack.c.l.b16 %v625_v53  ;;  %v3369_v31 = vsel %vm829_vm5, %v920_v26, %v924_v28  ;;  %v3387_v43 = vsel %vm950_vm6, %v972_v37, %v973_v38 }
  0x6f   : > { %1757 = vmatmul.bf16.gmra.mxu3 %v3176_v22  ;;  %1898 = vmatpush.bf16.msra.mxu2 %v2711_v60 }
  0x70   : > { %v714_v61 = vpack.c.b16 %v703_v57, %v702_v56  ;;  %1849 = vmatpush.bf16.msra.mxu1 %v2703_v23 }
  0x71   : > { %1947 = vmatpush.bf16.msra.mxu3 %v2719_v3 }
  0x72   : > { %v773_v11 = vshrl.u32 %v714_v61, 16  ;;  %v776_v20 = vshll.u32 %v714_v61, 16  ;;  %1996 = vmatpush.bf16.msra.mxu0 %v2727_v17 }
  0x73   : > { %1806 = vmatmul.bf16.gmra.mxu0 %v3276_v2 }
  0x74   : > { %v775_v18 = vrot.slane %v773_v11, 7 }
  0x75   : > { %1664 = vmatmul.bf16.gmra.mxu1 %v3276_v2 }
  0x76   : > { %v778_v30 = vor.u32 %v776_v20, %v775_v18  ;;  %v3384_v5 = vsel %vm3167_vm10, %v775_v18, 0 }
  0x77   : > { %v991_v48 = vshll.u32 %v3384_v5, 16 }
  0x78   : > { %v3373_v32 = vsel %vm3167_vm10, 0, %v778_v30 }
  0x79   : > { %1713 = vmatmul.bf16.gmra.mxu2 %v3285_v44  ;;  %v986_v41 = vshll.u32 %v3373_v32, 16  ;;  %v984_v6 = vshrl.u32 %v3373_v32, 16  ;;  %v993_v50 = vrot.slane %v991_v48, 1 }
  0x7b   : > { %v988_v47 = vrot.slane %v986_v41, 1 }
  0x7d   : > { %v989_v49 = vor.u32 %v988_v47, %v984_v6 }
  0x7f   : > { %1762 = vmatmul.bf16.gmra.mxu3 %v3233_v62  ;;  %v3401_v55 = vsel %vm829_vm5, %v989_v49, %v993_v50 }
  0x83   : > { %1811 = vmatmul.bf16.gmra.mxu0 %v3292_v33 }
  0x85   : > { %1669 = vmatmul.bf16.gmra.mxu1 %v3292_v33 }
  0x89   : > { %1718 = vmatmul.bf16.gmra.mxu2 %v3301_v59 }
  0x8f   : > { %1767 = vmatmul.bf16.gmra.mxu3 %v3193_v39 }
  0x93   : > { %1816 = vmatmul.bf16.gmra.mxu0 %v3308_v4 }
  0x95   : > { %1674 = vmatmul.bf16.gmra.mxu1 %v3308_v4 }
  0x99   : > { %1723 = vmatmul.bf16.gmra.mxu2 %v3318_v16 }
  0x9f   : > { %1772 = vmatmul.bf16.gmra.mxu3 %v3242_v19 }
  0xa3   : > { %1821 = vmatmul.bf16.gmra.mxu0 %v3329_v36 }
  0xa5   : > { %1679 = vmatmul.bf16.gmra.mxu1 %v3329_v36 }
  0xa9   : > { %1728 = vmatmul.bf16.gmra.mxu2 %v3338_v46 }
  0xaf   : > { %1777 = vmatmul.bf16.gmra.mxu3 %v3203_v54  ;;  %v3349_v7 = vpop.f32.mrf.mxu1 }
  0xb3   : > { %1826 = vmatmul.bf16.gmra.mxu0 %v3345_v58 }
  0xb5   : > { %1684 = vmatmul.bf16.gmra.mxu1 %v3345_v58 }
  0xb7   : > { %v3363_v63 = vpop.f32.mrf.mxu1 }
  0xb8   : > { %v3361_v25 = vpop.f32.mrf.mxu2 }
  0xb9   : > { %1733 = vmatmul.bf16.gmra.mxu2 %v3356_v12 }
  0xba   : > { %v3365_v29 = vpop.f32.mrf.mxu3 }
  0xbb   : > { %v1606_v21 = vpop.f32.mrf.mxu0 }
  0xbf   : > { %1782 = vmatmul.bf16.gmra.mxu3 %v3254_v40 }
  0xc0   : > { %v3375_v34 = vpop.f32.mrf.mxu2 }
  0xc2   : > { %v3379_v1 = vpop.f32.mrf.mxu1  ;;  %v3389_v45 = vpop.f32.mrf.mxu3 }
  0xc3   : > { %1831 = vmatmul.bf16.gmra.mxu0 %v3369_v31  ;;  %v1608_v42 = vpop.f32.mrf.mxu0 }
  0xc5   : > { %1689 = vmatmul.bf16.gmra.mxu1 %v3369_v31 }
  0xc9   : > { %1738 = vmatmul.bf16.gmra.mxu2 %v3387_v43 }
  0xca   : > { %v3397_v52 = vpop.f32.mrf.mxu1 }
  0xcc   : > { %v3395_v51 = vpop.f32.mrf.mxu2 }
  0xcf   : > { %1787 = vmatmul.bf16.gmra.mxu3 %v3373_v32 }
  0xd0   : > { %v1611_v53 = vpop.f32.mrf.mxu0 }
  0xd2   : > { %v3403_v35 = vpop.f32.mrf.mxu3  ;;  %v1655_v57 = vpop.f32.mrf.mxu1 }
  0xd3   : > { %1836 = vmatmul.bf16.gmra.mxu0 %v3401_v55  ;;  %v1656_v60 = vadd.f32 %v1655_v57, %v1606_v21 }
  0xd4   : > { %v3406_v56 = vpop.f32.mrf.mxu2 }
  0xd5   : > { %1850 = vmatmul.bf16.vlgmr.msra.gmra.mxu1 %v3270_v27 }
  0xd8   : > { %v1613_v61 = vpop.f32.mrf.mxu0 }
  0xd9   : > { %1899 = vmatmul.bf16.vlgmr.msra.gmra.mxu2 %v3176_v22 }
  0xda   : > { %v3409_v0 = vpop.f32.mrf.mxu3  ;;  %v1657_v3 = vpop.f32.mrf.mxu1 }
  0xdb   : > { %v1658_v8 = vadd.f32 %v1657_v3, %v1608_v42 }
  0xdc   : > { %v1704_v24 = vpop.f32.mrf.mxu2 }
  0xdd   : > { %v1705_v23 = vadd.f32 %v1704_v24, %v1656_v60 }
  0xdf   : > { %1948 = vmatmul.bf16.vlgmr.msra.gmra.mxu3 %v3276_v2 }
  0xe0   : > { %v1802_v10 = vpop.f32.mrf.mxu0 }
  0xe2   : > { %v1753_v11 = vpop.f32.mrf.mxu3  ;;  %v1660_v15 = vpop.f32.mrf.mxu1 }
  0xe3   : > { %v1754_v13 = vadd.f32 %v1753_v11, %v1705_v23  ;;  %1997 = vmatmul.bf16.vlgmr.msra.gmra.mxu0 %v3285_v44  ;;  %v1661_v18 = vadd.f32 %v1660_v15, %v1611_v53 }
  0xe4   : > { %v1706_v14 = vpop.f32.mrf.mxu2 }
  0xe5   : > { %v3414_v17 = vadd.f32 %v1802_v10, %v1754_v13  ;;  %v1707_v27 = vadd.f32 %v1706_v14, %v1658_v8  ;;  %1855 = vmatmul.bf16.gmra.mxu1 %v3285_v44 }
  0xe8   : > { %v1804_v22 = vpop.f32.mrf.mxu0 }
  0xe9   : > { %1904 = vmatmul.bf16.gmra.mxu2 %v3233_v62 }
  0xea   : > { %v1755_v20 = vpop.f32.mrf.mxu3  ;;  %v1662_v2 = vpop.f32.mrf.mxu1 }
  0xeb   : > { %v1756_v21 = vadd.f32 %v1755_v20, %v1707_v27  ;;  %v1663_v37 = vadd.f32 %v1662_v2, %v1613_v61 }
  0xec   : > { %v1709_v26 = vpop.f32.mrf.mxu2 }
  0xed   : > { %v3418_v28 = vadd.f32 %v1804_v22, %v1756_v21  ;;  %v1710_v30 = vadd.f32 %v1709_v26, %v1661_v18 }
  0xef   : > { %1953 = vmatmul.bf16.gmra.mxu3 %v3292_v33 }
  0xf0   : > { %v1807_v38 = vpop.f32.mrf.mxu0 }
  0xf2   : > { %v1758_v41 = vpop.f32.mrf.mxu3  ;;  %v1665_v6 = vpop.f32.mrf.mxu1 }
  0xf3   : > { %v1759_v42 = vadd.f32 %v1758_v41, %v1710_v30  ;;  %2002 = vmatmul.bf16.gmra.mxu0 %v3301_v59  ;;  %v1666_v48 = vadd.f32 %v1665_v6, %v3349_v7 }
  0xf4   : > { %v1711_v44 = vpop.f32.mrf.mxu2 }
  0xf5   : > { %v3422_v47 = vadd.f32 %v1807_v38, %v1759_v42  ;;  %v1712_v62 = vadd.f32 %v1711_v44, %v1663_v37  ;;  %1860 = vmatmul.bf16.gmra.mxu1 %v3301_v59  ;;  %v2909_v42 = vld [vmem:[%s3567_s4] ss:$0 sm:$0xff] }
  0xf8   : > { %v1809_v49 = vpop.f32.mrf.mxu0 }
  0xf9   : > { %1909 = vmatmul.bf16.gmra.mxu2 %v3193_v39 }
  0xfa   : > { %v1760_v50 = vpop.f32.mrf.mxu3  ;;  %v1667_v57 = vpop.f32.mrf.mxu1 }
  0xfb   : > { %v1761_v33 = vadd.f32 %v1760_v50, %v1712_v62  ;;  %v1668_v7 = vadd.f32 %v1667_v57, %v3363_v63 }
  0xfc   : > { %v1714_v53 = vpop.f32.mrf.mxu2 }
  0xfd   : > { %v3432_v60 = vadd.f32 %v1809_v49, %v1761_v33  ;;  %v1715_v61 = vadd.f32 %v1714_v53, %v1666_v48 }
  0xff   : > { %1958 = vmatmul.bf16.gmra.mxu3 %v3308_v4 }
 0x100   : > { %v1812_v39 = vpop.f32.mrf.mxu0 }
 0x102   : > { %v1763_v59 = vpop.f32.mrf.mxu3  ;;  %v1670_v23 = vpop.f32.mrf.mxu1 }
 0x103   : > { %v1764_v24 = vadd.f32 %v1763_v59, %v1715_v61  ;;  %2007 = vmatmul.bf16.gmra.mxu0 %v3318_v16  ;;  %v1671_v11 = vadd.f32 %v1670_v23, %v3379_v1 }
 0x104   : > { %v1716_v3 = vpop.f32.mrf.mxu2 }
 0x105   : > { %v3441_v8 = vadd.f32 %v1812_v39, %v1764_v24  ;;  %v1717_v10 = vadd.f32 %v1716_v3, %v1668_v7  ;;  %1865 = vmatmul.bf16.gmra.mxu1 %v3318_v16  ;;  %v662_v24 = vstv %s661_s10 }
 0x106   : > { %vm663_vm12 = vcmp.eq.s32.totalorder %v662_v24, 1 }
 0x108   : > { %v1814_v4 = vpop.f32.mrf.mxu0 }
 0x109   : > { %1914 = vmatmul.bf16.gmra.mxu2 %v3242_v19  ;;  %v2772_v19 = vld [vmem:[%s461_s19] sm:$0xff]  }
 0x10a   : > { %v1765_v63 = vpop.f32.mrf.mxu3  ;;  %v1672_v15 = vpop.f32.mrf.mxu1  ;;  %v2773_v21 = vunpack.c.l.bf16 %v2772_v19  ;;  %v2774_v26 = vunpack.c.h.bf16 %v2772_v19 }
 0x10b   : > { %v1766_v13 = vadd.f32 %v1765_v63, %v1717_v10  ;;  %v1673_v22 = vadd.f32 %v1672_v15, %v3397_v52 }
 0x10c   : > { %v1719_v14 = vpop.f32.mrf.mxu2 }
 0x10d   : > { %v3447_v27 = vadd.f32 %v1814_v4, %v1766_v13  ;;  %v1720_v18 = vadd.f32 %v1719_v14, %v1671_v11 }
 0x10f   : > { %1963 = vmatmul.bf16.gmra.mxu3 %v3329_v36  ;;  %v2908_v36 = vld [vmem:[%s3566_s3] ss:$0 sm:$0xff] }
 0x110   : > { %v1817_v16 = vpop.f32.mrf.mxu0  ;;  %v642_v38 = vmul.f32 %v2908_v36, %v2773_v21  ;;  %v643_v41 = vmul.f32 %v2908_v36, %v2774_v26 }
 0x112   : > { %v1768_v1 = vpop.f32.mrf.mxu3  ;;  %v1675_v30 = vpop.f32.mrf.mxu1  ;;  %v644_v44 = vadd.f32 %v2909_v42, %v642_v38  ;;  %v645_v6 = vadd.f32 %v2909_v42, %v643_v41 }
 0x113   : > { %v1769_v20 = vadd.f32 %v1768_v1, %v1720_v18  ;;  %2012 = vmatmul.bf16.gmra.mxu0 %v3338_v46  ;;  %v1676_v53 = vadd.f32 %v1675_v30, %v3361_v25 }
 0x114   : > { %v1721_v2 = vpop.f32.mrf.mxu2  ;;  %v648_v50 = vmul.f32 0.01, %v644_v44  ;;  %v649_v33 = vmul.f32 0.01, %v645_v6  ;;  %vm646_vm9 = vcmp.ge.f32.partialorder %v644_v44, 0.0  ;;  %vm647_vm11 = vcmp.ge.f32.partialorder %v645_v6, 0.0 }
 0x115   : > { %v3455_v37 = vadd.f32 %v1817_v16, %v1769_v20  ;;  %v1722_v52 = vadd.f32 %v1721_v2, %v1673_v22  ;;  %1870 = vmatmul.bf16.gmra.mxu1 %v3338_v46 }
 0x116   : > { %v650_v39 = vsel %vm646_vm9, %v644_v44, %v648_v50  ;;  %v651_v59 = vsel %vm647_vm11, %v645_v6, %v649_v33 }
 0x117   : > { %v652_v23 = vpack.c.bf16 %v650_v39, %v650_v39  ;;  %v653_v10 = vpack.c.bf16 %v651_v59, %v651_v59 }
 0x118   : > { %v1819_v62 = vpop.f32.mrf.mxu0 }
 0x119   : > { %1919 = vmatmul.bf16.gmra.mxu2 %v3203_v54  ;;  %v664_v15 = vsel %vm663_vm12, 0, %v652_v23 }
 0x11a   : > { %v1770_v48 = vpop.f32.mrf.mxu3  ;;  %v1677_v57 = vpop.f32.mrf.mxu1  ;;  %v704_v22 = vunpack.c.l.b16 %v664_v15 }
 0x11b   : > { %v1771_v49 = vadd.f32 %v1770_v48, %v1722_v52  ;;  %v1678_v25 = vadd.f32 %v1677_v57, %v3375_v34 }
 0x11c   : > { %v1724_v46 = vpop.f32.mrf.mxu2 }
 0x11d   : > { %v3467_v61 = vadd.f32 %v1819_v62, %v1771_v49  ;;  %v1725_v7 = vadd.f32 %v1724_v46, %v1676_v53  ;;  %v998_v53 = vrot.slane %v3373_v32, 1 }
 0x11f   : > { %1968 = vmatmul.bf16.gmra.mxu3 %v3345_v58  ;;  %v665_v58 = vsel %vm663_vm12, 0, %v653_v10 }
 0x120   : > { %v1822_v3 = vpop.f32.mrf.mxu0  ;;  %v705_v16 = vunpack.c.l.b16 %v665_v58 }
 0x122   : > { %v1773_v54 = vpop.f32.mrf.mxu3  ;;  %v1680_v63 = vpop.f32.mrf.mxu1  ;;  %v715_v26 = vpack.c.b16 %v705_v16, %v704_v22 }
 0x123   : > { %v1774_v11 = vadd.f32 %v1773_v54, %v1725_v7  ;;  %2017 = vmatmul.bf16.gmra.mxu0 %v3356_v12  ;;  %v1681_v19 = vadd.f32 %v1680_v63, %v3395_v51 }
 0x124   : > { %v1726_v4 = vpop.f32.mrf.mxu2  ;;  %v780_v36 = vshrl.u32 %v715_v26, 16  ;;  %v783_v51 = vshll.u32 %v715_v26, 16 }
 0x125   : > { %v3472_v13 = vadd.f32 %v1822_v3, %v1774_v11  ;;  %v1727_v14 = vadd.f32 %v1726_v4, %v1678_v25  ;;  %1875 = vmatmul.bf16.gmra.mxu1 %v3356_v12 }
 0x126   : > { %v782_v44 = vrot.slane %v780_v36, 7 }
 0x128   : > { %v1824_v18 = vpop.f32.mrf.mxu0  ;;  %v785_v49 = vor.u32 %v783_v51, %v782_v44 }
 0x129   : > { %1924 = vmatmul.bf16.gmra.mxu2 %v3254_v40 }
 0x12a   : > { %v1775_v1 = vpop.f32.mrf.mxu3  ;;  %v1682_v34 = vpop.f32.mrf.mxu1  ;;  %v818_v7 = vsel %vm3167_vm10, 0, %v785_v49 }
 0x12b   : > { %v1776_v20 = vadd.f32 %v1775_v1, %v1727_v14  ;;  %v1683_v41 = vadd.f32 %v1682_v34, %v3406_v56  ;;  %v999_v56 = vrot.slane %v3384_v5, 1  ;;  %v1005_v59 = vshll.u32 %v818_v7, 16 }
 0x12c   : > { %v1729_v21 = vpop.f32.mrf.mxu2  ;;  %v1003_v23 = vshrl.u32 %v818_v7, 16 }
 0x12d   : > { %v3477_v2 = vadd.f32 %v1824_v18, %v1776_v20  ;;  %v1730_v30 = vadd.f32 %v1729_v21, %v1681_v19  ;;  %v1000_v3 = vsel %vm950_vm6, %v998_v53, %v999_v56  ;;  %v1007_v10 = vrot.slane %v1005_v59, 1 }
 0x12f   : > { %1973 = vmatmul.bf16.gmra.mxu3 %v3369_v31  ;;  %v1008_v14 = vor.u32 %v1007_v10, %v1003_v23 }
 0x130   : > { %v1827_v52 = vpop.f32.mrf.mxu0 }
 0x132   : > { %v1778_v12 = vpop.f32.mrf.mxu3  ;;  %v1685_v42 = vpop.f32.mrf.mxu1 }
 0x133   : > { %v1779_v38 = vadd.f32 %v1778_v12, %v1730_v30  ;;  %2022 = vmatmul.bf16.gmra.mxu0 %v3387_v43  ;;  %v1686_v33 = vadd.f32 %v1685_v42, %v3365_v29  ;;  %v828_v29 = vsel %vm3167_vm10, %v782_v44, 0 }
 0x134   : > { %v1731_v40 = vpop.f32.mrf.mxu2  ;;  %v1010_v11 = vshll.u32 %v828_v29, 16  ;;  %v1018_v1 = vrot.slane %v828_v29, 1 }
 0x135   : > { %v3482_v6 = vadd.f32 %v1827_v52, %v1779_v38  ;;  %v1732_v62 = vadd.f32 %v1731_v40, %v1683_v41  ;;  %1880 = vmatmul.bf16.gmra.mxu1 %v3387_v43 }
 0x136   : > { %v1012_v15 = vrot.slane %v1010_v11, 1 }
 0x138   : > { %v1829_v48 = vpop.f32.mrf.mxu0  ;;  %v1013_v16 = vsel %vm829_vm5, %v1008_v14, %v1012_v15 }
 0x139   : > { %1929 = vmatmul.bf16.gmra.mxu2 %v3373_v32 }
 0x13a   : > { %v1780_v31 = vpop.f32.mrf.mxu3  ;;  %v1687_v57 = vpop.f32.mrf.mxu1 }
 0x13b   : > { %v1781_v50 = vadd.f32 %v1780_v31, %v1732_v62  ;;  %v1688_v5 = vadd.f32 %v1687_v57, %v3389_v45  ;;  %v1017_v45 = vrot.slane %v818_v7, 1 }
 0x13c   : > { %v1734_v46 = vpop.f32.mrf.mxu2 }
 0x13d   : > { %v3491_v39 = vadd.f32 %v1829_v48, %v1781_v50  ;;  %v1735_v43 = vadd.f32 %v1734_v46, %v1686_v33  ;;  %v1019_v30 = vsel %vm950_vm6, %v1017_v45, %v1018_v1 }
 0x13f   : > { %1978 = vmatmul.bf16.gmra.mxu3 %v3401_v55 }
 0x140   : > { %v1832_v24 = vpop.f32.mrf.mxu0 }
 0x142   : > { %v1783_v32 = vpop.f32.mrf.mxu3  ;;  %v1690_v4 = vpop.f32.mrf.mxu1 }
 0x143   : > { %v1784_v54 = vadd.f32 %v1783_v32, %v1735_v43  ;;  %2027 = vmatmul.bf16.gmra.mxu0 %v1000_v3  ;;  %v1691_v22 = vadd.f32 %v1690_v4, %v3403_v35 }
 0x144   : > { %v1736_v25 = vpop.f32.mrf.mxu2 }
 0x145   : > { %v3498_v63 = vadd.f32 %v1832_v24, %v1784_v54  ;;  %v1737_v55 = vadd.f32 %v1736_v25, %v1688_v5  ;;  %1885 = vmatmul.bf16.gmra.mxu1 %v1000_v3 }
 0x148   : > { %v1834_v58 = vpop.f32.mrf.mxu0 }
 0x149   : > { %1934 = vmatmul.bf16.gmra.mxu2 %v818_v7 }
 0x14a   : > { %v1785_v18 = vpop.f32.mrf.mxu3  ;;  %v1692_v19 = vpop.f32.mrf.mxu1 }
 0x14b   : > { %v1786_v9 = vadd.f32 %v1785_v18, %v1737_v55  ;;  %v1693_v12 = vadd.f32 %v1692_v19, %v3409_v0 }
 0x14c   : > { %v1739_v20 = vpop.f32.mrf.mxu2 }
 0x14d   : > { %v3502_v21 = vadd.f32 %v1834_v58, %v1786_v9  ;;  %v1740_v34 = vadd.f32 %v1739_v20, %v1691_v22 }
 0x14f   : > { %1983 = vmatmul.bf16.gmra.mxu3 %v1013_v16 }
 0x150   : > { %v1837_v26 = vpop.f32.mrf.mxu0 }
 0x152   : > { %v1788_v52 = vpop.f32.mrf.mxu3  ;;  %v1851_v35 = vpop.f32.mrf.mxu1 }
 0x153   : > { %v1789_v36 = vadd.f32 %v1788_v52, %v1740_v34  ;;  %2032 = vmatmul.bf16.gmra.mxu0 %v1019_v30  ;;  %v1852_v31 = vadd.f32 %v1851_v35, %v3414_v17 }
 0x154   : > { %v1741_v38 = vpop.f32.mrf.mxu2 }
 0x155   : > { %v3506_v41 = vadd.f32 %v1837_v26, %v1789_v36  ;;  %v1742_v40 = vadd.f32 %v1741_v38, %v1693_v12 }
 0x158   : > { %v1839_v42 = vpop.f32.mrf.mxu0 }
 0x15a   : > { %v1790_v44 = vpop.f32.mrf.mxu3  ;;  %v1853_v48 = vpop.f32.mrf.mxu1 }
 0x15b   : > { %v1791_v51 = vadd.f32 %v1790_v44, %v1742_v40  ;;  %v1854_v0 = vadd.f32 %v1853_v48, %v3418_v28 }
 0x15c   : > { %v1900_v62 = vpop.f32.mrf.mxu2 }
 0x15d   : > { %v3508_v49 = vadd.f32 %v1839_v42, %v1791_v51  ;;  %v1901_v33 = vadd.f32 %v1900_v62, %v1852_v31 }
 0x160   : > { %v1998_v50 = vpop.f32.mrf.mxu0 }
 0x162   : > { %v1949_v53 = vpop.f32.mrf.mxu3  ;;  %v1856_v46 = vpop.f32.mrf.mxu1 }
 0x163   : > { %v1950_v57 = vadd.f32 %v1949_v53, %v1901_v33  ;;  %v1857_v32 = vadd.f32 %v1856_v46, %v3422_v47 }
 0x164   : > { %v1902_v56 = vpop.f32.mrf.mxu2 }
 0x165   : > { %v1903_v7 = vadd.f32 %v1902_v56, %v1854_v0  ;;  %v1999_v59 = vadd.f32 %v1998_v50, %v1950_v57 }
 0x167   : > { %v2091_v17 = vmul.f32 %v1999_v59, %v1999_v59 }
 0x168   : > { %v2000_v43 = vpop.f32.mrf.mxu0 }
 0x16a   : > { %v1951_v24 = vpop.f32.mrf.mxu3  ;;  %v1858_v5 = vpop.f32.mrf.mxu1 }
 0x16b   : > { %v1952_v3 = vadd.f32 %v1951_v24, %v1903_v7  ;;  %v1859_v15 = vadd.f32 %v1858_v5, %v3432_v60 }
 0x16c   : > { %v1905_v54 = vpop.f32.mrf.mxu2 }
 0x16d   : > { %v2001_v29 = vadd.f32 %v2000_v43, %v1952_v3  ;;  %v1906_v11 = vadd.f32 %v1905_v54, %v1857_v32 }
 0x16f   : > { %v2778_v28 = vpack.c.bf16 %v2001_v29, %v1999_v59  ;;  %v2070_v23 = vadd.f32 %v2001_v29, %v1999_v59  ;;  %v2092_v10 = vmul.f32 %v2001_v29, %v2001_v29 }
 0x170   : > { %v2003_v4 = vpop.f32.mrf.mxu0 }
 0x171   : > { %2779 = vst [vmem:[%s3518_s13] sm:$0xff] %v2778_v28   ;;  %v2107_v25 = vadd.f32 %v2092_v10, %v2091_v17 }
 0x172   : > { %v1954_v55 = vpop.f32.mrf.mxu3  ;;  %v1861_v18 = vpop.f32.mrf.mxu1 }
 0x173   : > { %v1955_v14 = vadd.f32 %v1954_v55, %v1906_v11  ;;  %v1862_v26 = vadd.f32 %v1861_v18, %v3441_v8 }
 0x174   : > { %v1907_v58 = vpop.f32.mrf.mxu2 }
 0x175   : > { %v2004_v47 = vadd.f32 %v2003_v4, %v1955_v14  ;;  %v1908_v16 = vadd.f32 %v1907_v58, %v1859_v15 }
 0x177   : > { %v2071_v9 = vadd.f32 %v2070_v23, %v2004_v47  ;;  %v2093_v22 = vmul.f32 %v2004_v47, %v2004_v47 }
 0x178   : > { %v2005_v1 = vpop.f32.mrf.mxu0 }
 0x179   : > { %v2108_v45 = vadd.f32 %v2107_v25, %v2093_v22 }
 0x17a   : > { %v1956_v20 = vpop.f32.mrf.mxu3  ;;  %v1863_v52 = vpop.f32.mrf.mxu1 }
 0x17b   : > { %v1957_v19 = vadd.f32 %v1956_v20, %v1908_v16  ;;  %v1864_v62 = vadd.f32 %v1863_v52, %v3447_v27 }
 0x17c   : > { %v1910_v30 = vpop.f32.mrf.mxu2 }
 0x17d   : > { %v2006_v34 = vadd.f32 %v2005_v1, %v1957_v19  ;;  %v1911_v35 = vadd.f32 %v1910_v30, %v1862_v26 }
 0x17f   : > { %v2783_v36 = vpack.c.bf16 %v2006_v34, %v2004_v47  ;;  %v2072_v12 = vadd.f32 %v2071_v9, %v2006_v34  ;;  %v2094_v38 = vmul.f32 %v2006_v34, %v2006_v34 }
 0x180   : > { %v2008_v40 = vpop.f32.mrf.mxu0 }
 0x181   : > { %2822 = vst [vmem:[%s3518_s13 + $0x8] sm:$0xff] %v2783_v36   ;;  %v2109_v60 = vadd.f32 %v2108_v45, %v2094_v38 }
 0x182   : > { %v1959_v42 = vpop.f32.mrf.mxu3  ;;  %v1866_v31 = vpop.f32.mrf.mxu1 }
 0x183   : > { %v1960_v44 = vadd.f32 %v1959_v42, %v1911_v35  ;;  %v1867_v7 = vadd.f32 %v1866_v31, %v3455_v37 }
 0x184   : > { %v1912_v48 = vpop.f32.mrf.mxu2 }
 0x185   : > { %v2009_v51 = vadd.f32 %v2008_v40, %v1960_v44  ;;  %v1913_v8 = vadd.f32 %v1912_v48, %v1864_v62 }
 0x187   : > { %v2073_v50 = vadd.f32 %v2072_v12, %v2009_v51  ;;  %v2095_v33 = vmul.f32 %v2009_v51, %v2009_v51 }
 0x188   : > { %v2010_v0 = vpop.f32.mrf.mxu0 }
 0x189   : > { %v2110_v53 = vadd.f32 %v2109_v60, %v2095_v33 }
 0x18a   : > { %v1961_v56 = vpop.f32.mrf.mxu3  ;;  %v1868_v59 = vpop.f32.mrf.mxu1 }
 0x18b   : > { %v1962_v46 = vadd.f32 %v1961_v56, %v1913_v8  ;;  %v1869_v23 = vadd.f32 %v1868_v59, %v3467_v61 }
 0x18c   : > { %v1915_v43 = vpop.f32.mrf.mxu2 }
 0x18d   : > { %v2011_v57 = vadd.f32 %v2010_v0, %v1962_v46  ;;  %v1916_v32 = vadd.f32 %v1915_v43, %v1867_v7 }
 0x18f   : > { %v2788_v24 = vpack.c.bf16 %v2011_v57, %v2009_v51  ;;  %v2074_v3 = vadd.f32 %v2073_v50, %v2011_v57  ;;  %v2096_v29 = vmul.f32 %v2011_v57, %v2011_v57 }
 0x190   : > { %v2013_v54 = vpop.f32.mrf.mxu0 }
 0x191   : > { %2823 = vst [vmem:[%s3518_s13 + $0x10] sm:$0xff] %v2788_v24   ;;  %v2111_v27 = vadd.f32 %v2110_v53, %v2096_v29 }
 0x192   : > { %v1964_v5 = vpop.f32.mrf.mxu3  ;;  %v1871_v11 = vpop.f32.mrf.mxu1 }
 0x193   : > { %v1965_v17 = vadd.f32 %v1964_v5, %v1916_v32  ;;  %v1872_v18 = vadd.f32 %v1871_v11, %v3472_v13 }
 0x194   : > { %v1917_v10 = vpop.f32.mrf.mxu2 }
 0x195   : > { %v2014_v28 = vadd.f32 %v2013_v54, %v1965_v17  ;;  %v1918_v37 = vadd.f32 %v1917_v10, %v1869_v23 }
 0x197   : > { %v2075_v25 = vadd.f32 %v2074_v3, %v2014_v28  ;;  %v2097_v4 = vmul.f32 %v2014_v28, %v2014_v28 }
 0x198   : > { %v2015_v14 = vpop.f32.mrf.mxu0 }
 0x199   : > { %v2112_v55 = vadd.f32 %v2111_v27, %v2097_v4 }
 0x19a   : > { %v1966_v47 = vpop.f32.mrf.mxu3  ;;  %v1873_v22 = vpop.f32.mrf.mxu1 }
 0x19b   : > { %v1967_v15 = vadd.f32 %v1966_v47, %v1918_v37  ;;  %v1874_v52 = vadd.f32 %v1873_v22, %v3477_v2 }
 0x19c   : > { %v1920_v9 = vpop.f32.mrf.mxu2 }
 0x19d   : > { %v2016_v58 = vadd.f32 %v2015_v14, %v1967_v15  ;;  %v1921_v20 = vadd.f32 %v1920_v9, %v1872_v18 }
 0x19f   : > { %v2793_v16 = vpack.c.bf16 %v2016_v58, %v2014_v28  ;;  %v2076_v45 = vadd.f32 %v2075_v25, %v2016_v58  ;;  %v2098_v1 = vmul.f32 %v2016_v58, %v2016_v58 }
 0x1a0   : > { %v2018_v19 = vpop.f32.mrf.mxu0 }
 0x1a1   : > { %2824 = vst [vmem:[%s3518_s13 + $0x18] sm:$0xff] %v2793_v16   ;;  %v2113_v61 = vadd.f32 %v2112_v55, %v2098_v1 }
 0x1a2   : > { %v1969_v34 = vpop.f32.mrf.mxu3  ;;  %v1876_v12 = vpop.f32.mrf.mxu1 }
 0x1a3   : > { %v1970_v26 = vadd.f32 %v1969_v34, %v1921_v20  ;;  %v1877_v62 = vadd.f32 %v1876_v12, %v3482_v6 }
 0x1a4   : > { %v1922_v36 = vpop.f32.mrf.mxu2 }
 0x1a5   : > { %v2019_v30 = vadd.f32 %v2018_v19, %v1970_v26  ;;  %v1923_v13 = vadd.f32 %v1922_v36, %v1874_v52 }
 0x1a7   : > { %v2077_v38 = vadd.f32 %v2076_v45, %v2019_v30  ;;  %v2099_v35 = vmul.f32 %v2019_v30, %v2019_v30 }
 0x1a8   : > { %v2020_v40 = vpop.f32.mrf.mxu0 }
 0x1a9   : > { %v2114_v60 = vadd.f32 %v2113_v61, %v2099_v35 }
 0x1aa   : > { %v1971_v42 = vpop.f32.mrf.mxu3  ;;  %v1878_v31 = vpop.f32.mrf.mxu1 }
 0x1ab   : > { %v1972_v44 = vadd.f32 %v1971_v42, %v1923_v13  ;;  %v1879_v7 = vadd.f32 %v1878_v31, %v3491_v39 }
 0x1ac   : > { %v1925_v48 = vpop.f32.mrf.mxu2 }
 0x1ad   : > { %v2021_v51 = vadd.f32 %v2020_v40, %v1972_v44  ;;  %v1926_v53 = vadd.f32 %v1925_v48, %v1877_v62 }
 0x1af   : > { %v2798_v50 = vpack.c.bf16 %v2021_v51, %v2019_v30  ;;  %v2078_v33 = vadd.f32 %v2077_v38, %v2021_v51  ;;  %v2100_v8 = vmul.f32 %v2021_v51, %v2021_v51 }
 0x1b0   : > { %v2023_v0 = vpop.f32.mrf.mxu0 }
 0x1b1   : > { %2825 = vst [vmem:[%s3518_s13 + $0x20] sm:$0xff] %v2798_v50   ;;  %v2115_v2 = vadd.f32 %v2114_v60, %v2100_v8 }
 0x1b2   : > { %v1974_v56 = vpop.f32.mrf.mxu3  ;;  %v1881_v59 = vpop.f32.mrf.mxu1 }
 0x1b3   : > { %v1975_v46 = vadd.f32 %v1974_v56, %v1926_v53  ;;  %v1882_v17 = vadd.f32 %v1881_v59, %v3498_v63 }
 0x1b4   : > { %v1927_v43 = vpop.f32.mrf.mxu2 }
 0x1b5   : > { %v2024_v57 = vadd.f32 %v2023_v0, %v1975_v46  ;;  %v1928_v6 = vadd.f32 %v1927_v43, %v1879_v7 }
 0x1b7   : > { %v2079_v24 = vadd.f32 %v2078_v33, %v2024_v57  ;;  %v2101_v3 = vmul.f32 %v2024_v57, %v2024_v57 }
 0x1b8   : > { %v2025_v32 = vpop.f32.mrf.mxu0 }
 0x1b9   : > { %v2116_v29 = vadd.f32 %v2115_v2, %v2101_v3 }
 0x1ba   : > { %v1976_v27 = vpop.f32.mrf.mxu3  ;;  %v1883_v23 = vpop.f32.mrf.mxu1 }
 0x1bb   : > { %v1977_v54 = vadd.f32 %v1976_v27, %v1928_v6  ;;  %v1884_v15 = vadd.f32 %v1883_v23, %v3502_v21 }
 0x1bc   : > { %v1930_v28 = vpop.f32.mrf.mxu2 }
 0x1bd   : > { %v2026_v5 = vadd.f32 %v2025_v32, %v1977_v54  ;;  %v1931_v4 = vadd.f32 %v1930_v28, %v1882_v17 }
 0x1bf   : > { %v2803_v10 = vpack.c.bf16 %v2026_v5, %v2024_v57  ;;  %v2080_v11 = vadd.f32 %v2079_v24, %v2026_v5  ;;  %v2102_v25 = vmul.f32 %v2026_v5, %v2026_v5 }
 0x1c0   : > { %v2028_v37 = vpop.f32.mrf.mxu0 }
 0x1c1   : > { %2826 = vst [vmem:[%s3518_s13 + $0x28] sm:$0xff] %v2803_v10   ;;  %v2117_v39 = vadd.f32 %v2116_v29, %v2102_v25 }
 0x1c2   : > { %v1979_v55 = vpop.f32.mrf.mxu3  ;;  %v1886_v63 = vpop.f32.mrf.mxu1 }
 0x1c3   : > { %v1980_v14 = vadd.f32 %v1979_v55, %v1931_v4  ;;  %v1887_v19 = vadd.f32 %v1886_v63, %v3506_v41 }
 0x1c4   : > { %v1932_v58 = vpop.f32.mrf.mxu2 }
 0x1c5   : > { %v2029_v47 = vadd.f32 %v2028_v37, %v1980_v14  ;;  %v1933_v22 = vadd.f32 %v1932_v58, %v1884_v15 }
 0x1c7   : > { %v2081_v18 = vadd.f32 %v2080_v11, %v2029_v47  ;;  %v2103_v9 = vmul.f32 %v2029_v47, %v2029_v47 }
 0x1c8   : > { %v2030_v45 = vpop.f32.mrf.mxu0 }
 0x1c9   : > { %v2118_v16 = vadd.f32 %v2117_v39, %v2103_v9 }
 0x1ca   : > { %v1981_v1 = vpop.f32.mrf.mxu3  ;;  %v1888_v12 = vpop.f32.mrf.mxu1 }
 0x1cb   : > { %v1982_v20 = vadd.f32 %v1981_v1, %v1933_v22  ;;  %v1889_v40 = vadd.f32 %v1888_v12, %v3508_v49 }
 0x1cc   : > { %v1935_v34 = vpop.f32.mrf.mxu2 }
 0x1cd   : > { %v2031_v61 = vadd.f32 %v2030_v45, %v1982_v20  ;;  %v1936_v36 = vadd.f32 %v1935_v34, %v1887_v19 }
 0x1cf   : > { %v2808_v26 = vpack.c.bf16 %v2031_v61, %v2029_v47  ;;  %v2082_v30 = vadd.f32 %v2081_v18, %v2031_v61  ;;  %v2104_v52 = vmul.f32 %v2031_v61, %v2031_v61 }
 0x1d0   : > { %v2033_v38 = vpop.f32.mrf.mxu0 }
 0x1d1   : > { %2827 = vst [vmem:[%s3518_s13 + $0x30] sm:$0xff] %v2808_v26   ;;  %v2119_v21 = vadd.f32 %v2118_v16, %v2104_v52 }
 0x1d2   : > { %v1984_v35 = vpop.f32.mrf.mxu3 }
 0x1d3   : > { %v1985_v13 = vadd.f32 %v1984_v35, %v1936_v36 }
 0x1d4   : > { %v1937_v42 = vpop.f32.mrf.mxu2 }
 0x1d5   : > { %v2034_v60 = vadd.f32 %v2033_v38, %v1985_v13  ;;  %v1938_v51 = vadd.f32 %v1937_v42, %v1889_v40 }
 0x1d7   : > { %v2083_v44 = vadd.f32 %v2082_v30, %v2034_v60  ;;  %v2105_v41 = vmul.f32 %v2034_v60, %v2034_v60 }
 0x1d8   : > { %v2035_v50 = vpop.f32.mrf.mxu0 }
 0x1d9   : > { %v2120_v62 = vadd.f32 %v2119_v21, %v2105_v41 }
 0x1da   : > { %v1986_v48 = vpop.f32.mrf.mxu3 }
 0x1db   : > { %v1987_v31 = vadd.f32 %v1986_v48, %v1938_v51 }
 0x1dd   : > { %v2036_v33 = vadd.f32 %v2035_v50, %v1987_v31 }
 0x1df   : > { %v2813_v8 = vpack.c.bf16 %v2036_v33, %v2034_v60  ;;  %v2084_v53 = vadd.f32 %v2083_v44, %v2036_v33  ;;  %v2106_v2 = vmul.f32 %v2036_v33, %v2036_v33 }
 0x1e1   : > { %2828 = vst [vmem:[%s3518_s13 + $0x38] sm:$0xff] %v2813_v8   ;;  %v2085_v0 = vrot.slane %v2084_v53, 4  ;;  %v2121_v56 = vadd.f32 %v2120_v62, %v2106_v2 }
 0x1e3   : > { %v2086_v49 = vadd.f32 %v2085_v0, %v2084_v53  ;;  %v2122_v46 = vrot.slane %v2121_v56, 4 }
 0x1e5   : > { %v2087_v57 = vrot.slane %v2086_v49, 2  ;;  %v2123_v7 = vadd.f32 %v2122_v46, %v2121_v56 }
 0x1e7   : > { %v2088_v43 = vadd.f32 %v2087_v57, %v2086_v49  ;;  %v2124_v59 = vrot.slane %v2123_v7, 2 }
 0x1e9   : > { %v2089_v24 = vrot.slane %v2088_v43, 1  ;;  %v2125_v3 = vadd.f32 %v2124_v59, %v2123_v7 }
 0x1eb   : > { %v2126_v6 = vrot.slane %v2125_v3, 1  ;;  %v2090_v29 = vadd.f32 %v2089_v24, %v2088_v43 }
 0x1ed   : > { %v2127_v32 = vadd.f32 %v2126_v6, %v2125_v3 }
 0x1ef   : > { %v2129_v27 = vsel %vm806_vm2, %v2090_v29, %v2127_v32 }
 0x1f0   : > { %2130 = vst [vmem:[%s484_s16] sm:$0x3] %v2129_v27 }
 0x1f1 PF: > { %s19_s28 = sadd.s32 1, %s2982_s28   ;;  %s3578_s24 = smov %s2974_s26 }
 0x1f2   : > { %p16_p2 = scmp.ge.s32.totalorder %s19_s28, 6   ;;  %s3579_s25 = smov %s2978_s27 }
 0x1f3   : > { %s3580_s26 = smov %s3583_s30  ;;  %s3581_s27 = smov %s3587_s8 }
 0x1f4   :  { %18 = sbr.rel (!%p16_p2) target bundleno = 3 (0x3), region = 97 }
 0x1f9   :  { %2185 = vsyncpa [#allocation3], 1 }
 0x1fa   :  { %2187 = vsyncpa [#allocation3 + $0x1], 1 }

</bundles_post_ra>
